<compile_context>
chip_gen: v7x
topology: tpu7x:2x2x1
jax: 0.10.0
libtpu: 0.0.40
codegen_flags: <defaults>
</compile_context>

<pallas_src>
import functools

import jax
import jax.numpy as jnp
import numpy as np
from jax.experimental import pallas as pl
from jax.experimental.pallas import tpu as pltpu


def _round_up(x, m):
    return ((x + m - 1) // m) * m


def _head_kernel(slow_ref, fast_ref, w_slow_ref, w_fast_ref, b_ref,
                 out_ref, acc_slow, acc_fast, *, inv_n_slow, inv_n_fast):
    """Grid = (batch_tiles, spatial_tiles); spatial reduction axis is LAST."""
    j = pl.program_id(1)

    @pl.when(j == 0)
    def _():
        acc_slow[...] = jnp.zeros_like(acc_slow)
        acc_fast[...] = jnp.zeros_like(acc_fast)

    # Sum-pool this spatial tile.  Channels are the lane (last) dim and are a
    # multiple of 128, so these are lane-dense VPU sublane-accumulate adds.
    # Accumulation is always in f32 scratch (inputs may be bf16).
    acc_slow[...] += jnp.sum(slow_ref[...].astype(jnp.float32), axis=1)
    acc_fast[...] += jnp.sum(fast_ref[...].astype(jnp.float32), axis=1)

    @pl.when(j == pl.num_programs(1) - 1)
    def _():
        # Each pathway divides by its own true element count (T_i * H * W).
        pooled_slow = acc_slow[...] * jnp.float32(inv_n_slow)
        pooled_fast = acc_fast[...] * jnp.float32(inv_n_fast)
        # concat(fast, slow) @ W  ==  fast @ W_fast + slow @ W_slow
        # -> no lane-axis concat / relayout needed.
        logits = jnp.dot(pooled_fast, w_fast_ref[...].astype(jnp.float32),
                         preferred_element_type=jnp.float32)
        logits = logits + jnp.dot(pooled_slow, w_slow_ref[...].astype(jnp.float32),
                                  preferred_element_type=jnp.float32)
        logits = logits + b_ref[...].astype(jnp.float32)
        out_ref[...] = logits.astype(out_ref.dtype)


def slowfast_head(x_slow, x_fast, w_fc, b_fc, *, max_batch_tile=8,
                  vmem_input_budget=24 * 1024 * 1024):
    """Fused SlowFast head: avg-pool(slow) + avg-pool(fast) -> concat -> fc.

    x_slow: (B, C_slow, T_s, H, W)    (e.g. C_slow = 2048)
    x_fast: (B, C_fast, T_f, H, W)    (e.g. C_fast = 256)
    w_fc:   (num_classes, C_fast + C_slow)   PyTorch layout (fast columns first,
                                             matching torch.cat((x_fast, x_slow), 1))
    b_fc:   (num_classes,)
    Returns (B, num_classes) float32 logits.
    """
    B, Cs, Ts, Hs, Ws = x_slow.shape
    Bf, Cf, Tf, Hf, Wf = x_fast.shape
    assert B == Bf
    assert w_fc.shape[1] == Cf + Cs
    num_classes = w_fc.shape[0]
    n_slow = Ts * Hs * Ws
    n_fast = Tf * Hf * Wf

    # ---- Channel-last, lane-dense layout: (B, spatial, C). ----
    xs = jnp.transpose(x_slow, (0, 2, 3, 4, 1)).reshape(B, n_slow, Cs)
    xf = jnp.transpose(x_fast, (0, 2, 3, 4, 1)).reshape(B, n_fast, Cf)

    # Pad channels to multiples of 128 (zero padding is a no-op for sum + matmul).
    Cs_p = _round_up(Cs, 128)
    Cf_p = _round_up(Cf, 128)
    if Cs_p != Cs:
        xs = jnp.pad(xs, ((0, 0), (0, 0), (0, Cs_p - Cs)))
    if Cf_p != Cf:
        xf = jnp.pad(xf, ((0, 0), (0, 0), (0, Cf_p - Cf)))

    # ---- Batch tiling. ----
    tb = min(B, max_batch_tile)
    B_p = _round_up(B, tb)
    if B_p != B:
        xs = jnp.pad(xs, ((0, B_p - B), (0, 0), (0, 0)))
        xf = jnp.pad(xf, ((0, B_p - B), (0, 0), (0, 0)))

    # ---- Spatial tiling: num_steps so a double-buffered (slow + fast) tile pair
    #      fits the VMEM budget (conservative for v7x's 64 MiB / core VMEM). ----
    itemsize = xs.dtype.itemsize
    per_step_full = 2 * tb * itemsize * (n_slow * Cs_p + n_fast * Cf_p)
    num_steps = max(1, -(-per_step_full // vmem_input_budget))
    t_slow = _round_up(-(-n_slow // num_steps), 8)
    t_fast = _round_up(-(-n_fast // num_steps), 8)
    ns_p = num_steps * t_slow
    nf_p = num_steps * t_fast
    if ns_p != n_slow:
        xs = jnp.pad(xs, ((0, 0), (0, ns_p - n_slow), (0, 0)))
    if nf_p != n_fast:
        xf = jnp.pad(xf, ((0, 0), (0, nf_p - n_fast), (0, 0)))

    # ---- FC weight split: concat order in the reference is (fast, slow). ----
    w_fast = jnp.transpose(w_fc[:, :Cf])   # (Cf, num_classes)
    w_slow = jnp.transpose(w_fc[:, Cf:])   # (Cs, num_classes)
    # Pad num_classes to a lane-dense multiple of 128 (unmasked vst on the output).
    N_p = _round_up(max(num_classes, 128), 128)
    w_fast = jnp.pad(w_fast, ((0, Cf_p - Cf), (0, N_p - num_classes))).astype(jnp.float32)
    w_slow = jnp.pad(w_slow, ((0, Cs_p - Cs), (0, N_p - num_classes))).astype(jnp.float32)
    bias = jnp.pad(b_fc, (0, N_p - num_classes)).reshape(1, N_p).astype(jnp.float32)

    grid = (B_p // tb, num_steps)

    kernel = functools.partial(_head_kernel,
                               inv_n_slow=1.0 / float(n_slow),
                               inv_n_fast=1.0 / float(n_fast))

    # Rough VMEM sizing (double-buffered input tiles + resident weights/scratch/out).
    per_step_in = 2 * tb * itemsize * (t_slow * Cs_p + t_fast * Cf_p)
    weight_bytes = (Cs_p + Cf_p + 1) * N_p * 4
    scratch_bytes = tb * (Cs_p + Cf_p) * 4
    out_bytes = 2 * tb * N_p * 4
    vmem_limit = int(min(max(int(1.5 * (per_step_in + 2 * weight_bytes
                                        + scratch_bytes + out_bytes)),
                             32 * 1024 * 1024),
                         100 * 1024 * 1024))

    flops = 2 * B_p * (Cs_p + Cf_p) * N_p + B_p * (ns_p * Cs_p + nf_p * Cf_p)
    bytes_accessed = (xs.size * itemsize + xf.size * itemsize
                      + (w_slow.size + w_fast.size + bias.size) * 4
                      + B_p * N_p * 4)

    out = pl.pallas_call(
        kernel,
        out_shape=jax.ShapeDtypeStruct((B_p, N_p), jnp.float32),
        grid_spec=pltpu.PrefetchScalarGridSpec(
            num_scalar_prefetch=0,
            grid=grid,
            in_specs=[
                pl.BlockSpec((tb, t_slow, Cs_p), lambda i, j: (i, j, 0)),
                pl.BlockSpec((tb, t_fast, Cf_p), lambda i, j: (i, j, 0)),
                pl.BlockSpec((Cs_p, N_p), lambda i, j: (0, 0)),   # resident weights
                pl.BlockSpec((Cf_p, N_p), lambda i, j: (0, 0)),
                pl.BlockSpec((1, N_p), lambda i, j: (0, 0)),
            ],
            out_specs=pl.BlockSpec((tb, N_p), lambda i, j: (i, 0)),
            scratch_shapes=[
                pltpu.VMEM((tb, Cs_p), jnp.float32),   # f32 pooled-sum accumulators
                pltpu.VMEM((tb, Cf_p), jnp.float32),
            ],
        ),
        compiler_params=pltpu.CompilerParams(
            dimension_semantics=("parallel", "arbitrary"),
            vmem_limit_bytes=vmem_limit,
        ),
        cost_estimate=pl.CostEstimate(flops=flops, transcendentals=0,
                                      bytes_accessed=bytes_accessed),
    )(xs, xf, w_slow, w_fast, bias)

    return out[:B, :num_classes]


if __name__ == "__main__":
    key = jax.random.PRNGKey(0)
    k1, k2, k3, k4 = jax.random.split(key, 4)

    # Small-but-faithful shapes: real SlowFast channel counts (2048 slow, 256 fast),
    # tiny batch / temporal / spatial extents.
    B = 2
    C_slow, T_slow, H, W = 2048, 4, 7, 7
    C_fast, T_fast = 256, 16
    num_classes = 10

    x_slow = jax.random.normal(k1, (B, C_slow, T_slow, H, W), dtype=jnp.float32)
    x_fast = jax.random.normal(k2, (B, C_fast, T_fast, H, W), dtype=jnp.float32)
    w_fc = 0.02 * jax.random.normal(k3, (num_classes, C_fast + C_slow), dtype=jnp.float32)
    b_fc = 0.02 * jax.random.normal(k4, (num_classes,), dtype=jnp.float32)

    # Small VMEM budget here just to force multi-step spatial tiling so the
    # accumulator path (zero -> accumulate -> finalize) is exercised in the demo.
    out = jax.block_until_ready(
        slowfast_head(x_slow, x_fast, w_fc, b_fc,
                      vmem_input_budget=4 * 1024 * 1024))

    # Pure-JAX reference of the PyTorch head (pool -> concat(fast, slow) -> fc).
    ps = jnp.mean(x_slow, axis=(2, 3, 4))
    pf = jnp.mean(x_fast, axis=(2, 3, 4))
    ref = jnp.concatenate([pf, ps], axis=1) @ w_fc.T + b_fc

    np.testing.assert_allclose(np.asarray(out), np.asarray(ref), rtol=1e-3, atol=1e-3)
    print("KERNEL_OK")
</pallas_src>

<mosaic_0001>
module attributes {stable_mosaic.version = 11 : i64} {
  func.func @_head_kernel(%arg0: i32, %arg1: i32, %arg2: memref<2x72x2048xf32, #tpu.memory_space<vmem>>, %arg3: memref<2x264x256xf32, #tpu.memory_space<vmem>>, %arg4: memref<2048x128xf32, #tpu.memory_space<vmem>>, %arg5: memref<256x128xf32, #tpu.memory_space<vmem>>, %arg6: memref<1x128xf32, #tpu.memory_space<vmem>>, %arg7: memref<2x128xf32, #tpu.memory_space<vmem>>, %arg8: memref<2x2048xf32, #tpu.memory_space<vmem>>, %arg9: memref<2x256xf32, #tpu.memory_space<vmem>>) attributes {dimension_semantics = [#tpu.dimension_semantics<parallel>, #tpu.dimension_semantics<arbitrary>], iteration_bounds = array<i64: 1, 3>, scalar_prefetch = 0 : i64, scratch_operands = 2 : i64, tpu.core_type = #tpu.core_type<tc>, window_params = [{transform_indices = @transform_0, window_bounds = array<i64: 2, 72, 2048>}, {transform_indices = @transform_1, window_bounds = array<i64: 2, 264, 256>}, {pipeline_mode = #tpu.pipeline_mode<synchronous>, transform_indices = @transform_2, window_bounds = array<i64: 2048, 128>}, {pipeline_mode = #tpu.pipeline_mode<synchronous>, transform_indices = @transform_3, window_bounds = array<i64: 256, 128>}, {pipeline_mode = #tpu.pipeline_mode<synchronous>, transform_indices = @transform_4, window_bounds = array<i64: 1, 128>}, {transform_indices = @transform_5, window_bounds = array<i64: 2, 128>}]} {
    %c0_i32 = arith.constant 0 : i32
    %0 = arith.cmpi eq, %arg1, %c0_i32 : i32
    %1 = arith.extui %0 : i1 to i32
    %c0_i32_0 = arith.constant 0 : i32
    %2 = arith.cmpi ne, %1, %c0_i32_0 : i32
    scf.if %2 {
      %cst_16 = arith.constant 0.000000e+00 : f32
      %16 = vector.broadcast %cst_16 : f32 to vector<2x2048xf32>
      %c0_17 = arith.constant 0 : index
      %c0_18 = arith.constant 0 : index
      %17 = vector.load %arg8[%c0_17, %c0_18] : memref<2x2048xf32, #tpu.memory_space<vmem>>, vector<2x2048xf32>
      tpu.vector_store %arg8[%c0_17, %c0_18], %16 {strides = array<i32>} : memref<2x2048xf32, #tpu.memory_space<vmem>>, vector<2x2048xf32>,
      %cst_19 = arith.constant 0.000000e+00 : f32
      %18 = vector.broadcast %cst_19 : f32 to vector<2x256xf32>
      %c0_20 = arith.constant 0 : index
      %c0_21 = arith.constant 0 : index
      %19 = vector.load %arg9[%c0_20, %c0_21] : memref<2x256xf32, #tpu.memory_space<vmem>>, vector<2x256xf32>
      tpu.vector_store %arg9[%c0_20, %c0_21], %18 {strides = array<i32>} : memref<2x256xf32, #tpu.memory_space<vmem>>, vector<2x256xf32>,
    } else {
    }
    %c0 = arith.constant 0 : index
    %c0_1 = arith.constant 0 : index
    %3 = vector.load %arg8[%c0, %c0_1] : memref<2x2048xf32, #tpu.memory_space<vmem>>, vector<2x2048xf32>
    %c0_2 = arith.constant 0 : index
    %c0_3 = arith.constant 0 : index
    %c0_4 = arith.constant 0 : index
    %4 = vector.load %arg2[%c0_2, %c0_3, %c0_4] : memref<2x72x2048xf32, #tpu.memory_space<vmem>>, vector<2x72x2048xf32>
    %cst = arith.constant dense<0.000000e+00> : vector<2x2048xf32>
    %5 = vector.multi_reduction <add>, %4, %cst [1] : vector<2x72x2048xf32> to vector<2x2048xf32>
    %6 = arith.addf %3, %5 : vector<2x2048xf32>
    %c0_5 = arith.constant 0 : index
    %c0_6 = arith.constant 0 : index
    %7 = vector.load %arg8[%c0_5, %c0_6] : memref<2x2048xf32, #tpu.memory_space<vmem>>, vector<2x2048xf32>
    tpu.vector_store %arg8[%c0_5, %c0_6], %6 {strides = array<i32>} : memref<2x2048xf32, #tpu.memory_space<vmem>>, vector<2x2048xf32>,
    %c0_7 = arith.constant 0 : index
    %c0_8 = arith.constant 0 : index
    %8 = vector.load %arg9[%c0_7, %c0_8] : memref<2x256xf32, #tpu.memory_space<vmem>>, vector<2x256xf32>
    %c0_9 = arith.constant 0 : index
    %c0_10 = arith.constant 0 : index
    %c0_11 = arith.constant 0 : index
    %9 = vector.load %arg3[%c0_9, %c0_10, %c0_11] : memref<2x264x256xf32, #tpu.memory_space<vmem>>, vector<2x264x256xf32>
    %cst_12 = arith.constant dense<0.000000e+00> : vector<2x256xf32>
    %10 = vector.multi_reduction <add>, %9, %cst_12 [1] : vector<2x264x256xf32> to vector<2x256xf32>
    %11 = arith.addf %8, %10 : vector<2x256xf32>
    %c0_13 = arith.constant 0 : index
    %c0_14 = arith.constant 0 : index
    %12 = vector.load %arg9[%c0_13, %c0_14] : memref<2x256xf32, #tpu.memory_space<vmem>>, vector<2x256xf32>
    tpu.vector_store %arg9[%c0_13, %c0_14], %11 {strides = array<i32>} : memref<2x256xf32, #tpu.memory_space<vmem>>, vector<2x256xf32>,
    %c2_i32 = arith.constant 2 : i32
    %13 = arith.cmpi eq, %arg1, %c2_i32 : i32
    %14 = arith.extui %13 : i1 to i32
    %c0_i32_15 = arith.constant 0 : i32
    %15 = arith.cmpi ne, %14, %c0_i32_15 : i32
    scf.if %15 {
      %c0_16 = arith.constant 0 : index
      %c0_17 = arith.constant 0 : index
      %16 = vector.load %arg8[%c0_16, %c0_17] : memref<2x2048xf32, #tpu.memory_space<vmem>>, vector<2x2048xf32>
      %cst_18 = arith.constant 0.00510204071 : f32
      %17 = vector.broadcast %cst_18 : f32 to vector<2x2048xf32>
      %18 = arith.mulf %16, %17 : vector<2x2048xf32>
      %c0_19 = arith.constant 0 : index
      %c0_20 = arith.constant 0 : index
      %19 = vector.load %arg9[%c0_19, %c0_20] : memref<2x256xf32, #tpu.memory_space<vmem>>, vector<2x256xf32>
      %cst_21 = arith.constant 0.00127551018 : f32
      %20 = vector.broadcast %cst_21 : f32 to vector<2x256xf32>
      %21 = arith.mulf %19, %20 : vector<2x256xf32>
      %c0_22 = arith.constant 0 : index
      %c0_23 = arith.constant 0 : index
      %22 = vector.load %arg5[%c0_22, %c0_23] : memref<256x128xf32, #tpu.memory_space<vmem>>, vector<256x128xf32>
      %cst_24 = arith.constant dense<0.000000e+00> : vector<2x128xf32>
      %23 = tpu.matmul %21, %22, %cst_24 {dimension_numbers = #tpu.dot_dimension_numbers<[1], [0], [0], [1], [0, 0, 1, 1], [], []>} : vector<2x256xf32>, vector<256x128xf32>, vector<2x128xf32> -> vector<2x128xf32>
      %c0_25 = arith.constant 0 : index
      %c0_26 = arith.constant 0 : index
      %24 = vector.load %arg4[%c0_25, %c0_26] : memref<2048x128xf32, #tpu.memory_space<vmem>>, vector<2048x128xf32>
      %cst_27 = arith.constant dense<0.000000e+00> : vector<2x128xf32>
      %25 = tpu.matmul %18, %24, %cst_27 {dimension_numbers = #tpu.dot_dimension_numbers<[1], [0], [0], [1], [0, 0, 1, 1], [], []>} : vector<2x2048xf32>, vector<2048x128xf32>, vector<2x128xf32> -> vector<2x128xf32>
      %26 = arith.addf %23, %25 : vector<2x128xf32>
      %c0_28 = arith.constant 0 : index
      %c0_29 = arith.constant 0 : index
      %27 = vector.load %arg6[%c0_28, %c0_29] : memref<1x128xf32, #tpu.memory_space<vmem>>, vector<1x128xf32>
      %28 = vector.broadcast %27 : vector<1x128xf32> to vector<2x128xf32>
      %29 = arith.addf %26, %28 : vector<2x128xf32>
      %c0_30 = arith.constant 0 : index
      %c0_31 = arith.constant 0 : index
      %30 = vector.load %arg7[%c0_30, %c0_31] : memref<2x128xf32, #tpu.memory_space<vmem>>, vector<2x128xf32>
      tpu.vector_store %arg7[%c0_30, %c0_31], %29 {strides = array<i32>} : memref<2x128xf32, #tpu.memory_space<vmem>>, vector<2x128xf32>,
    } else {
    }
    return
  }
  func.func @transform_0(%arg0: i32, %arg1: i32) -> (i32, i32, i32) {
    %c0_i32 = arith.constant 0 : i32
    %c0_i32_0 = arith.constant 0 : i32
    return %arg0, %arg1, %c0_i32 : i32, i32, i32
  }
  func.func @transform_1(%arg0: i32, %arg1: i32) -> (i32, i32, i32) {
    %c0_i32 = arith.constant 0 : i32
    %c0_i32_0 = arith.constant 0 : i32
    return %arg0, %arg1, %c0_i32 : i32, i32, i32
  }
  func.func @transform_2(%arg0: i32, %arg1: i32) -> (i32, i32) {
    %c0_i32 = arith.constant 0 : i32
    %c0_i32_0 = arith.constant 0 : i32
    %c0_i32_1 = arith.constant 0 : i32
    return %c0_i32, %c0_i32_0 : i32, i32
  }
  func.func @transform_3(%arg0: i32, %arg1: i32) -> (i32, i32) {
    %c0_i32 = arith.constant 0 : i32
    %c0_i32_0 = arith.constant 0 : i32
    %c0_i32_1 = arith.constant 0 : i32
    return %c0_i32, %c0_i32_0 : i32, i32
  }
  func.func @transform_4(%arg0: i32, %arg1: i32) -> (i32, i32) {
    %c0_i32 = arith.constant 0 : i32
    %c0_i32_0 = arith.constant 0 : i32
    %c0_i32_1 = arith.constant 0 : i32
    return %c0_i32, %c0_i32_0 : i32, i32
  }
  func.func @transform_5(%arg0: i32, %arg1: i32) -> (i32, i32) {
    %c0_i32 = arith.constant 0 : i32
    %c0_i32_0 = arith.constant 0 : i32
    return %arg0, %c0_i32 : i32, i32
  }
}

</mosaic_0001>

<bundles_post_ra>
// kernel: tpu_custom_call.1
= control target key start
LH: loop header
LB: loop body
LE: loop exit
PB: predicated region body
PF: predicated region fallthrough
CT: control target
= control target key end

     0   :  { %s4736_s0 = inlined_call_operand.hbm [shape: f32[2,216,2048], index: 0, kind: input, shape index: {}]   ;;  %s4737_s1 = inlined_call_operand.hbm [shape: f32[2,792,256], index: 1, kind: input, shape index: {}]   ;;  %s4738_s2 = inlined_call_operand.hbm [shape: f32[2048,128], index: 2, kind: input, shape index: {}]   ;;  %s4739_s3 = inlined_call_operand.hbm [shape: f32[256,128], index: 3, kind: input, shape index: {}]   ;;  %s4740_s4 = inlined_call_operand.hbm [shape: f32[1,128], index: 4, kind: input, shape index: {}]   ;;  %s4741_s5 = inlined_call_operand.hbm [shape: f32[2,128], index: 5, kind: output, shape index: {}]  }
   0x1   :  { %4747 = sst [smem:[#allocation28_spill]] %s4739_s3 }
   0x2   :  { %10 = vsyncpa [#allocation5], 0 }
   0x3   :  { %12 = vsyncpa [#allocation5 + $0x1], 0 }
   0x4   :  { %13 = vsyncpa [#allocation8], 0 }
   0x5   :  { %15 = vsyncpa [#allocation8 + $0x1], 0 }
   0x6   :  { %16 = vsyncpa [#allocation11], 0 }
   0x7   :  { %17 = vsyncpa [#allocation6], 0  ;;  %s3826_s18 = smov 0   ;;  %s3828_s19 = smov 0  }
   0x8   :  { %s3830_s20 = smov 0   ;;  %s3832_s21 = smov 0  }
   0x9   :  { %s3834_s22 = smov 0   ;;  %s3836_s23 = smov 0  }
   0xa LB: > { %s3855_s24 = sadd.s32 4294967295, %s3774_s23   ;;  %s32_s25 = sadd.s32 1, %s3770_s22  ;;  %s3774_s23 = sphi %s3836_s23, %s23_s23   ;;  %s3770_s22 = sphi %s3834_s22, %s4771_s22   ;;  %s3766_s21 = sphi %s3832_s21, %s4770_s21   ;;  %s3762_s20 = sphi %s3830_s20, %s4769_s20   ;;  %s3758_s19 = sphi %s3828_s19, %s4768_s19   ;;  %s3754_s18 = sphi %s3826_s18, %s4767_s18  }
   0xb   : > { %p33_p0 = scmp.ge.s32.totalorder %s32_s25, 3  ;;  %s44_s26 = sadd.s32 1, %s3762_s20 }
   0xc   : > { %p51_p1 = scmp.ne.s32.totalorder %s3762_s20, %s3758_s19  ;;  %p52_p2 = scmp.eq.s32.totalorder %s3774_s23, 0 }
   0xd   : > { %s4773_s25 = smov (%p33_p0, %s32_s25), 0  ;;  %p57_p4 = scmp.ne.s32.totalorder %s3758_s19, %s3754_s18 }
   0xe   : > { %4748 = sst [smem:[#allocation25_spill]] %s4773_s25  ;;  %p3864_p3 = por %p52_p2, %p51_p1 }
   0xf   : > { %s40_s28 = ssub.s32 %s3770_s22, %s4773_s25  ;;  %p4742_p5 = scmp.eq.s32.totalorder %s3855_s24, 0 }
  0x10   : > { %s4749_s27 = scalar_select %p3864_p3, 1, 0 }
  0x11   : > { %p42_p6 = scmp.eq.s32.totalorder %s40_s28, 0  ;;  %p2841_p7 = scmp.ge.s32.totalorder %s3774_s23, 1 }
  0x12   : > { %p3875_p8 = por %p4742_p5, %p57_p4  ;;  %p185_p9 = scmp.lt.s32.totalorder %s3774_s23, 4 }
  0x13   : > { %s3881_s30 = scalar_select %p42_p6, %s3762_s20, %s44_s26  }
  0x14   : > { %s4750_s29 = scalar_select %p3875_p8, 1, 0 }
  0x15   : > { %p3883_p10 = pnand %p2841_p7, %p185_p9  ;;  %s3776_s7 = smov [#allocation10]  }
  0x16   : > { %s210_s8 = sshll.u32 %s3776_s7, 4  ;;  %s3777_s10 = smov [#allocation9]   ;;  %s211_s8 = int_to_ptr.vmem [resolvable:$true] %s210_s8 }
  0x17   : > { %s4751_s6 = scalar_select %p3883_p10, 1, 0 }
  0x18   : > { %p3512_p11 = pneg %p3883_p10  ;;  %s197_s11 = sshll.u32 %s3777_s10, 4  ;;  %s198_s11 = int_to_ptr.vmem [resolvable:$true] %s197_s11 }
  0x19   : > { %s4753_s3 = sld [smem:[#allocation28_spill]] }
  0x1a   : > { %p3891_p12 = pnand %p3512_p11, %p4742_p5 }
  0x1c   : > { %p3903_p0 = pneg %p3891_p12 }
  0x1f   : > { %s3598_s14 = scalar_lea.hbm %s4753_s3, 4096 }
  0x20   : > { %p3599_p13 = scmp.ne.s32.totalorder %s4753_s3, %s3598_s14  ;;  %p3605_p4 = scmp.lt.u32.totalorder %s3598_s14, %s4753_s3 }
  0x22   : > { %p3601_p1 = pnand %p3903_p0, %p3599_p13 }
  0x24   : > { %p3602_p2 = pneg %p3601_p1 }
  0x26   : > { %p3607_p6 = pnand %p3605_p4, %p3602_p2 }
  0x28   : > { %3610 = shalt.err (!%p3607_p6)
}
  0x29   : > { %s3611_s28 = scalar_lea.vmem %s211_s8, 4096  ;;  %p3619_p5 = scmp.lt.s32.totalorder %s211_s8, %s211_s8 }
  0x2a   : > { %p3612_p7 = scmp.ne.s32.totalorder %s211_s8, %s3611_s28  ;;  %p3620_p8 = scmp.lt.s32.totalorder %s3611_s28, %s3611_s28 }
  0x2c   : > { %p3614_p9 = pnand %p3612_p7, %p3903_p0  ;;  %p3621_p10 = por %p3620_p8, %p3619_p5 }
  0x2e   : > { %p3615_p11 = pneg %p3614_p9 }
  0x30   : > { %p3622_p3 = pnand %p3621_p10, %p3615_p11 }
  0x32   : > { %3625 = shalt.err (!%p3622_p3)
}
  0x33   : > { %s3778_s7 = smov 128   ;;  %s3779_s10 = smov 8  }
  0x34   : > { %3518 = dma.hbm_to_vmem [thread:$0]  (!%p3891_p12), %s4753_s3, 4096, %s211_s8, [#allocation11], %s3778_s7, %s3778_s7, %s3779_s10  }
  0x35   : > { %s3626_s16 = scalar_lea.hbm %s4738_s2, 32768 }
  0x36   : > { %p3627_p5 = scmp.ne.s32.totalorder %s4738_s2, %s3626_s16  ;;  %p3633_p10 = scmp.lt.u32.totalorder %s3626_s16, %s4738_s2 }
  0x38   : > { %p3629_p3 = pnand %p3627_p5, %p3903_p0 }
  0x3a   : > { %p3630_p8 = pneg %p3629_p3 }
  0x3c   : > { %p3635_p13 = pnand %p3633_p10, %p3630_p8 }
  0x3e   : > { %3638 = shalt.err (!%p3635_p13)
}
  0x3f   : > { %s3639_s12 = scalar_lea.vmem %s198_s11, 32768  ;;  %p3647_p6 = scmp.lt.s32.totalorder %s198_s11, %s198_s11 }
  0x40   : > { %p3640_p1 = scmp.ne.s32.totalorder %s198_s11, %s3639_s12  ;;  %p3648_p7 = scmp.lt.s32.totalorder %s3639_s12, %s3639_s12 }
  0x42   : > { %p3642_p2 = pnand %p3640_p1, %p3903_p0  ;;  %p3649_p9 = por %p3648_p7, %p3647_p6 }
  0x44   : > { %p3643_p4 = pneg %p3642_p2 }
  0x46   : > { %p3650_p11 = pnand %p3649_p9, %p3643_p4 }
  0x48   : > { %3653 = shalt.err (!%p3650_p11)
}
  0x49   : > { %3515 = dma.hbm_to_vmem [thread:$0]  (!%p3891_p12), %s4738_s2, 32768, %s198_s11, [#allocation8], %s3778_s7, %s3778_s7, %s3779_s10  }
  0x4a   : > { %s3780_s25 = smov [#allocation12]   ;;  %s3654_s18 = scalar_lea.hbm %s4740_s4, 16 }
  0x4b   : > { %s224_s14 = sshll.u32 %s3780_s25, 4  ;;  %p3655_p5 = scmp.ne.s32.totalorder %s4740_s4, %s3654_s18  ;;  %s225_s14 = int_to_ptr.vmem [resolvable:$true] %s224_s14 }
  0x4c   : > { %p3661_p10 = scmp.lt.u32.totalorder %s3654_s18, %s4740_s4 }
  0x4d   : > { %p3657_p3 = pnand %p3655_p5, %p3903_p0 }
  0x4f   : > { %p3658_p8 = pneg %p3657_p3 }
  0x51   : > { %p3663_p13 = pnand %p3661_p10, %p3658_p8 }
  0x53   : > { %3666 = shalt.err (!%p3663_p13)
}
  0x54   : > { %s3667_s11 = scalar_lea.vmem %s225_s14, 16  ;;  %s3674_s7 = scalar_lea.vmem %s225_s14, 32 }
  0x55   : > { %p3668_p1 = scmp.ne.s32.totalorder %s225_s14, %s3667_s11  ;;  %p3675_p6 = scmp.lt.s32.totalorder %s225_s14, %s225_s14 }
  0x56   : > { %p3676_p7 = scmp.lt.s32.totalorder %s3674_s7, %s3667_s11 }
  0x57   : > { %p3670_p2 = pnand %p3668_p1, %p3903_p0 }
  0x58   : > { %p3677_p9 = por %p3676_p7, %p3675_p6 }
  0x59   : > { %p3671_p4 = pneg %p3670_p2 }
  0x5b   : > { %p3678_p11 = pnand %p3677_p9, %p3671_p4 }
  0x5d   : > { %3681 = shalt.err (!%p3678_p11)
}
  0x5e   : > { %3521 = dma.hbm_to_vmem [thread:$0]  (!%p3891_p12), %s4740_s4, 16, %s225_s14, [#allocation11]  }
  0x5f   : > { %p2845_p5 = scmp.ge.s32.totalorder %s3774_s23, 3 }
  0x61   : > { %231 = sbr.rel (%p2845_p5) target bundleno = 134 (0x86), region = 28 }
  0x68   : > { %s3957_s3 = sand.u32 1, %s3762_s20   ;;  %s2869_s17 = smul.u32 18432, %s3770_s22 }
  0x69   : > { %s3474_s9 = smul.u32 2304, %s3957_s3  ;;  %s3781_s13 = smov 55296  }
  0x6a   : > { %p4755_p0 = scmp.ne.s32.totalorder %s4749_s27, 0  ;;  %s249_s16 = scalar_lea.hbm %s4736_s0, %s2869_s17 }
  0x6b   : > { %s239_s26 = scalar_lea.vmem [#allocation4], %s3474_s9  ;;  %s3782_s12 = smov 18432  }
  0x6c   : > { %3485 = sst [smem:[#allocation15]] (%p4755_p0), %s3781_s13  ;;  %s262_s28 = sshll.u32 %s239_s26, 4  ;;  %s263_s28 = int_to_ptr.vmem [resolvable:$true] %s262_s28 }
  0x6d   : > { %s3484_s25 = scalar_select %p4755_p0, [#allocation0], [#allocation18] }
  0x6e   : > { %3486 = sst [smem:[#allocation15 + $0x1]] (%p4755_p0), %s3782_s12  ;;  %s3783_s11 = smov 9  }
  0x6f   : > { %s254_s18 = sld [smem:[%s3484_s25]]   ;;  %s3784_s7 = smov 2048  }
  0x70   : > { %3487 = sst [smem:[#allocation15 + $0x2]] (%p4755_p0), %s3783_s11  ;;  %s3785_s10 = smov 128  }
  0x71   : > { %3488 = sst [smem:[#allocation15 + $0x3]] (%p4755_p0), %s3784_s7  ;;  %s236_s9 = scalar_lea.sflag [#allocation5], %s3957_s3 }
  0x72   : > { %3489 = sst [smem:[#allocation15 + $0x4]] (%p4755_p0), %s3784_s7  ;;  %s3786_s13 = smov [#allocation14]  }
  0x73   : > { %3490 = sst [smem:[#allocation15 + $0x5]] (%p4755_p0), %s3785_s10 }
  0x75   : > { %s2848_s8 = sshll.u32 %s254_s18, 26 }
  0x76   : > { %s2849_s17 = sadd.s32 134217728, %s2848_s8 }
  0x77   : > { %3491 = dma.general (%p4755_p0), %s249_s16, 36864, %s263_s28, %s236_s9, %s3786_s13, [#allocation15], %s2849_s17, 0  }
  0x78   : > { %s285_s25 = sand.u32 1, %s3774_s23   ;;  %s3475_s14 = smul.u32 1056, %s3957_s3 }
  0x79   : > { %s2870_s15 = smul.u32 8448, %s3770_s22  ;;  %s3787_s7 = smov 25344  }
  0x7a   : > { %s3492_s11 = scalar_select %p4755_p0, [#allocation0], [#allocation19] }
  0x7b   : > { %s299_s18 = scalar_lea.hbm %s4737_s1, %s2870_s15  ;;  %s289_s16 = scalar_lea.vmem [#allocation7], %s3475_s14 }
  0x7c   : > { %s312_s28 = sshll.u32 %s289_s16, 4  ;;  %3493 = sst [smem:[#allocation17]] (%p4755_p0), %s3787_s7  ;;  %s313_s28 = int_to_ptr.vmem [resolvable:$true] %s312_s28 }
  0x7d   : > { %s304_s10 = sld [smem:[%s3492_s11]]   ;;  %s3788_s8 = smov 8448  }
  0x7e   : > { %3494 = sst [smem:[#allocation17 + $0x1]] (%p4755_p0), %s3788_s8  ;;  %s3789_s3 = smov 33  }
  0x7f   : > { %3495 = sst [smem:[#allocation17 + $0x2]] (%p4755_p0), %s3789_s3  ;;  %s3790_s17 = smov 256  }
  0x80   : > { %3496 = sst [smem:[#allocation17 + $0x3]] (%p4755_p0), %s3790_s17  ;;  %s3791_s9 = smov 16  }
  0x81   : > { %3497 = sst [smem:[#allocation17 + $0x4]] (%p4755_p0), %s3790_s17  ;;  %s286_s15 = scalar_lea.sflag [#allocation8], %s285_s25 }
  0x82   : > { %3498 = sst [smem:[#allocation17 + $0x5]] (%p4755_p0), %s3791_s9  ;;  %s3792_s26 = smov [#allocation16]  }
  0x83   : > { %s2852_s13 = sshll.u32 %s304_s10, 26 }
  0x84   : > { %s2853_s14 = sadd.s32 134217728, %s2852_s13 }
  0x85   : > { %3499 = dma.general (%p4755_p0), %s299_s18, 16896, %s313_s28, %s286_s15, %s3792_s26, [#allocation17], %s2853_s14, 0  }
  0x86 PF: > { %p4756_p12 = scmp.ne.s32.totalorder %s4751_s6, 0 }
  0x88   : > { %337 = sbr.rel (%p4756_p12) target bundleno = 792 (0x318), region = 40 }
  0x8f   : > { %s339_s12 = sand.u32 1, %s3758_s19   ;;  %p4757_p3 = scmp.ne.s32.totalorder %s4750_s29, 0 }
  0x90   : > { %s3476_s11 = smul.u32 2304, %s339_s12  ;;  %s340_s16 = scalar_lea.sflag [#allocation5], %s339_s12 }
  0x92   : > { %s4006_s7 = scalar_lea.vmem [#allocation4], %s3476_s11 }
  0x93   : > { %3733 = dma.done.wait (%p4757_p3), %s340_s16, 36864  }
  0x94   : > { %3735 = vsyncadd (%p4757_p3), %s340_s16, 4294930432  ;;  %s348_s27 = sand.u32 1, %s3855_s24   ;;  %s3477_s25 = smul.u32 1056, %s339_s12 }
  0x95   : > { %s349_s18 = scalar_lea.sflag [#allocation8], %s348_s27 }
  0x96   : > { %s4013_s28 = scalar_lea.vmem [#allocation7], %s3477_s25 }
  0x97   : > { %3737 = dma.done.wait (%p4757_p3), %s349_s18, 16896  }
  0x98   : > { %3739 = vsyncadd (%p4757_p3), %s349_s18, 4294950400  ;;  %p4758_p8 = scmp.eq.s32.totalorder %s3855_s24, 0 }
  0x9a   : > { %3741 = dma.done.wait (%p4758_p8), [#allocation8], 32768   ;;  %p4759_p10 = pmov %p4758_p8 }
  0x9b   : > { %p4760_p13 = pmov %p4758_p8 }
  0x9c   : > { %3743 = vsyncadd (%p4759_p10), [#allocation8], 4294934528 }
  0x9d   : > { %3745 = dma.done.wait (%p4760_p13), [#allocation11], 4112   ;;  %p4761_p1 = pmov %p4758_p8 }
  0x9e   : > { %p2858_p2 = scmp.ne.s32.totalorder %s3766_s21, 0 }
  0x9f   : > { %3747 = vsyncadd (%p4761_p1), [#allocation11], 4294963184  ;;  %v3793_v0 = vmov (!%p2858_p2), 0.0  }
  0xa0   : > { %398 = sbr.rel (%p2858_p2) target bundleno = 167 (0xa7), region = 64  ;;  %399 = vst [vmem:[#allocation2] sm:$0xff] (!%p2858_p2), %v3793_v0  ;;  %400 = vst [vmem:[#allocation2 + $0x8] sm:$0xff] (!%p2858_p2), %v3793_v0 }
  0xa1   : > { %401 = vst [vmem:[#allocation2 + $0x10] sm:$0xff] (!%p2858_p2), %v3793_v0  ;;  %402 = vst [vmem:[#allocation2 + $0x18] sm:$0xff] (!%p2858_p2), %v3793_v0 }
  0xa2   : > { %403 = vst [vmem:[#allocation3] sm:$0xf] (!%p2858_p2), %v3793_v0 }
  0xa7 PF: > { %v3794_v1 = vmov 1983009808   ;;  %v1181_v3 = vlaneseq  ;;  %v408_v4 = vld [vmem:[%s4006_s7] sm:$0xff]  ;;  %v409_v5 = vld [vmem:[%s4006_s7 + $0x8] sm:$0xff]  ;;  %v410_v6 = vld [vmem:[%s4006_s7 + $0x10] sm:$0xff]  ;;  %vm1317_vm0 = vcmask 1041409  }
  0xa8   : > { %v1179_v2 = vunpack.c.l.s4 %v3794_v1  ;;  %v424_v7 = vld [vmem:[%s4006_s7 + $0x80] sm:$0xff]  ;;  %v425_v8 = vld [vmem:[%s4006_s7 + $0x88] sm:$0xff]  ;;  %v426_v9 = vld [vmem:[%s4006_s7 + $0x90] sm:$0xff]  ;;  %vm1319_vm1 = vcmask 1043459   ;;  %vm1321_vm2 = vcmask 1045509   ;;  %vm1323_vm3 = vcmask 1047559  }
  0xa9   : > { %v411_v10 = vld [vmem:[%s4006_s7 + $0x18] sm:$0xff]  ;;  %v412_v11 = vld [vmem:[%s4006_s7 + $0x20] sm:$0xff]  ;;  %v413_v12 = vld [vmem:[%s4006_s7 + $0x28] sm:$0xff]  ;;  %v1182_v25 = vshrl.u32 %v1181_v3, 7  ;;  %v696_v44 = vadd.f32 %v424_v7, %v408_v4  ;;  %v710_v45 = vadd.f32 %v425_v8, %v409_v5  ;;  %v724_v46 = vadd.f32 %v426_v9, %v410_v6  ;;  %p2859_p4 = scmp.ne.s32.totalorder %s3766_s21, 2 }
  0xaa   : > { %v427_v13 = vld [vmem:[%s4006_s7 + $0x98] sm:$0xff]  ;;  %v428_v14 = vld [vmem:[%s4006_s7 + $0xa0] sm:$0xff]  ;;  %v429_v15 = vld [vmem:[%s4006_s7 + $0xa8] sm:$0xff]  ;;  %v1180_v24 = vunpack.c.0.s8 %v1179_v2 }
  0xab   : > { %v414_v16 = vld [vmem:[%s4006_s7 + $0x30] sm:$0xff]  ;;  %v415_v17 = vld [vmem:[%s4006_s7 + $0x38] sm:$0xff]  ;;  %v416_v18 = vld [vmem:[%s4006_s7 + $0x40] sm:$0xff]  ;;  %v738_v51 = vadd.f32 %v427_v13, %v411_v10  ;;  %v752_v52 = vadd.f32 %v428_v14, %v412_v11  ;;  %v766_v53 = vadd.f32 %v429_v15, %v413_v12 }
  0xac   : > { %v417_v19 = vld [vmem:[%s4006_s7 + $0x48] sm:$0xff]  ;;  %v430_v20 = vld [vmem:[%s4006_s7 + $0xb0] sm:$0xff]  ;;  %v431_v21 = vld [vmem:[%s4006_s7 + $0xb8] sm:$0xff]  ;;  %v4070_v54 = vsub.s32 %v1180_v24, %v1182_v25 }
  0xad   : > { %v432_v22 = vld [vmem:[%s4006_s7 + $0xc0] sm:$0xff]  ;;  %v433_v23 = vld [vmem:[%s4006_s7 + $0xc8] sm:$0xff]  ;;  %v418_v26 = vld [vmem:[%s4006_s7 + $0x50] sm:$0xff]  ;;  %v780_v59 = vadd.f32 %v430_v20, %v414_v16  ;;  %v794_v60 = vadd.f32 %v431_v21, %v415_v17 }
  0xae   : > { %v419_v27 = vld [vmem:[%s4006_s7 + $0x58] sm:$0xff]  ;;  %v420_v28 = vld [vmem:[%s4006_s7 + $0x60] sm:$0xff]  ;;  %v421_v29 = vld [vmem:[%s4006_s7 + $0x68] sm:$0xff]  ;;  %v808_v61 = vadd.f32 %v432_v22, %v416_v18  ;;  %v822_v62 = vadd.f32 %v433_v23, %v417_v19 }
  0xaf   : > { %v434_v30 = vld [vmem:[%s4006_s7 + $0xd0] sm:$0xff]  ;;  %v435_v31 = vld [vmem:[%s4006_s7 + $0xd8] sm:$0xff]  ;;  %v436_v32 = vld [vmem:[%s4006_s7 + $0xe0] sm:$0xff] }
  0xb0   : > { %v437_v33 = vld [vmem:[%s4006_s7 + $0xe8] sm:$0xff]  ;;  %v422_v34 = vld [vmem:[%s4006_s7 + $0x70] sm:$0xff]  ;;  %v440_v36 = vld [vmem:[%s4006_s7 + $0x100] sm:$0xff]  ;;  %v836_v3 = vadd.f32 %v434_v30, %v418_v26  ;;  %v850_v4 = vadd.f32 %v435_v31, %v419_v27  ;;  %v864_v5 = vadd.f32 %v436_v32, %v420_v28 }
  0xb1   : > { %v438_v35 = vld [vmem:[%s4006_s7 + $0xf0] sm:$0xff]  ;;  %v441_v37 = vld [vmem:[%s4006_s7 + $0x108] sm:$0xff]  ;;  %v423_v39 = vld [vmem:[%s4006_s7 + $0x78] sm:$0xff]  ;;  %v878_v6 = vadd.f32 %v437_v33, %v421_v29  ;;  %v697_v11 = vadd.f32 %v696_v44, %v440_v36 }
  0xb2   : > { %v442_v38 = vld [vmem:[%s4006_s7 + $0x110] sm:$0xff]  ;;  %v439_v40 = vld [vmem:[%s4006_s7 + $0xf8] sm:$0xff]  ;;  %v444_v42 = vld [vmem:[%s4006_s7 + $0x120] sm:$0xff]  ;;  %v711_v12 = vadd.f32 %v710_v45, %v441_v37  ;;  %v892_v14 = vadd.f32 %v438_v35, %v422_v34 }
  0xb3   : > { %v443_v41 = vld [vmem:[%s4006_s7 + $0x118] sm:$0xff]  ;;  %v445_v43 = vld [vmem:[%s4006_s7 + $0x128] sm:$0xff]  ;;  %v446_v47 = vld [vmem:[%s4006_s7 + $0x130] sm:$0xff]  ;;  %v725_v13 = vadd.f32 %v724_v46, %v442_v38  ;;  %v753_v20 = vadd.f32 %v752_v52, %v444_v42  ;;  %v906_v22 = vadd.f32 %v439_v40, %v423_v39 }
  0xb4   : > { %v447_v48 = vld [vmem:[%s4006_s7 + $0x138] sm:$0xff]  ;;  %v448_v49 = vld [vmem:[%s4006_s7 + $0x140] sm:$0xff]  ;;  %v449_v50 = vld [vmem:[%s4006_s7 + $0x148] sm:$0xff]  ;;  %v739_v19 = vadd.f32 %v738_v51, %v443_v41  ;;  %v767_v21 = vadd.f32 %v766_v53, %v445_v43  ;;  %v781_v27 = vadd.f32 %v780_v59, %v446_v47 }
  0xb5   : > { %v450_v55 = vld [vmem:[%s4006_s7 + $0x150] sm:$0xff]  ;;  %v451_v56 = vld [vmem:[%s4006_s7 + $0x158] sm:$0xff]  ;;  %v452_v57 = vld [vmem:[%s4006_s7 + $0x160] sm:$0xff]  ;;  %v795_v28 = vadd.f32 %v794_v60, %v447_v48  ;;  %v809_v29 = vadd.f32 %v808_v61, %v448_v49  ;;  %v823_v30 = vadd.f32 %v822_v62, %v449_v50 }
  0xb6   : > { %v453_v58 = vld [vmem:[%s4006_s7 + $0x168] sm:$0xff]  ;;  %v454_v63 = vld [vmem:[%s4006_s7 + $0x170] sm:$0xff]  ;;  %v456_v0 = vld [vmem:[%s4006_s7 + $0x180] sm:$0xff]  ;;  %v837_v35 = vadd.f32 %v836_v3, %v450_v55  ;;  %v851_v36 = vadd.f32 %v850_v4, %v451_v56  ;;  %v865_v37 = vadd.f32 %v864_v5, %v452_v57 }
  0xb7   : > { %v457_v1 = vld [vmem:[%s4006_s7 + $0x188] sm:$0xff]  ;;  %v458_v2 = vld [vmem:[%s4006_s7 + $0x190] sm:$0xff]  ;;  %v455_v7 = vld [vmem:[%s4006_s7 + $0x178] sm:$0xff]  ;;  %v879_v38 = vadd.f32 %v878_v6, %v453_v58  ;;  %v698_v43 = vadd.f32 %v697_v11, %v456_v0  ;;  %v893_v46 = vadd.f32 %v892_v14, %v454_v63 }
  0xb8   : > { %v459_v8 = vld [vmem:[%s4006_s7 + $0x198] sm:$0xff]  ;;  %v460_v9 = vld [vmem:[%s4006_s7 + $0x1a0] sm:$0xff]  ;;  %v461_v10 = vld [vmem:[%s4006_s7 + $0x1a8] sm:$0xff]  ;;  %v712_v44 = vadd.f32 %v711_v12, %v457_v1  ;;  %v726_v45 = vadd.f32 %v725_v13, %v458_v2  ;;  %v907_v55 = vadd.f32 %v906_v22, %v455_v7 }
  0xb9   : > { %v462_v15 = vld [vmem:[%s4006_s7 + $0x1b0] sm:$0xff]  ;;  %v463_v16 = vld [vmem:[%s4006_s7 + $0x1b8] sm:$0xff]  ;;  %v464_v17 = vld [vmem:[%s4006_s7 + $0x1c0] sm:$0xff]  ;;  %v740_v51 = vadd.f32 %v739_v19, %v459_v8  ;;  %v754_v52 = vadd.f32 %v753_v20, %v460_v9  ;;  %v768_v53 = vadd.f32 %v767_v21, %v461_v10 }
  0xba   : > { %v465_v18 = vld [vmem:[%s4006_s7 + $0x1c8] sm:$0xff]  ;;  %v466_v23 = vld [vmem:[%s4006_s7 + $0x1d0] sm:$0xff]  ;;  %v467_v24 = vld [vmem:[%s4006_s7 + $0x1d8] sm:$0xff]  ;;  %v782_v60 = vadd.f32 %v781_v27, %v462_v15  ;;  %v796_v61 = vadd.f32 %v795_v28, %v463_v16  ;;  %v810_v62 = vadd.f32 %v809_v29, %v464_v17 }
  0xbb   : > { %v468_v25 = vld [vmem:[%s4006_s7 + $0x1e0] sm:$0xff]  ;;  %v469_v26 = vld [vmem:[%s4006_s7 + $0x1e8] sm:$0xff]  ;;  %v470_v31 = vld [vmem:[%s4006_s7 + $0x1f0] sm:$0xff]  ;;  %v824_v63 = vadd.f32 %v823_v30, %v465_v18  ;;  %v838_v4 = vadd.f32 %v837_v35, %v466_v23  ;;  %v852_v5 = vadd.f32 %v851_v36, %v467_v24 }
  0xbc   : > { %v472_v32 = vld [vmem:[%s4006_s7 + $0x200] sm:$0xff]  ;;  %v473_v33 = vld [vmem:[%s4006_s7 + $0x208] sm:$0xff]  ;;  %v474_v34 = vld [vmem:[%s4006_s7 + $0x210] sm:$0xff]  ;;  %v866_v6 = vadd.f32 %v865_v37, %v468_v25  ;;  %v880_v7 = vadd.f32 %v879_v38, %v469_v26  ;;  %v894_v15 = vadd.f32 %v893_v46, %v470_v31 }
  0xbd   : > { %v471_v39 = vld [vmem:[%s4006_s7 + $0x1f8] sm:$0xff]  ;;  %v476_v41 = vld [vmem:[%s4006_s7 + $0x220] sm:$0xff]  ;;  %v477_v42 = vld [vmem:[%s4006_s7 + $0x228] sm:$0xff]  ;;  %v699_v12 = vadd.f32 %v698_v43, %v472_v32  ;;  %v713_v13 = vadd.f32 %v712_v44, %v473_v33  ;;  %v727_v14 = vadd.f32 %v726_v45, %v474_v34 }
  0xbe   : > { %v475_v40 = vld [vmem:[%s4006_s7 + $0x218] sm:$0xff]  ;;  %v478_v47 = vld [vmem:[%s4006_s7 + $0x230] sm:$0xff]  ;;  %v480_v49 = vld [vmem:[%s4006_s7 + $0x240] sm:$0xff]  ;;  %v755_v20 = vadd.f32 %v754_v52, %v476_v41  ;;  %v769_v21 = vadd.f32 %v768_v53, %v477_v42  ;;  %v908_v22 = vadd.f32 %v907_v55, %v471_v39 }
  0xbf   : > { %v479_v48 = vld [vmem:[%s4006_s7 + $0x238] sm:$0xff]  ;;  %v481_v50 = vld [vmem:[%s4006_s7 + $0x248] sm:$0xff]  ;;  %v482_v56 = vld [vmem:[%s4006_s7 + $0x250] sm:$0xff]  ;;  %v741_v19 = vadd.f32 %v740_v51, %v475_v40  ;;  %v783_v26 = vadd.f32 %v782_v60, %v478_v47  ;;  %v811_v28 = vadd.f32 %v810_v62, %v480_v49 }
  0xc0   : > { %v483_v57 = vld [vmem:[%s4006_s7 + $0x258] sm:$0xff]  ;;  %v484_v58 = vld [vmem:[%s4006_s7 + $0x260] sm:$0xff]  ;;  %v485_v59 = vld [vmem:[%s4006_s7 + $0x268] sm:$0xff]  ;;  %v797_v27 = vadd.f32 %v796_v61, %v479_v48  ;;  %v825_v29 = vadd.f32 %v824_v63, %v481_v50  ;;  %v839_v33 = vadd.f32 %v838_v4, %v482_v56 }
  0xc1   : > { %v486_v0 = vld [vmem:[%s4006_s7 + $0x270] sm:$0xff]  ;;  %v488_v1 = vld [vmem:[%s4006_s7 + $0x280] sm:$0xff]  ;;  %v489_v2 = vld [vmem:[%s4006_s7 + $0x288] sm:$0xff]  ;;  %v853_v34 = vadd.f32 %v852_v5, %v483_v57  ;;  %v867_v35 = vadd.f32 %v866_v6, %v484_v58  ;;  %v881_v36 = vadd.f32 %v880_v7, %v485_v59 }
  0xc2   : > { %v490_v3 = vld [vmem:[%s4006_s7 + $0x290] sm:$0xff]  ;;  %v487_v8 = vld [vmem:[%s4006_s7 + $0x278] sm:$0xff]  ;;  %v492_v10 = vld [vmem:[%s4006_s7 + $0x2a0] sm:$0xff]  ;;  %v700_v40 = vadd.f32 %v699_v12, %v488_v1  ;;  %v714_v41 = vadd.f32 %v713_v13, %v489_v2  ;;  %v895_v43 = vadd.f32 %v894_v15, %v486_v0 }
  0xc3   : > { %v491_v9 = vld [vmem:[%s4006_s7 + $0x298] sm:$0xff]  ;;  %v493_v11 = vld [vmem:[%s4006_s7 + $0x2a8] sm:$0xff]  ;;  %v494_v16 = vld [vmem:[%s4006_s7 + $0x2b0] sm:$0xff]  ;;  %v728_v42 = vadd.f32 %v727_v14, %v490_v3  ;;  %v756_v48 = vadd.f32 %v755_v20, %v492_v10  ;;  %v909_v50 = vadd.f32 %v908_v22, %v487_v8 }
  0xc4   : > { %v495_v17 = vld [vmem:[%s4006_s7 + $0x2b8] sm:$0xff]  ;;  %v496_v18 = vld [vmem:[%s4006_s7 + $0x2c0] sm:$0xff]  ;;  %v497_v23 = vld [vmem:[%s4006_s7 + $0x2c8] sm:$0xff]  ;;  %v742_v47 = vadd.f32 %v741_v19, %v491_v9  ;;  %v770_v49 = vadd.f32 %v769_v21, %v493_v11  ;;  %v784_v55 = vadd.f32 %v783_v26, %v494_v16 }
  0xc5   : > { %v498_v24 = vld [vmem:[%s4006_s7 + $0x2d0] sm:$0xff]  ;;  %v499_v25 = vld [vmem:[%s4006_s7 + $0x2d8] sm:$0xff]  ;;  %v500_v30 = vld [vmem:[%s4006_s7 + $0x2e0] sm:$0xff]  ;;  %v798_v56 = vadd.f32 %v797_v27, %v495_v17  ;;  %v812_v57 = vadd.f32 %v811_v28, %v496_v18  ;;  %v826_v58 = vadd.f32 %v825_v29, %v497_v23 }
  0xc6   : > { %v501_v31 = vld [vmem:[%s4006_s7 + $0x2e8] sm:$0xff]  ;;  %v502_v32 = vld [vmem:[%s4006_s7 + $0x2f0] sm:$0xff]  ;;  %v503_v37 = vld [vmem:[%s4006_s7 + $0x2f8] sm:$0xff]  ;;  %v840_v62 = vadd.f32 %v839_v33, %v498_v24  ;;  %v854_v63 = vadd.f32 %v853_v34, %v499_v25  ;;  %v868_v0 = vadd.f32 %v867_v35, %v500_v30 }
  0xc7   : > { %v504_v38 = vld [vmem:[%s4006_s7 + $0x300] sm:$0xff]  ;;  %v505_v39 = vld [vmem:[%s4006_s7 + $0x308] sm:$0xff]  ;;  %v506_v44 = vld [vmem:[%s4006_s7 + $0x310] sm:$0xff]  ;;  %v882_v1 = vadd.f32 %v881_v36, %v501_v31  ;;  %v896_v8 = vadd.f32 %v895_v43, %v502_v32  ;;  %v910_v15 = vadd.f32 %v909_v50, %v503_v37 }
  0xc8   : > { %v507_v45 = vld [vmem:[%s4006_s7 + $0x318] sm:$0xff]  ;;  %v508_v46 = vld [vmem:[%s4006_s7 + $0x320] sm:$0xff]  ;;  %v509_v51 = vld [vmem:[%s4006_s7 + $0x328] sm:$0xff]  ;;  %v701_v5 = vadd.f32 %v700_v40, %v504_v38  ;;  %v715_v6 = vadd.f32 %v714_v41, %v505_v39  ;;  %v729_v7 = vadd.f32 %v728_v42, %v506_v44 }
  0xc9   : > { %v510_v52 = vld [vmem:[%s4006_s7 + $0x330] sm:$0xff]  ;;  %v511_v53 = vld [vmem:[%s4006_s7 + $0x338] sm:$0xff]  ;;  %v512_v59 = vld [vmem:[%s4006_s7 + $0x340] sm:$0xff]  ;;  %v743_v12 = vadd.f32 %v742_v47, %v507_v45  ;;  %v757_v13 = vadd.f32 %v756_v48, %v508_v46  ;;  %v771_v14 = vadd.f32 %v770_v49, %v509_v51 }
  0xca   : > { %v513_v60 = vld [vmem:[%s4006_s7 + $0x348] sm:$0xff]  ;;  %v514_v61 = vld [vmem:[%s4006_s7 + $0x350] sm:$0xff]  ;;  %v515_v2 = vld [vmem:[%s4006_s7 + $0x358] sm:$0xff]  ;;  %v785_v19 = vadd.f32 %v784_v55, %v510_v52  ;;  %v799_v20 = vadd.f32 %v798_v56, %v511_v53  ;;  %v813_v21 = vadd.f32 %v812_v57, %v512_v59 }
  0xcb   : > { %v516_v3 = vld [vmem:[%s4006_s7 + $0x360] sm:$0xff]  ;;  %v517_v4 = vld [vmem:[%s4006_s7 + $0x368] sm:$0xff]  ;;  %v518_v9 = vld [vmem:[%s4006_s7 + $0x370] sm:$0xff]  ;;  %v827_v22 = vadd.f32 %v826_v58, %v513_v60  ;;  %v841_v26 = vadd.f32 %v840_v62, %v514_v61  ;;  %v855_v27 = vadd.f32 %v854_v63, %v515_v2 }
  0xcc   : > { %v519_v10 = vld [vmem:[%s4006_s7 + $0x378] sm:$0xff]  ;;  %v520_v11 = vld [vmem:[%s4006_s7 + $0x380] sm:$0xff]  ;;  %v521_v16 = vld [vmem:[%s4006_s7 + $0x388] sm:$0xff]  ;;  %v869_v28 = vadd.f32 %v868_v0, %v516_v3  ;;  %v883_v29 = vadd.f32 %v882_v1, %v517_v4  ;;  %v897_v36 = vadd.f32 %v896_v8, %v518_v9 }
  0xcd   : > { %v522_v17 = vld [vmem:[%s4006_s7 + $0x390] sm:$0xff]  ;;  %v523_v18 = vld [vmem:[%s4006_s7 + $0x398] sm:$0xff]  ;;  %v524_v23 = vld [vmem:[%s4006_s7 + $0x3a0] sm:$0xff]  ;;  %v702_v33 = vadd.f32 %v701_v5, %v520_v11  ;;  %v716_v34 = vadd.f32 %v715_v6, %v521_v16  ;;  %v911_v43 = vadd.f32 %v910_v15, %v519_v10 }
  0xce   : > { %v525_v24 = vld [vmem:[%s4006_s7 + $0x3a8] sm:$0xff]  ;;  %v526_v25 = vld [vmem:[%s4006_s7 + $0x3b0] sm:$0xff]  ;;  %v527_v30 = vld [vmem:[%s4006_s7 + $0x3b8] sm:$0xff]  ;;  %v730_v35 = vadd.f32 %v729_v7, %v522_v17  ;;  %v744_v40 = vadd.f32 %v743_v12, %v523_v18  ;;  %v758_v41 = vadd.f32 %v757_v13, %v524_v23 }
  0xcf   : > { %v528_v31 = vld [vmem:[%s4006_s7 + $0x3c0] sm:$0xff]  ;;  %v529_v32 = vld [vmem:[%s4006_s7 + $0x3c8] sm:$0xff]  ;;  %v530_v37 = vld [vmem:[%s4006_s7 + $0x3d0] sm:$0xff]  ;;  %v772_v42 = vadd.f32 %v771_v14, %v525_v24  ;;  %v786_v47 = vadd.f32 %v785_v19, %v526_v25  ;;  %v800_v48 = vadd.f32 %v799_v20, %v527_v30 }
  0xd0   : > { %v531_v38 = vld [vmem:[%s4006_s7 + $0x3d8] sm:$0xff]  ;;  %v532_v39 = vld [vmem:[%s4006_s7 + $0x3e0] sm:$0xff]  ;;  %v533_v44 = vld [vmem:[%s4006_s7 + $0x3e8] sm:$0xff]  ;;  %v4158_v49 = vadd.f32 %v813_v21, %v528_v31  ;;  %v4160_v50 = vadd.f32 %v827_v22, %v529_v32  ;;  %v4165_v55 = vadd.f32 %v841_v26, %v530_v37 }
  0xd1   : > { %v534_v45 = vld [vmem:[%s4006_s7 + $0x3f0] sm:$0xff]  ;;  %v535_v46 = vld [vmem:[%s4006_s7 + $0x3f8] sm:$0xff]  ;;  %v536_v51 = vld [vmem:[%s4006_s7 + $0x400] sm:$0xff]  ;;  %v4167_v56 = vadd.f32 %v855_v27, %v531_v38  ;;  %v4169_v57 = vadd.f32 %v869_v28, %v532_v39  ;;  %v4171_v58 = vadd.f32 %v883_v29, %v533_v44 }
  0xd2   : > { %v537_v52 = vld [vmem:[%s4006_s7 + $0x408] sm:$0xff]  ;;  %v538_v53 = vld [vmem:[%s4006_s7 + $0x410] sm:$0xff]  ;;  %v539_v59 = vld [vmem:[%s4006_s7 + $0x418] sm:$0xff]  ;;  %v703_v62 = vadd.f32 %v702_v33, %v536_v51  ;;  %v4176_v1 = vadd.f32 %v897_v36, %v534_v45  ;;  %v4180_v7 = vadd.f32 %v911_v43, %v535_v46 }
  0xd3   : > { %v540_v60 = vld [vmem:[%s4006_s7 + $0x420] sm:$0xff]  ;;  %v541_v61 = vld [vmem:[%s4006_s7 + $0x428] sm:$0xff]  ;;  %v717_v63 = vadd.f32 %v716_v34, %v537_v52  ;;  %v731_v0 = vadd.f32 %v730_v35, %v538_v53  ;;  %v542_v2 = vld [vmem:[%s4006_s7 + $0x430] sm:$0xff]  ;;  %v745_v4 = vadd.f32 %v744_v40, %v539_v59 }
  0xd4   : > { %v543_v3 = vld [vmem:[%s4006_s7 + $0x438] sm:$0xff]  ;;  %v759_v5 = vadd.f32 %v758_v41, %v540_v60  ;;  %v773_v6 = vadd.f32 %v772_v42, %v541_v61  ;;  %v704_v8 = vrot.slane %v703_v62, 4  ;;  %v787_v11 = vadd.f32 %v786_v47, %v542_v2  ;;  %v544_v44 = vld [vmem:[%s4006_s7 + $0x440] sm:$0xff]  ;;  %v545_v45 = vld [vmem:[%s4006_s7 + $0x448] sm:$0xff] }
  0xd5   : > { %v718_v9 = vrot.slane %v717_v63, 4  ;;  %v732_v10 = vrot.slane %v731_v0, 4  ;;  %v746_v12 = vrot.slane %v745_v4, 4  ;;  %v801_v15 = vadd.f32 %v800_v48, %v543_v3  ;;  %v546_v46 = vld [vmem:[%s4006_s7 + $0x450] sm:$0xff]  ;;  %v547_v53 = vld [vmem:[%s4006_s7 + $0x458] sm:$0xff]  ;;  %v548_v59 = vld [vmem:[%s4006_s7 + $0x460] sm:$0xff] }
  0xd6   : > { %v760_v13 = vrot.slane %v759_v5, 4  ;;  %v774_v14 = vrot.slane %v773_v6, 4  ;;  %v705_v16 = vadd.f32 %v704_v8, %v703_v62  ;;  %v788_v19 = vrot.slane %v787_v11, 4  ;;  %v549_v60 = vld [vmem:[%s4006_s7 + $0x468] sm:$0xff]  ;;  %v550_v2 = vld [vmem:[%s4006_s7 + $0x470] sm:$0xff]  ;;  %v551_v8 = vld [vmem:[%s4006_s7 + $0x478] sm:$0xff] }
  0xd7   : > { %v719_v17 = vadd.f32 %v718_v9, %v717_v63  ;;  %v733_v18 = vadd.f32 %v732_v10, %v731_v0  ;;  %v747_v20 = vadd.f32 %v746_v12, %v745_v4  ;;  %v802_v23 = vrot.slane %v801_v15, 4 }
  0xd8   : > { %v761_v21 = vadd.f32 %v760_v13, %v759_v5  ;;  %v775_v22 = vadd.f32 %v774_v14, %v773_v6  ;;  %v706_v24 = vrot.slane %v705_v16, 2  ;;  %v789_v27 = vadd.f32 %v788_v19, %v787_v11 }
  0xd9   : > { %v720_v25 = vrot.slane %v719_v17, 2  ;;  %v734_v26 = vrot.slane %v733_v18, 2  ;;  %v748_v28 = vrot.slane %v747_v20, 2  ;;  %v803_v31 = vadd.f32 %v802_v23, %v801_v15 }
  0xda   : > { %v762_v29 = vrot.slane %v761_v21, 2  ;;  %v776_v30 = vrot.slane %v775_v22, 2  ;;  %v707_v32 = vadd.f32 %v706_v24, %v705_v16  ;;  %v790_v35 = vrot.slane %v789_v27, 2 }
  0xdb   : > { %v721_v33 = vadd.f32 %v720_v25, %v719_v17  ;;  %v735_v34 = vadd.f32 %v734_v26, %v733_v18  ;;  %v749_v36 = vadd.f32 %v748_v28, %v747_v20  ;;  %v804_v39 = vrot.slane %v803_v31, 2 }
  0xdc   : > { %v763_v37 = vadd.f32 %v762_v29, %v761_v21  ;;  %v777_v38 = vadd.f32 %v776_v30, %v775_v22  ;;  %v708_v40 = vrot.slane %v707_v32, 1  ;;  %v791_v43 = vadd.f32 %v790_v35, %v789_v27 }
  0xdd   : > { %v722_v41 = vrot.slane %v721_v33, 1  ;;  %v736_v42 = vrot.slane %v735_v34, 1  ;;  %v750_v47 = vrot.slane %v749_v36, 1  ;;  %v805_v52 = vadd.f32 %v804_v39, %v803_v31  ;;  %v554_v39 = vld [vmem:[%s4006_s7 + $0x490] sm:$0xff] }
  0xde   : > { %v764_v48 = vrot.slane %v763_v37, 1  ;;  %v778_v51 = vrot.slane %v777_v38, 1  ;;  %v4188_v61 = vadd.f32 %v708_v40, %v707_v32  ;;  %v792_v0 = vrot.slane %v791_v43, 1  ;;  %v568_v40 = vld [vmem:[%s4006_s7 + $0x500] sm:$0xff] }
  0xdf   : > { %v4190_v62 = vadd.f32 %v722_v41, %v721_v33  ;;  %v4192_v63 = vadd.f32 %v736_v42, %v735_v34  ;;  %v4195_v3 = vadd.f32 %v750_v47, %v749_v36  ;;  %v806_v6 = vrot.slane %v805_v52, 1  ;;  %v569_v41 = vld [vmem:[%s4006_s7 + $0x508] sm:$0xff]  ;;  %v570_v42 = vld [vmem:[%s4006_s7 + $0x510] sm:$0xff]  ;;  %v555_v47 = vld [vmem:[%s4006_s7 + $0x498] sm:$0xff] }
  0xe0   : > { %v4197_v4 = vadd.f32 %v764_v48, %v763_v37  ;;  %v4199_v5 = vadd.f32 %v778_v51, %v777_v38  ;;  %v4202_v9 = vadd.f32 %v792_v0, %v791_v43  ;;  %v815_v10 = vadd.f32 %v4158_v49, %v544_v44  ;;  %v552_v37 = vld [vmem:[%s4006_s7 + $0x480] sm:$0xff]  ;;  %v553_v38 = vld [vmem:[%s4006_s7 + $0x488] sm:$0xff] }
  0xe1   : > { %v829_v11 = vadd.f32 %v4160_v50, %v545_v45  ;;  %v843_v12 = vadd.f32 %v4165_v55, %v546_v46  ;;  %v4207_v13 = vadd.f32 %v806_v6, %v805_v52  ;;  %v857_v14 = vadd.f32 %v4167_v56, %v547_v53  ;;  %v556_v48 = vld [vmem:[%s4006_s7 + $0x4a0] sm:$0xff]  ;;  %v557_v51 = vld [vmem:[%s4006_s7 + $0x4a8] sm:$0xff]  ;;  %v571_v52 = vld [vmem:[%s4006_s7 + $0x518] sm:$0xff] }
  0xe2   : > { %v871_v15 = vadd.f32 %v4169_v57, %v548_v59  ;;  %v885_v16 = vadd.f32 %v4171_v58, %v549_v60  ;;  %v816_v17 = vrot.slane %v815_v10, 4  ;;  %v899_v20 = vadd.f32 %v4176_v1, %v550_v2  ;;  %v572_v53 = vld [vmem:[%s4006_s7 + $0x520] sm:$0xff]  ;;  %v573_v59 = vld [vmem:[%s4006_s7 + $0x528] sm:$0xff] }
  0xe3   : > { %v830_v18 = vrot.slane %v829_v11, 4  ;;  %v844_v19 = vrot.slane %v843_v12, 4  ;;  %v858_v21 = vrot.slane %v857_v14, 4  ;;  %v913_v50 = vadd.f32 %v4180_v7, %v551_v8  ;;  %v558_v8 = vld [vmem:[%s4006_s7 + $0x4b0] sm:$0xff] }
  0xe4   : > { %v872_v22 = vrot.slane %v871_v15, 4  ;;  %v886_v49 = vrot.slane %v885_v16, 4  ;;  %v817_v23 = vadd.f32 %v816_v17, %v815_v10  ;;  %v900_v25 = vrot.slane %v899_v20, 4  ;;  %v574_v10 = vld [vmem:[%s4006_s7 + $0x530] sm:$0xff] }
  0xe5   : > { %v831_v55 = vadd.f32 %v830_v18, %v829_v11  ;;  %v845_v24 = vadd.f32 %v844_v19, %v843_v12  ;;  %v859_v26 = vadd.f32 %v858_v21, %v857_v14  ;;  %v914_v58 = vrot.slane %v913_v50, 4  ;;  %v584_v11 = vld [vmem:[%s4006_s7 + $0x580] sm:$0xff]  ;;  %v585_v12 = vld [vmem:[%s4006_s7 + $0x588] sm:$0xff]  ;;  %v559_v18 = vld [vmem:[%s4006_s7 + $0x4b8] sm:$0xff] }
  0xe6   : > { %v873_v56 = vadd.f32 %v872_v22, %v871_v15  ;;  %v887_v57 = vadd.f32 %v886_v49, %v885_v16  ;;  %v818_v27 = vrot.slane %v817_v23, 2  ;;  %v901_v29 = vadd.f32 %v900_v25, %v899_v20  ;;  %v575_v19 = vld [vmem:[%s4006_s7 + $0x538] sm:$0xff]  ;;  %v586_v20 = vld [vmem:[%s4006_s7 + $0x590] sm:$0xff]  ;;  %v588_v22 = vld [vmem:[%s4006_s7 + $0x5a0] sm:$0xff] }
  0xe7   : > { %v832_v1 = vrot.slane %v831_v55, 2  ;;  %v846_v28 = vrot.slane %v845_v24, 2  ;;  %v860_v30 = vrot.slane %v859_v26, 2  ;;  %v915_v32 = vadd.f32 %v914_v58, %v913_v50  ;;  %v587_v21 = vld [vmem:[%s4006_s7 + $0x598] sm:$0xff]  ;;  %v590_v25 = vld [vmem:[%s4006_s7 + $0x5b0] sm:$0xff] }
  0xe8   : > { %v874_v7 = vrot.slane %v873_v56, 2  ;;  %v888_v31 = vrot.slane %v887_v57, 2  ;;  %v819_v33 = vadd.f32 %v818_v27, %v817_v23  ;;  %v902_v36 = vrot.slane %v901_v29, 2 }
  0xe9   : > { %v833_v34 = vadd.f32 %v832_v1, %v831_v55  ;;  %v847_v35 = vadd.f32 %v846_v28, %v845_v24  ;;  %v861_v43 = vadd.f32 %v860_v30, %v859_v26  ;;  %v916_v46 = vrot.slane %v915_v32, 2  ;;  %v589_v24 = vld [vmem:[%s4006_s7 + $0x5a8] sm:$0xff]  ;;  %v600_v26 = vld [vmem:[%s4006_s7 + $0x600] sm:$0xff]  ;;  %v591_v1 = vld [vmem:[%s4006_s7 + $0x5b8] sm:$0xff] }
  0xea   : > { %v875_v44 = vadd.f32 %v874_v7, %v873_v56  ;;  %v889_v45 = vadd.f32 %v888_v31, %v887_v57  ;;  %v820_v60 = vrot.slane %v819_v33, 1  ;;  %v903_v6 = vadd.f32 %v902_v36, %v901_v29  ;;  %v601_v28 = vld [vmem:[%s4006_s7 + $0x608] sm:$0xff]  ;;  %v602_v29 = vld [vmem:[%s4006_s7 + $0x610] sm:$0xff]  ;;  %v603_v30 = vld [vmem:[%s4006_s7 + $0x618] sm:$0xff] }
  0xeb   : > { %v834_v0 = vrot.slane %v833_v34, 1  ;;  %v848_v2 = vrot.slane %v847_v35, 1  ;;  %v862_v14 = vrot.slane %v861_v43, 1  ;;  %v917_v17 = vadd.f32 %v916_v46, %v915_v32  ;;  %v606_v36 = vld [vmem:[%s4006_s7 + $0x630] sm:$0xff] }
  0xec   : > { %v876_v15 = vrot.slane %v875_v44, 1  ;;  %v890_v16 = vrot.slane %v889_v45, 1  ;;  %v4235_v49 = vadd.f32 %v820_v60, %v819_v33  ;;  %v904_v55 = vrot.slane %v903_v6, 1  ;;  %v607_v60 = vld [vmem:[%s4006_s7 + $0x638] sm:$0xff] }
  0xed   : > { %v4237_v50 = vadd.f32 %v834_v0, %v833_v34  ;;  %v4239_v23 = vadd.f32 %v848_v2, %v847_v35  ;;  %v4244_v56 = vadd.f32 %v862_v14, %v861_v43  ;;  %v918_v27 = vrot.slane %v917_v17, 1  ;;  %v604_v34 = vld [vmem:[%s4006_s7 + $0x620] sm:$0xff]  ;;  %v605_v35 = vld [vmem:[%s4006_s7 + $0x628] sm:$0xff] }
  0xee   : > { %v4246_v57 = vadd.f32 %v876_v15, %v875_v44  ;;  %v4248_v58 = vadd.f32 %v890_v16, %v889_v45  ;;  %v4254_v7 = vadd.f32 %v904_v55, %v903_v6  ;;  %v920_v31 = vadd.f32 %v568_v40, %v552_v37  ;;  %v616_v0 = vld [vmem:[%s4006_s7 + $0x680] sm:$0xff]  ;;  %v617_v2 = vld [vmem:[%s4006_s7 + $0x688] sm:$0xff] }
  0xef   : > { %v934_v32 = vadd.f32 %v569_v41, %v553_v38  ;;  %v948_v33 = vadd.f32 %v570_v42, %v554_v39  ;;  %v4259_v43 = vadd.f32 %v918_v27, %v917_v17  ;;  %v962_v44 = vadd.f32 %v571_v52, %v555_v47  ;;  %v618_v41 = vld [vmem:[%s4006_s7 + $0x690] sm:$0xff]  ;;  %v619_v42 = vld [vmem:[%s4006_s7 + $0x698] sm:$0xff]  ;;  %v620_v6 = vld [vmem:[%s4006_s7 + $0x6a0] sm:$0xff] }
  0xf0   : > { %4762 = vst [vmem:[#allocation26_spill] sm:$0xff] %v4254_v7  ;;  %v976_v45 = vadd.f32 %v572_v53, %v556_v48  ;;  %v990_v46 = vadd.f32 %v573_v59, %v557_v51  ;;  %v921_v37 = vadd.f32 %v920_v31, %v584_v11  ;;  %v1004_v39 = vadd.f32 %v574_v10, %v558_v8  ;;  %v621_v52 = vld [vmem:[%s4006_s7 + $0x6a8] sm:$0xff]  ;;  %v622_v53 = vld [vmem:[%s4006_s7 + $0x6b0] sm:$0xff]  ;;  %v623_v59 = vld [vmem:[%s4006_s7 + $0x6b8] sm:$0xff] }
  0xf1   : > { %4763 = vst [vmem:[#allocation27_spill] sm:$0xff] %v4259_v43  ;;  %v935_v38 = vadd.f32 %v934_v32, %v585_v12  ;;  %v949_v40 = vadd.f32 %v948_v33, %v586_v20  ;;  %v963_v14 = vadd.f32 %v962_v44, %v587_v21  ;;  %v1018_v51 = vadd.f32 %v575_v19, %v559_v18  ;;  %v632_v10 = vld [vmem:[%s4006_s7 + $0x700] sm:$0xff]  ;;  %v633_v16 = vld [vmem:[%s4006_s7 + $0x708] sm:$0xff]  ;;  %v634_v17 = vld [vmem:[%s4006_s7 + $0x710] sm:$0xff] }
  0xf2   : > { %v977_v47 = vadd.f32 %v976_v45, %v588_v22  ;;  %v991_v48 = vadd.f32 %v990_v46, %v589_v24  ;;  %v922_v11 = vadd.f32 %v921_v37, %v600_v26  ;;  %v1005_v8 = vadd.f32 %v1004_v39, %v590_v25  ;;  %v635_v22 = vld [vmem:[%s4006_s7 + $0x718] sm:$0xff]  ;;  %v636_v55 = vld [vmem:[%s4006_s7 + $0x720] sm:$0xff]  ;;  %v637_v24 = vld [vmem:[%s4006_s7 + $0x728] sm:$0xff] }
  0xf3   : > { %v936_v12 = vadd.f32 %v935_v38, %v601_v28  ;;  %v950_v15 = vadd.f32 %v949_v40, %v602_v29  ;;  %v964_v20 = vadd.f32 %v963_v14, %v603_v30  ;;  %v1019_v21 = vadd.f32 %v1018_v51, %v591_v1  ;;  %v560_v29 = vld [vmem:[%s4006_s7 + $0x4c0] sm:$0xff]  ;;  %v561_v30 = vld [vmem:[%s4006_s7 + $0x4c8] sm:$0xff]  ;;  %v562_v31 = vld [vmem:[%s4006_s7 + $0x4d0] sm:$0xff] }
  0xf4   : > { %v978_v18 = vadd.f32 %v977_v47, %v604_v34  ;;  %v992_v19 = vadd.f32 %v991_v48, %v605_v35  ;;  %v923_v26 = vadd.f32 %v922_v11, %v616_v0  ;;  %v1006_v28 = vadd.f32 %v1005_v8, %v606_v36  ;;  %v576_v32 = vld [vmem:[%s4006_s7 + $0x540] sm:$0xff]  ;;  %v577_v1 = vld [vmem:[%s4006_s7 + $0x548] sm:$0xff]  ;;  %v578_v33 = vld [vmem:[%s4006_s7 + $0x550] sm:$0xff] }
  0xf5   : > { %v937_v25 = vadd.f32 %v936_v12, %v617_v2  ;;  %v951_v27 = vadd.f32 %v950_v15, %v618_v41  ;;  %v638_v34 = vld [vmem:[%s4006_s7 + $0x730] sm:$0xff]  ;;  %v965_v35 = vadd.f32 %v964_v20, %v619_v42  ;;  %v1020_v46 = vadd.f32 %v1019_v21, %v607_v60  ;;  %v563_v36 = vld [vmem:[%s4006_s7 + $0x4d8] sm:$0xff]  ;;  %v564_v0 = vld [vmem:[%s4006_s7 + $0x4e0] sm:$0xff] }
  0xf6   : > { %v979_v44 = vadd.f32 %v978_v18, %v620_v6  ;;  %v993_v45 = vadd.f32 %v992_v19, %v621_v52  ;;  %v565_v2 = vld [vmem:[%s4006_s7 + $0x4e8] sm:$0xff]  ;;  %v579_v37 = vld [vmem:[%s4006_s7 + $0x558] sm:$0xff]  ;;  %v580_v38 = vld [vmem:[%s4006_s7 + $0x560] sm:$0xff]  ;;  %v924_v42 = vadd.f32 %v923_v26, %v632_v10  ;;  %v1007_v48 = vadd.f32 %v1006_v28, %v622_v53 }
  0xf7   : > { %v581_v40 = vld [vmem:[%s4006_s7 + $0x568] sm:$0xff]  ;;  %v639_v39 = vld [vmem:[%s4006_s7 + $0x738] sm:$0xff]  ;;  %v648_v41 = vld [vmem:[%s4006_s7 + $0x780] sm:$0xff]  ;;  %v938_v6 = vadd.f32 %v937_v25, %v633_v16  ;;  %v952_v47 = vadd.f32 %v951_v27, %v634_v17  ;;  %v966_v12 = vadd.f32 %v965_v35, %v635_v22  ;;  %v1021_v20 = vadd.f32 %v1020_v46, %v623_v59 }
  0xf8   : > { %v649_v14 = vld [vmem:[%s4006_s7 + $0x788] sm:$0xff]  ;;  %v592_v60 = vld [vmem:[%s4006_s7 + $0x5c0] sm:$0xff]  ;;  %v650_v51 = vld [vmem:[%s4006_s7 + $0x790] sm:$0xff]  ;;  %v980_v15 = vadd.f32 %v979_v44, %v636_v55  ;;  %v994_v8 = vadd.f32 %v993_v45, %v637_v24  ;;  %v925_v16 = vadd.f32 %v924_v42, %v648_v41  ;;  %v1008_v21 = vadd.f32 %v1007_v48, %v638_v34 }
  0xf9   : > { %v651_v52 = vld [vmem:[%s4006_s7 + $0x798] sm:$0xff]  ;;  %v652_v11 = vld [vmem:[%s4006_s7 + $0x7a0] sm:$0xff]  ;;  %v653_v18 = vld [vmem:[%s4006_s7 + $0x7a8] sm:$0xff]  ;;  %v939_v17 = vadd.f32 %v938_v6, %v649_v14  ;;  %v953_v53 = vadd.f32 %v952_v47, %v650_v51  ;;  %v1022_v27 = vadd.f32 %v1021_v20, %v639_v39  ;;  %v1032_v34 = vadd.f32 %v576_v32, %v560_v29 }
  0xfa   : > { %v654_v19 = vld [vmem:[%s4006_s7 + $0x7b0] sm:$0xff]  ;;  %v655_v10 = vld [vmem:[%s4006_s7 + $0x7b8] sm:$0xff]  ;;  %v593_v26 = vld [vmem:[%s4006_s7 + $0x5c8] sm:$0xff]  ;;  %v967_v55 = vadd.f32 %v966_v12, %v651_v52  ;;  %v981_v59 = vadd.f32 %v980_v15, %v652_v11  ;;  %v995_v24 = vadd.f32 %v994_v8, %v653_v18  ;;  %v1046_v46 = vadd.f32 %v577_v1, %v561_v30 }
  0xfb   : > { %v594_v25 = vld [vmem:[%s4006_s7 + $0x5d0] sm:$0xff]  ;;  %v595_v22 = vld [vmem:[%s4006_s7 + $0x5d8] sm:$0xff]  ;;  %v608_v28 = vld [vmem:[%s4006_s7 + $0x640] sm:$0xff]  ;;  %v1009_v45 = vadd.f32 %v1008_v21, %v654_v19  ;;  %v1060_v41 = vadd.f32 %v578_v33, %v562_v31  ;;  %v1023_v52 = vadd.f32 %v1022_v27, %v655_v10  ;;  %v1074_v11 = vadd.f32 %v579_v37, %v563_v36 }
  0xfc   : > { %v609_v35 = vld [vmem:[%s4006_s7 + $0x648] sm:$0xff]  ;;  %v610_v44 = vld [vmem:[%s4006_s7 + $0x650] sm:$0xff]  ;;  %v596_v6 = vld [vmem:[%s4006_s7 + $0x5e0] sm:$0xff]  ;;  %v1088_v12 = vadd.f32 %v580_v38, %v564_v0  ;;  %v1102_v29 = vadd.f32 %v581_v40, %v565_v2  ;;  %v1033_v20 = vadd.f32 %v1032_v34, %v592_v60  ;;  %v1047_v18 = vadd.f32 %v1046_v46, %v593_v26 }
  0xfd   : > { %v566_v14 = vld [vmem:[%s4006_s7 + $0x4f0] sm:$0xff]  ;;  %v597_v47 = vld [vmem:[%s4006_s7 + $0x5e8] sm:$0xff]  ;;  %v611_v48 = vld [vmem:[%s4006_s7 + $0x658] sm:$0xff]  ;;  %v1061_v19 = vadd.f32 %v1060_v41, %v594_v25  ;;  %v1075_v37 = vadd.f32 %v1074_v11, %v595_v22 }
  0xfe   : > { %v582_v42 = vld [vmem:[%s4006_s7 + $0x570] sm:$0xff]  ;;  %v624_v51 = vld [vmem:[%s4006_s7 + $0x6c0] sm:$0xff]  ;;  %v567_v32 = vld [vmem:[%s4006_s7 + $0x4f8] sm:$0xff]  ;;  %v1034_v26 = vadd.f32 %v1033_v20, %v608_v28  ;;  %v1048_v46 = vadd.f32 %v1047_v18, %v609_v35  ;;  %v4326_v41 = vadd.f32 %v1088_v12, %v596_v6 }
  0xff   : > { %v664_v39 = vld [vmem:[%s4006_s7 + $0x800] sm:$0xff]  ;;  %v583_v30 = vld [vmem:[%s4006_s7 + $0x578] sm:$0xff]  ;;  %v625_v31 = vld [vmem:[%s4006_s7 + $0x6c8] sm:$0xff] }
 0x100   : > { %v665_v1 = vld [vmem:[%s4006_s7 + $0x808] sm:$0xff]  ;;  %v666_v33 = vld [vmem:[%s4006_s7 + $0x810] sm:$0xff]  ;;  %v667_v15 = vld [vmem:[%s4006_s7 + $0x818] sm:$0xff]  ;;  %v926_v8 = vadd.f32 %v925_v16, %v664_v39  ;;  %v1035_v22 = vadd.f32 %v1034_v26, %v624_v51  ;;  %v4328_v39 = vadd.f32 %v1102_v29, %v597_v47 }
 0x101   : > { %v668_v21 = vld [vmem:[%s4006_s7 + $0x820] sm:$0xff]  ;;  %v669_v10 = vld [vmem:[%s4006_s7 + $0x828] sm:$0xff]  ;;  %v670_v27 = vld [vmem:[%s4006_s7 + $0x830] sm:$0xff]  ;;  %v940_v36 = vadd.f32 %v939_v17, %v665_v1  ;;  %v954_v0 = vadd.f32 %v953_v53, %v666_v33  ;;  %v968_v2 = vadd.f32 %v967_v55, %v667_v15  ;;  %v1062_v17 = vadd.f32 %v1061_v19, %v610_v44 }
 0x102   : > { %v626_v38 = vld [vmem:[%s4006_s7 + $0x6d0] sm:$0xff]  ;;  %v627_v40 = vld [vmem:[%s4006_s7 + $0x6d8] sm:$0xff]  ;;  %v982_v43 = vadd.f32 %v981_v59, %v668_v21  ;;  %v996_v16 = vadd.f32 %v995_v24, %v669_v10  ;;  %v1010_v60 = vadd.f32 %v1009_v45, %v670_v27  ;;  %v640_v34 = vld [vmem:[%s4006_s7 + $0x740] sm:$0xff]  ;;  %v1076_v53 = vadd.f32 %v1075_v37, %v611_v48 }
 0x103   : > { %v671_v7 = vld [vmem:[%s4006_s7 + $0x838] sm:$0xff]  ;;  %v641_v55 = vld [vmem:[%s4006_s7 + $0x748] sm:$0xff]  ;;  %v4330_v59 = vadd.f32 %v582_v42, %v566_v14  ;;  %v680_v24 = vld [vmem:[%s4006_s7 + $0x880] sm:$0xff]  ;;  %v4339_v44 = vadd.f32 %v583_v30, %v567_v32  ;;  %v4344_v29 = vadd.f32 %v1035_v22, %v640_v34 }
 0x104   : > { %v1024_v25 = vadd.f32 %v1023_v52, %v671_v7  ;;  %v681_v28 = vld [vmem:[%s4006_s7 + $0x888] sm:$0xff]  ;;  %v682_v45 = vld [vmem:[%s4006_s7 + $0x890] sm:$0xff]  ;;  %v1049_v7 = vadd.f32 %v1048_v46, %v625_v31  ;;  %v4335_v52 = vadd.f32 %v1062_v17, %v626_v38  ;;  %v4337_v35 = vadd.f32 %v1076_v53, %v627_v40  ;;  %v683_v48 = vld [vmem:[%s4006_s7 + $0x898] sm:$0xff] }
 0x105   : > { %v684_v51 = vld [vmem:[%s4006_s7 + $0x8a0] sm:$0xff]  ;;  %v685_v6 = vld [vmem:[%s4006_s7 + $0x8a8] sm:$0xff]  ;;  %v927_v11 = vadd.f32 %v926_v8, %v680_v24  ;;  %v941_v47 = vadd.f32 %v940_v36, %v681_v28  ;;  %v955_v12 = vadd.f32 %v954_v0, %v682_v45  ;;  %v686_v14 = vld [vmem:[%s4006_s7 + $0x8b0] sm:$0xff]  ;;  %v969_v1 = vadd.f32 %v968_v2, %v683_v48 }
 0x106   : > { %v687_v42 = vld [vmem:[%s4006_s7 + $0x8b8] sm:$0xff]  ;;  %v983_v33 = vadd.f32 %v982_v43, %v684_v51  ;;  %v997_v15 = vadd.f32 %v996_v16, %v685_v6  ;;  %v4348_v31 = vadd.f32 %v1049_v7, %v641_v55  ;;  %v1011_v32 = vadd.f32 %v1010_v60, %v686_v14  ;;  %v598_v14 = vld [vmem:[%s4006_s7 + $0x5f0] sm:$0xff] }
 0x107   : > { %v928_v20 = vrot.slane %v927_v11, 4  ;;  %v942_v18 = vrot.slane %v941_v47, 4  ;;  %v956_v19 = vrot.slane %v955_v12, 4  ;;  %v970_v30 = vrot.slane %v969_v1, 4 }
 0x108   : > { %v984_v21 = vrot.slane %v983_v33, 4  ;;  %v998_v10 = vrot.slane %v997_v15, 4  ;;  %v1025_v27 = vadd.f32 %v1024_v25, %v687_v42  ;;  %v1012_v37 = vrot.slane %v1011_v32, 4  ;;  %v642_v42 = vld [vmem:[%s4006_s7 + $0x750] sm:$0xff] }
 0x109   : > { %v929_v8 = vadd.f32 %v928_v20, %v927_v11  ;;  %v943_v36 = vadd.f32 %v942_v18, %v941_v47  ;;  %v957_v0 = vadd.f32 %v956_v19, %v955_v12  ;;  %v971_v38 = vadd.f32 %v970_v30, %v969_v1  ;;  %v656_v1 = vld [vmem:[%s4006_s7 + $0x7c0] sm:$0xff] }
 0x10a   : > { %v985_v40 = vadd.f32 %v984_v21, %v983_v33  ;;  %v999_v26 = vadd.f32 %v998_v10, %v997_v15  ;;  %v1026_v2 = vrot.slane %v1025_v27, 4  ;;  %v1013_v46 = vadd.f32 %v1012_v37, %v1011_v32  ;;  %v657_v33 = vld [vmem:[%s4006_s7 + $0x7c8] sm:$0xff]  ;;  %v599_v32 = vld [vmem:[%s4006_s7 + $0x5f8] sm:$0xff]  ;;  %v612_v30 = vld [vmem:[%s4006_s7 + $0x660] sm:$0xff] }
 0x10b   : > { %v930_v43 = vrot.slane %v929_v8, 2  ;;  %v944_v16 = vrot.slane %v943_v36, 2  ;;  %v958_v34 = vrot.slane %v957_v0, 2  ;;  %v972_v17 = vrot.slane %v971_v38, 2  ;;  %v613_v21 = vld [vmem:[%s4006_s7 + $0x668] sm:$0xff]  ;;  %v643_v10 = vld [vmem:[%s4006_s7 + $0x758] sm:$0xff] }
 0x10c   : > { %v986_v53 = vrot.slane %v985_v40, 2  ;;  %v1000_v60 = vrot.slane %v999_v26, 2  ;;  %v1027_v55 = vadd.f32 %v1026_v2, %v1025_v27  ;;  %v1014_v28 = vrot.slane %v1013_v46, 2  ;;  %v614_v37 = vld [vmem:[%s4006_s7 + $0x670] sm:$0xff] }
 0x10d   : > { %v931_v25 = vadd.f32 %v930_v43, %v929_v8  ;;  %v945_v22 = vadd.f32 %v944_v16, %v943_v36  ;;  %v959_v24 = vadd.f32 %v958_v34, %v957_v0  ;;  %v973_v45 = vadd.f32 %v972_v17, %v971_v38  ;;  %v658_v38 = vld [vmem:[%s4006_s7 + $0x7d0] sm:$0xff]  ;;  %v628_v17 = vld [vmem:[%s4006_s7 + $0x6e0] sm:$0xff] }
 0x10e   : > { %v987_v7 = vadd.f32 %v986_v53, %v985_v40  ;;  %v1001_v48 = vadd.f32 %v1000_v60, %v999_v26  ;;  %v1028_v51 = vrot.slane %v1027_v55, 2  ;;  %v1015_v12 = vadd.f32 %v1014_v28, %v1013_v46  ;;  %v672_v40 = vld [vmem:[%s4006_s7 + $0x840] sm:$0xff]  ;;  %v673_v26 = vld [vmem:[%s4006_s7 + $0x848] sm:$0xff]  ;;  %v615_v46 = vld [vmem:[%s4006_s7 + $0x678] sm:$0xff] }
 0x10f   : > { %v932_v6 = vrot.slane %v931_v25, 1  ;;  %v946_v11 = vrot.slane %v945_v22, 1  ;;  %v960_v47 = vrot.slane %v959_v24, 1  ;;  %v974_v15 = vrot.slane %v973_v45, 1  ;;  %v629_v53 = vld [vmem:[%s4006_s7 + $0x6e8] sm:$0xff]  ;;  %v659_v60 = vld [vmem:[%s4006_s7 + $0x7d8] sm:$0xff] }
 0x110   : > { %v988_v20 = vrot.slane %v987_v7, 1  ;;  %v1002_v18 = vrot.slane %v1001_v48, 1  ;;  %v1029_v19 = vadd.f32 %v1028_v51, %v1027_v55  ;;  %v1016_v0 = vrot.slane %v1015_v12, 1  ;;  %v674_v28 = vld [vmem:[%s4006_s7 + $0x850] sm:$0xff] }
 0x111   : > { %v4358_v27 = vadd.f32 %v932_v6, %v931_v25  ;;  %v4360_v8 = vadd.f32 %v946_v11, %v945_v22  ;;  %v4362_v36 = vadd.f32 %v960_v47, %v959_v24  ;;  %v4368_v2 = vadd.f32 %v974_v15, %v973_v45  ;;  %v688_v45 = vld [vmem:[%s4006_s7 + $0x8c0] sm:$0xff]  ;;  %v675_v47 = vld [vmem:[%s4006_s7 + $0x858] sm:$0xff] }
 0x112   : > { %v4370_v43 = vadd.f32 %v988_v20, %v987_v7  ;;  %v4372_v16 = vadd.f32 %v1002_v18, %v1001_v48  ;;  %v1030_v34 = vrot.slane %v1029_v19, 1  ;;  %v4378_v55 = vadd.f32 %v1016_v0, %v1015_v12  ;;  %v689_v7 = vld [vmem:[%s4006_s7 + $0x8c8] sm:$0xff]  ;;  %v631_v15 = vld [vmem:[%s4006_s7 + $0x6f8] sm:$0xff]  ;;  %v690_v20 = vld [vmem:[%s4006_s7 + $0x8d0] sm:$0xff] }
 0x113   : > { %v1037_v25 = vadd.f32 %v4344_v29, %v656_v1  ;;  %v1051_v22 = vadd.f32 %v4348_v31, %v657_v33  ;;  %v1064_v24 = vadd.f32 %v4335_v52, %v642_v42  ;;  %v1078_v51 = vadd.f32 %v4337_v35, %v643_v10  ;;  %v644_v29 = vld [vmem:[%s4006_s7 + $0x760] sm:$0xff]  ;;  %v645_v31 = vld [vmem:[%s4006_s7 + $0x768] sm:$0xff]  ;;  %v630_v33 = vld [vmem:[%s4006_s7 + $0x6f0] sm:$0xff] }
 0x114   : > { %v4386_v48 = vadd.f32 %v1030_v34, %v1029_v19  ;;  %v1090_v6 = vadd.f32 %v4326_v41, %v612_v30  ;;  %v1104_v11 = vadd.f32 %v4328_v39, %v613_v21  ;;  %v1117_v1 = vadd.f32 %v4330_v59, %v598_v14  ;;  %v660_v19 = vld [vmem:[%s4006_s7 + $0x7e0] sm:$0xff]  ;;  %v661_v30 = vld [vmem:[%s4006_s7 + $0x7e8] sm:$0xff]  ;;  %v691_v21 = vld [vmem:[%s4006_s7 + $0x8d8] sm:$0xff] }
 0x115   : > { %v1038_v52 = vadd.f32 %v1037_v25, %v672_v40  ;;  %v1052_v12 = vadd.f32 %v1051_v22, %v673_v26  ;;  %v1065_v42 = vadd.f32 %v1064_v24, %v658_v38  ;;  %v1079_v35 = vadd.f32 %v1078_v51, %v659_v60  ;;  %v646_v59 = vld [vmem:[%s4006_s7 + $0x770] sm:$0xff]  ;;  %v676_v60 = vld [vmem:[%s4006_s7 + $0x860] sm:$0xff]  ;;  %v677_v25 = vld [vmem:[%s4006_s7 + $0x868] sm:$0xff] }
 0x116   : > { %v1091_v41 = vadd.f32 %v1090_v6, %v628_v17  ;;  %v1105_v18 = vadd.f32 %v1104_v11, %v629_v53  ;;  %v1131_v39 = vadd.f32 %v4339_v44, %v599_v32  ;;  %v1118_v40 = vadd.f32 %v1117_v1, %v614_v37  ;;  %v647_v53 = vld [vmem:[%s4006_s7 + $0x778] sm:$0xff]  ;;  %v692_v11 = vld [vmem:[%s4006_s7 + $0x8e0] sm:$0xff] }
 0x117   : > { %v1039_v10 = vadd.f32 %v1038_v52, %v688_v45  ;;  %v1053_v0 = vadd.f32 %v1052_v12, %v689_v7  ;;  %v1066_v38 = vadd.f32 %v1065_v42, %v674_v28  ;;  %v1080_v14 = vadd.f32 %v1079_v35, %v675_v47  ;;  %v662_v45 = vld [vmem:[%s4006_s7 + $0x7f0] sm:$0xff]  ;;  %v663_v6 = vld [vmem:[%s4006_s7 + $0x7f8] sm:$0xff] }
 0x118   : > { %v1092_v26 = vadd.f32 %v1091_v41, %v644_v29  ;;  %v1106_v34 = vadd.f32 %v1105_v18, %v645_v31  ;;  %v1132_v17 = vadd.f32 %v1131_v39, %v615_v46  ;;  %v1119_v24 = vadd.f32 %v1118_v40, %v630_v33  ;;  %v693_v29 = vld [vmem:[%s4006_s7 + $0x8e8] sm:$0xff]  ;;  %v678_v12 = vld [vmem:[%s4006_s7 + $0x870] sm:$0xff]  ;;  %v679_v35 = vld [vmem:[%s4006_s7 + $0x878] sm:$0xff] }
 0x119   : > { %v1040_v44 = vrot.slane %v1039_v10, 4  ;;  %v1054_v32 = vrot.slane %v1053_v0, 4  ;;  %v1067_v22 = vadd.f32 %v1066_v38, %v690_v20  ;;  %v1081_v7 = vadd.f32 %v1080_v14, %v691_v21 }
 0x11a   : > { %v1093_v37 = vadd.f32 %v1092_v26, %v660_v19  ;;  %v1107_v28 = vadd.f32 %v1106_v34, %v661_v30  ;;  %v1133_v51 = vadd.f32 %v1132_v17, %v631_v15  ;;  %v1120_v52 = vadd.f32 %v1119_v24, %v646_v59  ;;  %v694_v15 = vld [vmem:[%s4006_s7 + $0x8f0] sm:$0xff] }
 0x11b   : > { %v1041_v31 = vadd.f32 %v1040_v44, %v1039_v10  ;;  %v1055_v46 = vadd.f32 %v1054_v32, %v1053_v0  ;;  %v1068_v47 = vrot.slane %v1067_v22, 4  ;;  %v1082_v42 = vrot.slane %v1081_v7, 4  ;;  %v695_v10 = vld [vmem:[%s4006_s7 + $0x8f8] sm:$0xff] }
 0x11c   : > { %v1094_v1 = vadd.f32 %v1093_v37, %v676_v60  ;;  %v1108_v20 = vadd.f32 %v1107_v28, %v677_v25  ;;  %v1134_v33 = vadd.f32 %v1133_v51, %v647_v53  ;;  %v1121_v19 = vadd.f32 %v1120_v52, %v662_v45 }
 0x11d   : > { %v1042_v41 = vrot.slane %v1041_v31, 2  ;;  %v1056_v18 = vrot.slane %v1055_v46, 2  ;;  %v1069_v39 = vadd.f32 %v1068_v47, %v1067_v22  ;;  %v1083_v30 = vadd.f32 %v1082_v42, %v1081_v7 }
 0x11e   : > { %v1095_v21 = vadd.f32 %v1094_v1, %v692_v11  ;;  %v1109_v38 = vadd.f32 %v1108_v20, %v693_v29  ;;  %v1135_v40 = vadd.f32 %v1134_v33, %v663_v6  ;;  %v1122_v26 = vadd.f32 %v1121_v19, %v678_v12 }
 0x11f   : > { %v1043_v0 = vadd.f32 %v1042_v41, %v1041_v31  ;;  %v1057_v14 = vadd.f32 %v1056_v18, %v1055_v46  ;;  %v1070_v59 = vrot.slane %v1069_v39, 2  ;;  %v1084_v34 = vrot.slane %v1083_v30, 2 }
 0x120   : > { %v1096_v17 = vrot.slane %v1095_v21, 4  ;;  %v1110_v60 = vrot.slane %v1109_v38, 4  ;;  %v1136_v25 = vadd.f32 %v1135_v40, %v679_v35  ;;  %v1123_v24 = vadd.f32 %v1122_v26, %v694_v15  ;;  %v4764_v26 = vld [vmem:[#allocation27_spill] sm:$0xff] }
 0x121   : > { %v1044_v53 = vrot.slane %v1043_v0, 1  ;;  %v1058_v44 = vrot.slane %v1057_v14, 1  ;;  %v1071_v32 = vadd.f32 %v1070_v59, %v1069_v39  ;;  %v1085_v22 = vadd.f32 %v1084_v34, %v1083_v30  ;;  %v4765_v34 = vld [vmem:[#allocation26_spill] sm:$0xff] }
 0x122   : > { %v1097_v45 = vadd.f32 %v1096_v17, %v1095_v21  ;;  %v1111_v37 = vadd.f32 %v1110_v60, %v1109_v38  ;;  %v1137_v7 = vadd.f32 %v1136_v25, %v695_v10  ;;  %v1124_v11 = vrot.slane %v1123_v24, 4 }
 0x123   : > { %v4414_v28 = vadd.f32 %v1044_v53, %v1043_v0  ;;  %v4416_v51 = vadd.f32 %v1058_v44, %v1057_v14  ;;  %v1072_v6 = vrot.slane %v1071_v32, 1  ;;  %v1086_v29 = vrot.slane %v1085_v22, 1  ;;  %v1359_v44 = vld [vmem:[%s4013_s28] sm:$0xff] }
 0x124   : > { %v1098_v31 = vrot.slane %v1097_v45, 2  ;;  %v1112_v46 = vrot.slane %v1111_v37, 2  ;;  %v1138_v47 = vrot.slane %v1137_v7, 4  ;;  %v1125_v12 = vadd.f32 %v1124_v11, %v1123_v24  ;;  %v1427_v11 = vld [vmem:[%s4013_s28 + $0x220] sm:$0xff] }
 0x125   : > { %v4418_v52 = vadd.f32 %v1072_v6, %v1071_v32  ;;  %v1176_v42 = vcombine.low %v4188_v61, %v4190_v62  ;;  %v1177_v1 = vcombine.low %v4192_v63, %v4195_v3  ;;  %v4424_v20 = vadd.f32 %v1086_v29, %v1085_v22  ;;  %v1360_v22 = vld [vmem:[%s4013_s28 + $0x8] sm:$0xff] }
 0x126   : > { %v1099_v33 = vadd.f32 %v1098_v31, %v1097_v45  ;;  %v1113_v35 = vadd.f32 %v1112_v46, %v1111_v37  ;;  %v1139_v41 = vadd.f32 %v1138_v47, %v1137_v7  ;;  %v1126_v18 = vrot.slane %v1125_v12, 2  ;;  %v1361_v45 = vld [vmem:[%s4013_s28 + $0x10] sm:$0xff]  ;;  %v1362_v37 = vld [vmem:[%s4013_s28 + $0x18] sm:$0xff]  ;;  %v1364_v46 = vld [vmem:[%s4013_s28 + $0x28] sm:$0xff] }
 0x127   : > { %v4427_v39 = vrot.slane %v1176_v42, %v4070_v54  ;;  %v4430_v19 = vrot.slane %v1177_v1, %v4070_v54  ;;  %v1193_v15 = vcombine.low %v4197_v4, %v4199_v5  ;;  %v1194_v63 = vcombine.low %v4202_v9, %v4207_v13  ;;  %v1426_v47 = vld [vmem:[%s4013_s28 + $0x218] sm:$0xff]  ;;  %v1429_v1 = vld [vmem:[%s4013_s28 + $0x230] sm:$0xff] }
 0x128   : > { %v1100_v30 = vrot.slane %v1099_v33, 1  ;;  %v1114_v61 = vrot.slane %v1113_v35, 1  ;;  %v1140_v62 = vrot.slane %v1139_v41, 2  ;;  %v1127_v3 = vadd.f32 %v1126_v18, %v1125_v12  ;;  %v1428_v12 = vld [vmem:[%s4013_s28 + $0x228] sm:$0xff] }
 0x129   : > { %v1192_v21 = vcombine.low %v4427_v39, %v4430_v19  ;;  %v4439_v38 = vrot.slane %v1193_v15, %v4070_v54  ;;  %v1210_v40 = vcombine.low %v4235_v49, %v4237_v50  ;;  %v4444_v4 = vrot.slane %v1194_v63, %v4070_v54  ;;  %v1365_v15 = vld [vmem:[%s4013_s28 + $0x30] sm:$0xff]  ;;  %v1431_v63 = vld [vmem:[%s4013_s28 + $0x240] sm:$0xff] }
 0x12a   : > { %v1101_v10 = vadd.f32 %v1100_v30, %v1099_v33  ;;  %v1115_v0 = vadd.f32 %v1114_v61, %v1113_v35  ;;  %v1141_v14 = vadd.f32 %v1140_v62, %v1139_v41  ;;  %v1128_v5 = vrot.slane %v1127_v3, 1  ;;  %v1366_v30 = vld [vmem:[%s4013_s28 + $0x38] sm:$0xff] }
 0x12b   : > { %v1211_v9 = vcombine.low %v4239_v23, %v4244_v56  ;;  %v4449_v13 = vrot.slane %v1210_v40, %v4070_v54  ;;  %v1227_v59 = vcombine.low %v4246_v57, %v4248_v58  ;;  %v1209_v50 = vcombine.low %v4439_v38, %v4444_v4 }
 0x12c   : > { %v1142_v49 = vrot.slane %v1141_v14, 1  ;;  %v1228_v17 = vcombine.low %v4765_v34, %v4764_v26  ;;  %v1244_v60 = vcombine.low %v4358_v27, %v4360_v8  ;;  %v1129_v23 = vadd.f32 %v1128_v5, %v1127_v3 }
 0x12d   : > { %v4460_v56 = vrot.slane %v1211_v9, %v4070_v54  ;;  %v4463_v57 = vrot.slane %v1227_v59, %v4070_v54  ;;  %v1245_v58 = vcombine.low %v4362_v36, %v4368_v2  ;;  %v1261_v8 = vcombine.low %v4370_v43, %v4372_v16  ;;  %v1367_v9 = vld [vmem:[%s4013_s28 + $0x40] sm:$0xff] }
 0x12e   : > { %v1143_v25 = vadd.f32 %v1142_v49, %v1141_v14  ;;  %v4468_v53 = vrot.slane %v1228_v17, %v4070_v54  ;;  %v1252_v27 = vrot.slane %v1244_v60, %v4070_v54  ;;  %v1262_v36 = vcombine.low %v4378_v55, %v4386_v48  ;;  %v1363_v55 = vld [vmem:[%s4013_s28 + $0x20] sm:$0xff]  ;;  %v1425_v48 = vld [vmem:[%s4013_s28 + $0x210] sm:$0xff] }
 0x12f   : > { %v1226_v32 = vcombine.low %v4449_v13, %v4460_v56  ;;  %v1259_v24 = vrot.slane %v1245_v58, %v4070_v54  ;;  %v1278_v2 = vcombine.low %v4414_v28, %v4416_v51  ;;  %v1269_v16 = vrot.slane %v1261_v8, %v4070_v54  ;;  %v404_v59 = vld [vmem:[#allocation2] sm:$0xff]  ;;  %v405_v56 = vld [vmem:[#allocation2 + $0x8] sm:$0xff]  ;;  %v406_v8 = vld [vmem:[#allocation2 + $0x10] sm:$0xff] }
 0x130   : > { %v1243_v43 = vcombine.low %v4463_v57, %v4468_v53  ;;  %v1279_v7 = vcombine.low %v4418_v52, %v4424_v20  ;;  %v1295_v6 = vcombine.low %v1101_v10, %v1115_v0  ;;  %v1276_v51 = vrot.slane %v1262_v36, %v4070_v54  ;;  %v1368_v53 = vld [vmem:[%s4013_s28 + $0x48] sm:$0xff]  ;;  %v1433_v36 = vld [vmem:[%s4013_s28 + $0x250] sm:$0xff] }
 0x131   : > { %v1260_v28 = vcombine.low %v1252_v27, %v1259_v24  ;;  %v1286_v29 = vrot.slane %v1278_v2, %v4070_v54  ;;  %v1296_v31 = vcombine.low %v1129_v23, %v1143_v25  ;;  %v1491_v20 = vadd.f32 %v1361_v45, %v1359_v44  ;;  %v1371_v24 = vld [vmem:[%s4013_s28 + $0x60] sm:$0xff]  ;;  %v407_v2 = vld [vmem:[#allocation2 + $0x18] sm:$0xff] }
 0x132   : > { %v1293_v42 = vrot.slane %v1279_v7, %v4070_v54  ;;  %v1303_v52 = vrot.slane %v1295_v6, %v4070_v54  ;;  %v1529_v33 = vadd.f32 %v1362_v37, %v1360_v22  ;;  %v1277_v35 = vcombine.low %v1269_v16, %v1276_v51  ;;  %v1370_v37 = vld [vmem:[%s4013_s28 + $0x58] sm:$0xff] }
 0x133   : > { %v1310_v41 = vrot.slane %v1296_v31, %v4070_v54  ;;  %v1316_v18 = vrot.slane %v1260_v28, 7  ;;  %v1567_v61 = vadd.f32 %v1427_v11, %v1425_v48  ;;  %v1492_v3 = vadd.f32 %v1491_v20, %v1363_v55  ;;  %v1430_v16 = vld [vmem:[%s4013_s28 + $0x238] sm:$0xff]  ;;  %v1373_v48 = vld [vmem:[%s4013_s28 + $0x70] sm:$0xff]  ;;  %v1435_v11 = vld [vmem:[%s4013_s28 + $0x260] sm:$0xff] }
 0x134   : > { %v1294_v62 = vcombine.low %v1286_v29, %v1293_v42  ;;  %v1530_v40 = vadd.f32 %v1529_v33, %v1364_v46  ;;  %v1605_v10 = vadd.f32 %v1428_v12, %v1426_v47  ;;  %v1327_v5 = vrot.slane %v1277_v35, 7  ;;  %v1372_v31 = vld [vmem:[%s4013_s28 + $0x68] sm:$0xff]  ;;  %v1374_v35 = vld [vmem:[%s4013_s28 + $0x78] sm:$0xff] }
 0x135   : > { %v1311_v0 = vcombine.low %v1303_v52, %v1310_v41  ;;  %v1318_v14 = vsel %vm1317_vm0, %v1316_v18, %v1192_v21  ;;  %v1568_v13 = vadd.f32 %v1567_v61, %v1429_v1  ;;  %v1493_v34 = vadd.f32 %v1492_v3, %v1365_v15  ;;  %v1369_v21 = vld [vmem:[%s4013_s28 + $0x50] sm:$0xff]  ;;  %v1432_v46 = vld [vmem:[%s4013_s28 + $0x248] sm:$0xff]  ;;  %v1375_v52 = vld [vmem:[%s4013_s28 + $0x80] sm:$0xff] }
 0x136   : > { %v1320_v49 = vsel %vm1319_vm1, %v1316_v18, %v1318_v14  ;;  %v1334_v26 = vrot.slane %v1294_v62, 7  ;;  %v1531_v17 = vadd.f32 %v1530_v40, %v1366_v30  ;;  %v1328_v39 = vsel %vm1317_vm0, %v1327_v5, %v1209_v50  ;;  %v1437_v1 = vld [vmem:[%s4013_s28 + $0x270] sm:$0xff]  ;;  %v1434_v41 = vld [vmem:[%s4013_s28 + $0x258] sm:$0xff]  ;;  %v1439_v61 = vld [vmem:[%s4013_s28 + $0x280] sm:$0xff] }
 0x137   : > { %v1322_v60 = vsel %vm1321_vm2, %v1316_v18, %v1320_v49  ;;  %v1341_v19 = vrot.slane %v1311_v0, 7  ;;  %v1569_v23 = vadd.f32 %v1568_v13, %v1431_v63  ;;  %v1329_v58 = vsel %vm1319_vm1, %v1327_v5, %v1328_v39  ;;  %v1377_v30 = vld [vmem:[%s4013_s28 + $0x90] sm:$0xff]  ;;  %v1376_v3 = vld [vmem:[%s4013_s28 + $0x88] sm:$0xff]  ;;  %v1379_v14 = vld [vmem:[%s4013_s28 + $0xa0] sm:$0xff] }
 0x138   : > { %v1324_v57 = vsel %vm1323_vm3, %v1316_v18, %v1322_v60  ;;  %v1335_v25 = vsel %vm1317_vm0, %v1334_v26, %v1226_v32  ;;  %v1494_v27 = vadd.f32 %v1493_v34, %v1367_v9  ;;  %v1330_v38 = vsel %vm1321_vm2, %v1327_v5, %v1329_v58  ;;  %v1436_v40 = vld [vmem:[%s4013_s28 + $0x268] sm:$0xff]  ;;  %v1438_v49 = vld [vmem:[%s4013_s28 + $0x278] sm:$0xff]  ;;  %v1443_v60 = vld [vmem:[%s4013_s28 + $0x2a0] sm:$0xff] }
 0x139   : > { %v1336_v4 = vsel %vm1319_vm1, %v1334_v26, %v1335_v25  ;;  %v1342_v50 = vsel %vm1317_vm0, %v1341_v19, %v1243_v43  ;;  %v1350_v44 = vadd.f32 %v1324_v57, %v404_v59  ;;  %v1331_v22 = vsel %vm1323_vm3, %v1327_v5, %v1330_v38  ;;  %v1441_v5 = vld [vmem:[%s4013_s28 + $0x290] sm:$0xff]  ;;  %v1378_v59 = vld [vmem:[%s4013_s28 + $0x98] sm:$0xff]  ;;  %v1383_v58 = vld [vmem:[%s4013_s28 + $0xc0] sm:$0xff] }
 0x13a   : > { %v1337_v32 = vsel %vm1321_vm2, %v1334_v26, %v1336_v4  ;;  %v1343_v45 = vsel %vm1319_vm1, %v1341_v19, %v1342_v50  ;;  %v1495_v7 = vadd.f32 %v1494_v27, %v1369_v21  ;;  %v1351_v55 = vadd.f32 %v1331_v22, %v405_v56  ;;  %v1380_v21 = vld [vmem:[%s4013_s28 + $0xa8] sm:$0xff]  ;;  %v1445_v25 = vld [vmem:[%s4013_s28 + $0x2b0] sm:$0xff]  ;;  %v1442_v38 = vld [vmem:[%s4013_s28 + $0x298] sm:$0xff] }
 0x13b   : > { %v1338_v6 = vsel %vm1323_vm3, %v1334_v26, %v1337_v32  ;;  %v1344_v43 = vsel %vm1321_vm2, %v1341_v19, %v1343_v45  ;;  %1354 = vst [vmem:[#allocation2] sm:$0xff] %v1350_v44  ;;  %v1532_v28 = vadd.f32 %v1531_v17, %v1368_v53  ;;  %v1570_v12 = vadd.f32 %v1569_v23, %v1433_v36  ;;  %v1381_v17 = vld [vmem:[%s4013_s28 + $0xb0] sm:$0xff]  ;;  %v1440_v23 = vld [vmem:[%s4013_s28 + $0x288] sm:$0xff] }
 0x13c   : > { %v1345_v51 = vsel %vm1323_vm3, %v1341_v19, %v1344_v43  ;;  %v1352_v29 = vadd.f32 %v1338_v6, %v406_v8  ;;  %v1496_v47 = vadd.f32 %v1495_v7, %v1371_v24  ;;  %1355 = vst [vmem:[#allocation2 + $0x8] sm:$0xff] %v1351_v55  ;;  %v1606_v33 = vadd.f32 %v1605_v10, %v1430_v16  ;;  %v1382_v8 = vld [vmem:[%s4013_s28 + $0xb8] sm:$0xff]  ;;  %v1385_v44 = vld [vmem:[%s4013_s28 + $0xd0] sm:$0xff]  ;;  %v1447_v24 = vld [vmem:[%s4013_s28 + $0x2c0] sm:$0xff] }
 0x13d   : > { %v1353_v42 = vadd.f32 %v1345_v51, %v407_v2  ;;  %v1533_v20 = vadd.f32 %v1532_v28, %v1370_v37  ;;  %v1571_v15 = vadd.f32 %v1570_v12, %v1435_v11  ;;  %v1384_v22 = vld [vmem:[%s4013_s28 + $0xc8] sm:$0xff]  ;;  %v1387_v16 = vld [vmem:[%s4013_s28 + $0xe0] sm:$0xff]  ;;  %v1449_v7 = vld [vmem:[%s4013_s28 + $0x2d0] sm:$0xff] }
 0x13e   : > { %1356 = vst [vmem:[#allocation2 + $0x10] sm:$0xff] %v1352_v29  ;;  %v1497_v18 = vadd.f32 %v1496_v47, %v1373_v48  ;;  %v1607_v63 = vadd.f32 %v1606_v33, %v1432_v46  ;;  %v1444_v32 = vld [vmem:[%s4013_s28 + $0x2a8] sm:$0xff]  ;;  %v1386_v55 = vld [vmem:[%s4013_s28 + $0xd8] sm:$0xff]  ;;  %v1389_v51 = vld [vmem:[%s4013_s28 + $0xf0] sm:$0xff] }
 0x13f   : > { %1357 = vst [vmem:[#allocation2 + $0x18] sm:$0xff] %v1353_v42  ;;  %v1534_v62 = vadd.f32 %v1533_v20, %v1372_v31  ;;  %v1572_v0 = vadd.f32 %v1571_v15, %v1437_v1  ;;  %v1446_v48 = vld [vmem:[%s4013_s28 + $0x2b8] sm:$0xff]  ;;  %v1451_v29 = vld [vmem:[%s4013_s28 + $0x2e0] sm:$0xff]  ;;  %v1388_v47 = vld [vmem:[%s4013_s28 + $0xe8] sm:$0xff] }
 0x140   : > { %v1498_v10 = vadd.f32 %v1497_v18, %v1375_v52  ;;  %v1608_v13 = vadd.f32 %v1607_v63, %v1434_v41  ;;  %v1448_v12 = vld [vmem:[%s4013_s28 + $0x2c8] sm:$0xff]  ;;  %v1391_v1 = vld [vmem:[%s4013_s28 + $0x100] sm:$0xff]  ;;  %v1453_v20 = vld [vmem:[%s4013_s28 + $0x2f0] sm:$0xff] }
 0x141   : > { %v1535_v9 = vadd.f32 %v1534_v62, %v1374_v35  ;;  %v1573_v34 = vadd.f32 %v1572_v0, %v1439_v61  ;;  %v1390_v41 = vld [vmem:[%s4013_s28 + $0xf8] sm:$0xff]  ;;  %v1393_v61 = vld [vmem:[%s4013_s28 + $0x110] sm:$0xff]  ;;  %v1455_v62 = vld [vmem:[%s4013_s28 + $0x300] sm:$0xff] }
 0x142   : > { %v1499_v26 = vadd.f32 %v1498_v10, %v1377_v30  ;;  %v1609_v19 = vadd.f32 %v1608_v13, %v1436_v40  ;;  %v1450_v18 = vld [vmem:[%s4013_s28 + $0x2d8] sm:$0xff]  ;;  %v1392_v40 = vld [vmem:[%s4013_s28 + $0x108] sm:$0xff] }
 0x143   : > { %v1536_v39 = vadd.f32 %v1535_v9, %v1376_v3  ;;  %v1574_v57 = vadd.f32 %v1573_v34, %v1441_v5  ;;  %v1452_v10 = vld [vmem:[%s4013_s28 + $0x2e8] sm:$0xff]  ;;  %v1395_v5 = vld [vmem:[%s4013_s28 + $0x120] sm:$0xff]  ;;  %v1457_v9 = vld [vmem:[%s4013_s28 + $0x310] sm:$0xff] }
 0x144   : > { %v1500_v56 = vadd.f32 %v1499_v26, %v1379_v14  ;;  %v1610_v27 = vadd.f32 %v1609_v19, %v1438_v49  ;;  %v1394_v49 = vld [vmem:[%s4013_s28 + $0x118] sm:$0xff] }
 0x145   : > { %v1537_v53 = vadd.f32 %v1536_v39, %v1378_v59  ;;  %v1575_v50 = vadd.f32 %v1574_v57, %v1443_v60  ;;  %v1454_v26 = vld [vmem:[%s4013_s28 + $0x2f8] sm:$0xff]  ;;  %v1397_v60 = vld [vmem:[%s4013_s28 + $0x130] sm:$0xff]  ;;  %v1459_v39 = vld [vmem:[%s4013_s28 + $0x320] sm:$0xff] }
 0x146   : > { %v1501_v4 = vadd.f32 %v1500_v56, %v1381_v17  ;;  %v1611_v2 = vadd.f32 %v1610_v27, %v1440_v23  ;;  %v1396_v23 = vld [vmem:[%s4013_s28 + $0x128] sm:$0xff] }
 0x147   : > { %v1538_v36 = vadd.f32 %v1537_v53, %v1380_v21  ;;  %v1576_v37 = vadd.f32 %v1575_v50, %v1445_v25  ;;  %v1456_v56 = vld [vmem:[%s4013_s28 + $0x308] sm:$0xff]  ;;  %v1399_v25 = vld [vmem:[%s4013_s28 + $0x140] sm:$0xff]  ;;  %v1461_v53 = vld [vmem:[%s4013_s28 + $0x330] sm:$0xff] }
 0x148   : > { %v1502_v45 = vadd.f32 %v1501_v4, %v1383_v58  ;;  %v1612_v43 = vadd.f32 %v1611_v2, %v1442_v38  ;;  %v1398_v38 = vld [vmem:[%s4013_s28 + $0x138] sm:$0xff] }
 0x149   : > { %v1539_v6 = vadd.f32 %v1538_v36, %v1382_v8  ;;  %v1577_v28 = vadd.f32 %v1576_v37, %v1447_v24  ;;  %v1458_v4 = vld [vmem:[%s4013_s28 + $0x318] sm:$0xff]  ;;  %v1401_v24 = vld [vmem:[%s4013_s28 + $0x150] sm:$0xff]  ;;  %v1463_v36 = vld [vmem:[%s4013_s28 + $0x340] sm:$0xff] }
 0x14a   : > { %v1503_v11 = vadd.f32 %v1502_v45, %v1385_v44  ;;  %v1613_v46 = vadd.f32 %v1612_v43, %v1444_v32  ;;  %v1400_v32 = vld [vmem:[%s4013_s28 + $0x148] sm:$0xff] }
 0x14b   : > { %v1540_v31 = vadd.f32 %v1539_v6, %v1384_v22  ;;  %v1578_v52 = vadd.f32 %v1577_v28, %v1449_v7  ;;  %v1460_v45 = vld [vmem:[%s4013_s28 + $0x328] sm:$0xff]  ;;  %v1403_v7 = vld [vmem:[%s4013_s28 + $0x160] sm:$0xff]  ;;  %v1465_v6 = vld [vmem:[%s4013_s28 + $0x350] sm:$0xff] }
 0x14c   : > { %v1504_v42 = vadd.f32 %v1503_v11, %v1387_v16  ;;  %v1614_v35 = vadd.f32 %v1613_v46, %v1446_v48  ;;  %v1402_v48 = vld [vmem:[%s4013_s28 + $0x158] sm:$0xff] }
 0x14d   : > { %v1541_v33 = vadd.f32 %v1540_v31, %v1386_v55  ;;  %v1579_v30 = vadd.f32 %v1578_v52, %v1451_v29  ;;  %v1462_v11 = vld [vmem:[%s4013_s28 + $0x338] sm:$0xff]  ;;  %v1405_v29 = vld [vmem:[%s4013_s28 + $0x170] sm:$0xff]  ;;  %v1467_v31 = vld [vmem:[%s4013_s28 + $0x360] sm:$0xff] }
 0x14e   : > { %v1505_v15 = vadd.f32 %v1504_v42, %v1389_v51  ;;  %v1615_v3 = vadd.f32 %v1614_v35, %v1448_v12  ;;  %v1404_v12 = vld [vmem:[%s4013_s28 + $0x168] sm:$0xff] }
 0x14f   : > { %v1542_v63 = vadd.f32 %v1541_v33, %v1388_v47  ;;  %v1580_v14 = vadd.f32 %v1579_v30, %v1453_v20  ;;  %v1464_v42 = vld [vmem:[%s4013_s28 + $0x348] sm:$0xff]  ;;  %v1407_v20 = vld [vmem:[%s4013_s28 + $0x180] sm:$0xff]  ;;  %v1469_v33 = vld [vmem:[%s4013_s28 + $0x370] sm:$0xff] }
 0x150   : > { %v1506_v0 = vadd.f32 %v1505_v15, %v1391_v1  ;;  %v1616_v59 = vadd.f32 %v1615_v3, %v1450_v18  ;;  %v1406_v18 = vld [vmem:[%s4013_s28 + $0x178] sm:$0xff] }
 0x151   : > { %v1543_v13 = vadd.f32 %v1542_v63, %v1390_v41  ;;  %v1581_v17 = vadd.f32 %v1580_v14, %v1455_v62  ;;  %v1466_v15 = vld [vmem:[%s4013_s28 + $0x358] sm:$0xff]  ;;  %v1409_v62 = vld [vmem:[%s4013_s28 + $0x190] sm:$0xff]  ;;  %v1471_v63 = vld [vmem:[%s4013_s28 + $0x380] sm:$0xff] }
 0x152   : > { %v1507_v34 = vadd.f32 %v1506_v0, %v1393_v61  ;;  %v1617_v21 = vadd.f32 %v1616_v59, %v1452_v10  ;;  %v1408_v10 = vld [vmem:[%s4013_s28 + $0x188] sm:$0xff] }
 0x153   : > { %v1544_v19 = vadd.f32 %v1543_v13, %v1392_v40  ;;  %v1582_v58 = vadd.f32 %v1581_v17, %v1457_v9  ;;  %v1468_v0 = vld [vmem:[%s4013_s28 + $0x368] sm:$0xff]  ;;  %v1411_v9 = vld [vmem:[%s4013_s28 + $0x1a0] sm:$0xff]  ;;  %v1473_v13 = vld [vmem:[%s4013_s28 + $0x390] sm:$0xff] }
 0x154   : > { %v1508_v57 = vadd.f32 %v1507_v34, %v1395_v5  ;;  %v1618_v8 = vadd.f32 %v1617_v21, %v1454_v26  ;;  %v1410_v26 = vld [vmem:[%s4013_s28 + $0x198] sm:$0xff] }
 0x155   : > { %v1545_v27 = vadd.f32 %v1544_v19, %v1394_v49  ;;  %v1583_v44 = vadd.f32 %v1582_v58, %v1459_v39  ;;  %v1470_v34 = vld [vmem:[%s4013_s28 + $0x378] sm:$0xff]  ;;  %v1413_v39 = vld [vmem:[%s4013_s28 + $0x1b0] sm:$0xff]  ;;  %v1475_v19 = vld [vmem:[%s4013_s28 + $0x3a0] sm:$0xff] }
 0x156   : > { %v1509_v50 = vadd.f32 %v1508_v57, %v1397_v60  ;;  %v1619_v22 = vadd.f32 %v1618_v8, %v1456_v56  ;;  %v1412_v56 = vld [vmem:[%s4013_s28 + $0x1a8] sm:$0xff] }
 0x157   : > { %v1546_v2 = vadd.f32 %v1545_v27, %v1396_v23  ;;  %v1584_v16 = vadd.f32 %v1583_v44, %v1461_v53  ;;  %v1472_v57 = vld [vmem:[%s4013_s28 + $0x388] sm:$0xff]  ;;  %v1415_v53 = vld [vmem:[%s4013_s28 + $0x1c0] sm:$0xff]  ;;  %v1477_v27 = vld [vmem:[%s4013_s28 + $0x3b0] sm:$0xff] }
 0x158   : > { %v1510_v37 = vadd.f32 %v1509_v50, %v1399_v25  ;;  %v1620_v55 = vadd.f32 %v1619_v22, %v1458_v4  ;;  %v1414_v4 = vld [vmem:[%s4013_s28 + $0x1b8] sm:$0xff] }
 0x159   : > { %v1547_v43 = vadd.f32 %v1546_v2, %v1398_v38  ;;  %v1585_v51 = vadd.f32 %v1584_v16, %v1463_v36  ;;  %v1474_v50 = vld [vmem:[%s4013_s28 + $0x398] sm:$0xff]  ;;  %v1417_v36 = vld [vmem:[%s4013_s28 + $0x1d0] sm:$0xff]  ;;  %v1479_v2 = vld [vmem:[%s4013_s28 + $0x3c0] sm:$0xff] }
 0x15a   : > { %v1511_v28 = vadd.f32 %v1510_v37, %v1401_v24  ;;  %v1621_v47 = vadd.f32 %v1620_v55, %v1460_v45  ;;  %v1416_v45 = vld [vmem:[%s4013_s28 + $0x1c8] sm:$0xff] }
 0x15b   : > { %v1548_v46 = vadd.f32 %v1547_v43, %v1400_v32  ;;  %v1586_v1 = vadd.f32 %v1585_v51, %v1465_v6  ;;  %v1476_v37 = vld [vmem:[%s4013_s28 + $0x3a8] sm:$0xff]  ;;  %v1419_v6 = vld [vmem:[%s4013_s28 + $0x1e0] sm:$0xff]  ;;  %v1481_v43 = vld [vmem:[%s4013_s28 + $0x3d0] sm:$0xff] }
 0x15c   : > { %v1512_v52 = vadd.f32 %v1511_v28, %v1403_v7  ;;  %v1622_v41 = vadd.f32 %v1621_v47, %v1462_v11  ;;  %v1418_v11 = vld [vmem:[%s4013_s28 + $0x1d8] sm:$0xff] }
 0x15d   : > { %v1549_v35 = vadd.f32 %v1548_v46, %v1402_v48  ;;  %v1587_v61 = vadd.f32 %v1586_v1, %v1467_v31  ;;  %v1478_v28 = vld [vmem:[%s4013_s28 + $0x3b8] sm:$0xff]  ;;  %v1421_v31 = vld [vmem:[%s4013_s28 + $0x1f0] sm:$0xff]  ;;  %v1483_v46 = vld [vmem:[%s4013_s28 + $0x3e0] sm:$0xff] }
 0x15e   : > { %v1513_v30 = vadd.f32 %v1512_v52, %v1405_v29  ;;  %v1623_v40 = vadd.f32 %v1622_v41, %v1464_v42  ;;  %v1420_v42 = vld [vmem:[%s4013_s28 + $0x1e8] sm:$0xff] }
 0x15f   : > { %v1550_v3 = vadd.f32 %v1549_v35, %v1404_v12  ;;  %v1588_v5 = vadd.f32 %v1587_v61, %v1469_v33  ;;  %v1480_v52 = vld [vmem:[%s4013_s28 + $0x3c8] sm:$0xff]  ;;  %v1423_v33 = vld [vmem:[%s4013_s28 + $0x200] sm:$0xff]  ;;  %v1485_v35 = vld [vmem:[%s4013_s28 + $0x3f0] sm:$0xff] }
 0x160   : > { %v1514_v14 = vadd.f32 %v1513_v30, %v1407_v20  ;;  %v1624_v49 = vadd.f32 %v1623_v40, %v1466_v15  ;;  %v1422_v15 = vld [vmem:[%s4013_s28 + $0x1f8] sm:$0xff] }
 0x161   : > { %v1551_v59 = vadd.f32 %v1550_v3, %v1406_v18  ;;  %v1589_v60 = vadd.f32 %v1588_v5, %v1471_v63  ;;  %v1482_v30 = vld [vmem:[%s4013_s28 + $0x3d8] sm:$0xff]  ;;  %v1487_v63 = vld [vmem:[%s4013_s28 + $0x400] sm:$0xff] }
 0x162   : > { %v1515_v17 = vadd.f32 %v1514_v14, %v1409_v62  ;;  %v1625_v23 = vadd.f32 %v1624_v49, %v1468_v0  ;;  %v1484_v0 = vld [vmem:[%s4013_s28 + $0x3e8] sm:$0xff]  ;;  %v1486_v49 = vld [vmem:[%s4013_s28 + $0x3f8] sm:$0xff] }
 0x163   : > { %v1552_v21 = vadd.f32 %v1551_v59, %v1408_v10  ;;  %v1590_v25 = vadd.f32 %v1589_v60, %v1473_v13  ;;  %v1424_v10 = vld [vmem:[%s4013_s28 + $0x208] sm:$0xff] }
 0x164   : > { %v1516_v58 = vadd.f32 %v1515_v17, %v1411_v9  ;;  %v1626_v38 = vadd.f32 %v1625_v23, %v1470_v34  ;;  %v1489_v9 = vld [vmem:[%s4013_s28 + $0x410] sm:$0xff] }
 0x165   : > { %v1553_v8 = vadd.f32 %v1552_v21, %v1410_v26  ;;  %v1591_v24 = vadd.f32 %v1590_v25, %v1475_v19 }
 0x166   : > { %v1517_v44 = vadd.f32 %v1516_v58, %v1413_v39  ;;  %v1627_v32 = vadd.f32 %v1626_v38, %v1472_v57  ;;  %v1488_v39 = vld [vmem:[%s4013_s28 + $0x408] sm:$0xff]  ;;  %v1490_v57 = vld [vmem:[%s4013_s28 + $0x418] sm:$0xff] }
 0x167   : > { %v1554_v22 = vadd.f32 %v1553_v8, %v1412_v56  ;;  %v1592_v7 = vadd.f32 %v1591_v24, %v1477_v27 }
 0x168   : > { %v1518_v16 = vadd.f32 %v1517_v44, %v1415_v53  ;;  %v1628_v48 = vadd.f32 %v1627_v32, %v1474_v50 }
 0x169   : > { %v1555_v55 = vadd.f32 %v1554_v22, %v1414_v4  ;;  %v1593_v29 = vadd.f32 %v1592_v7, %v1479_v2 }
 0x16a   : > { %v1519_v51 = vadd.f32 %v1518_v16, %v1417_v36  ;;  %v1629_v12 = vadd.f32 %v1628_v48, %v1476_v37 }
 0x16b   : > { %v1556_v47 = vadd.f32 %v1555_v55, %v1416_v45  ;;  %v1594_v20 = vadd.f32 %v1593_v29, %v1481_v43 }
 0x16c   : > { %v1520_v1 = vadd.f32 %v1519_v51, %v1419_v6  ;;  %v1630_v18 = vadd.f32 %v1629_v12, %v1478_v28  ;;  %v1358_v12 = vld [vmem:[#allocation3] sm:$0xf] }
 0x16d   : > { %v1557_v41 = vadd.f32 %v1556_v47, %v1418_v11  ;;  %v1595_v62 = vadd.f32 %v1594_v20, %v1483_v46 }
 0x16e   : > { %v1521_v61 = vadd.f32 %v1520_v1, %v1421_v31  ;;  %v1631_v40 = vadd.f32 %v1630_v18, %v1480_v52 }
 0x16f   : > { %v1558_v3 = vadd.f32 %v1557_v41, %v1420_v42  ;;  %v1596_v5 = vadd.f32 %v1595_v62, %v1485_v35  ;;  %v1736_v35 = vld [vmem:[#allocation9 + $0x88] sm:$0xff] (!%p2859_p4)  ;;  %v1767_v41 = vld [vmem:[#allocation9 + $0x180] sm:$0xff] (!%p2859_p4) }
 0x170   : > { %v1522_v14 = vadd.f32 %v1521_v61, %v1423_v33  ;;  %v1632_v59 = vadd.f32 %v1631_v40, %v1482_v30  ;;  %v1735_v33 = vld [vmem:[#allocation9 + $0x80] sm:$0xff] (!%p2859_p4)  ;;  %v1720_v61 = vld [vmem:[#allocation9 + $0x8] sm:$0xff] (!%p2859_p4) }
 0x171   : > { %v1559_v13 = vadd.f32 %v1558_v3, %v1422_v15  ;;  %v1597_v34 = vadd.f32 %v1596_v5, %v1487_v63  ;;  %v3186_v18 = vpack.c.bf16 (!%p2859_p4), %v1736_v35, %v1735_v33  ;;  %v1768_v15 = vld [vmem:[#allocation9 + $0x188] sm:$0xff] (!%p2859_p4)  ;;  %v1719_v30 = vld [vmem:[#allocation9] sm:$0xff] (!%p2859_p4)  ;;  %v1769_v5 = vld [vmem:[#allocation9 + $0x190] sm:$0xff] (!%p2859_p4) }
 0x172   : > { %v1523_v26 = vrot.slane %v1522_v14, 4  ;;  %v1633_v60 = vadd.f32 %v1632_v59, %v1484_v0  ;;  %v3218_v62 = vpack.c.bf16 (!%p2859_p4), %v1768_v15, %v1767_v41  ;;  %v3188_v63 = vpack.c.bf16 (!%p2859_p4), %v1720_v61, %v1719_v30  ;;  %v1751_v3 = vld [vmem:[#allocation9 + $0x100] sm:$0xff] (!%p2859_p4)  ;;  %v1752_v40 = vld [vmem:[#allocation9 + $0x108] sm:$0xff] (!%p2859_p4)  ;;  %v1729_v41 = vld [vmem:[#allocation9 + $0x50] sm:$0xff] (!%p2859_p4) }
 0x173   : > { %v1560_v17 = vadd.f32 %v1559_v13, %v1424_v10  ;;  %v1598_v21 = vadd.f32 %v1597_v34, %v1489_v9  ;;  %v1737_v10 = vld [vmem:[#allocation9 + $0x90] sm:$0xff] (!%p2859_p4)  ;;  %3187 = vmatprep.subr.bf16.mxu0 (!%p2859_p4), %v3186_v18  ;;  %v3220_v0 = vpack.c.bf16 (!%p2859_p4), %v1752_v40, %v1751_v3  ;;  %v1770_v9 = vld [vmem:[#allocation9 + $0x198] sm:$0xff] (!%p2859_p4)  ;;  %v1779_v3 = vld [vmem:[#allocation9 + $0x1e0] sm:$0xff] (!%p2859_p4) }
 0x174   : > { %v1524_v19 = vadd.f32 %v1523_v26, %v1522_v14  ;;  %v1634_v56 = vadd.f32 %v1633_v60, %v1486_v49  ;;  %v1738_v14 = vld [vmem:[#allocation9 + $0x98] sm:$0xff] (!%p2859_p4)  ;;  %3219 = vmatprep.subr.bf16.mxu1 (!%p2859_p4), %v3218_v62  ;;  %3189 = vmatpush3.bf16.msra.mxu0 (!%p2859_p4), %v3188_v63  ;;  %v3222_v59 = vpack.c.bf16 (!%p2859_p4), %v1770_v9, %v1769_v5  ;;  %v1721_v49 = vld [vmem:[#allocation9 + $0x10] sm:$0xff] (!%p2859_p4)  ;;  %v1747_v62 = vld [vmem:[#allocation9 + $0xe0] sm:$0xff] (!%p2859_p4) }
 0x175   : > { %v1561_v23 = vrot.slane %v1560_v17, 4  ;;  %v1599_v25 = vrot.slane %v1598_v21, 4  ;;  %v3190_v13 = vpack.c.bf16 (!%p2859_p4), %v1738_v14, %v1737_v10  ;;  %v1722_v26 = vld [vmem:[#allocation9 + $0x18] sm:$0xff] (!%p2859_p4)  ;;  %v1753_v34 = vld [vmem:[#allocation9 + $0x110] sm:$0xff] (!%p2859_p4)  ;;  %3221 = vmatpush3.bf16.msra.mxu1 (!%p2859_p4), %v3220_v0  ;;  %v1748_v63 = vld [vmem:[#allocation9 + $0xe8] sm:$0xff] (!%p2859_p4) }
 0x176   : > { %v1525_v58 = vrot.slane %v1524_v19, 2  ;;  %v1635_v27 = vadd.f32 %v1634_v56, %v1488_v39  ;;  %v1754_v60 = vld [vmem:[#allocation9 + $0x118] sm:$0xff] (!%p2859_p4)  ;;  %v1739_v39 = vld [vmem:[#allocation9 + $0xa0] sm:$0xff] (!%p2859_p4)  ;;  %3223 = vmatprep.subr.bf16.mxu1 (!%p2859_p4), %v3222_v59  ;;  %v1761_v15 = vld [vmem:[#allocation9 + $0x150] sm:$0xff] (!%p2859_p4)  ;;  %v3210_v5 = vpack.c.bf16 (!%p2859_p4), %v1748_v63, %v1747_v62 }
 0x177   : > { %v1562_v53 = vadd.f32 %v1561_v23, %v1560_v17  ;;  %v1600_v8 = vadd.f32 %v1599_v25, %v1598_v21  ;;  %v3192_v17 = vpack.c.bf16 (!%p2859_p4), %v1722_v26, %v1721_v49  ;;  %3191 = vmatprep.subr.bf16.mxu0 (!%p2859_p4), %v3190_v13  ;;  %v3224_v21 = vpack.c.bf16 (!%p2859_p4), %v1754_v60, %v1753_v34  ;;  %v1771_v56 = vld [vmem:[#allocation9 + $0x1a0] sm:$0xff] (!%p2859_p4)  ;;  %v1730_v18 = vld [vmem:[#allocation9 + $0x58] sm:$0xff] (!%p2859_p4)  ;;  %v1780_v40 = vld [vmem:[#allocation9 + $0x1e8] sm:$0xff] (!%p2859_p4) }
 0x178   : > { %v1526_v38 = vadd.f32 %v1525_v58, %v1524_v19  ;;  %v1636_v50 = vadd.f32 %v1635_v27, %v1490_v57  ;;  %v1740_v19 = vld [vmem:[#allocation9 + $0xa8] sm:$0xff] (!%p2859_p4)  ;;  %v1723_v58 = vld [vmem:[#allocation9 + $0x20] sm:$0xff] (!%p2859_p4)  ;;  %v1762_v61 = vld [vmem:[#allocation9 + $0x158] sm:$0xff] (!%p2859_p4)  ;;  %v3208_v10 = vpack.c.bf16 (!%p2859_p4), %v1730_v18, %v1729_v41  ;;  %v3242_v49 = vpack.c.bf16 (!%p2859_p4), %v1780_v40, %v1779_v3 }
 0x179   : > { %v1563_v4 = vrot.slane %v1562_v53, 2  ;;  %v1601_v44 = vrot.slane %v1600_v8, 2  ;;  %v3194_v23 = vpack.c.bf16 (!%p2859_p4), %v1740_v19, %v1739_v39  ;;  %v1772_v57 = vld [vmem:[#allocation9 + $0x1a8] sm:$0xff] (!%p2859_p4)  ;;  %v1755_v27 = vld [vmem:[#allocation9 + $0x120] sm:$0xff] (!%p2859_p4)  ;;  %3193 = vmatpush3.bf16.msra.mxu0 (!%p2859_p4), %v3192_v17  ;;  %3225 = vmatpush3.bf16.msra.mxu1 (!%p2859_p4), %v3224_v21  ;;  %v3240_v14 = vpack.c.bf16 (!%p2859_p4), %v1762_v61, %v1761_v15  ;;  %v1749_v34 = vld [vmem:[#allocation9 + $0xf0] sm:$0xff] (!%p2859_p4) }
 0x17a   : > { %v1637_v36 = vrot.slane %v1636_v50, 4  ;;  %v1527_v22 = vrot.slane %v1526_v38, 1  ;;  %v3226_v25 = vpack.c.bf16 (!%p2859_p4), %v1772_v57, %v1771_v56  ;;  %v1731_v0 = vld [vmem:[#allocation9 + $0x60] sm:$0xff] (!%p2859_p4)  ;;  %v1732_v9 = vld [vmem:[#allocation9 + $0x68] sm:$0xff] (!%p2859_p4)  ;;  %v1750_v17 = vld [vmem:[#allocation9 + $0xf8] sm:$0xff] (!%p2859_p4) }
 0x17b   : > { %v1564_v24 = vadd.f32 %v1563_v4, %v1562_v53  ;;  %v1602_v2 = vadd.f32 %v1601_v44, %v1600_v8  ;;  %v1724_v53 = vld [vmem:[#allocation9 + $0x28] sm:$0xff] (!%p2859_p4)  ;;  %v1741_v4 = vld [vmem:[#allocation9 + $0xb0] sm:$0xff] (!%p2859_p4)  ;;  %3195 = vmatprep.subr.bf16.mxu0 (!%p2859_p4), %v3194_v23  ;;  %v1763_v13 = vld [vmem:[#allocation9 + $0x160] sm:$0xff] (!%p2859_p4)  ;;  %v3212_v21 = vpack.c.bf16 (!%p2859_p4), %v1732_v9, %v1731_v0 }
 0x17c   : > { %v1638_v45 = vadd.f32 %v1637_v36, %v1636_v50  ;;  %v1528_v7 = vadd.f32 %v1527_v22, %v1526_v38  ;;  %v1756_v8 = vld [vmem:[#allocation9 + $0x128] sm:$0xff] (!%p2859_p4)  ;;  %v3196_v38 = vpack.c.bf16 (!%p2859_p4), %v1724_v53, %v1723_v58  ;;  %v1742_v50 = vld [vmem:[#allocation9 + $0xb8] sm:$0xff] (!%p2859_p4)  ;;  %v1773_v44 = vld [vmem:[#allocation9 + $0x1b0] sm:$0xff] (!%p2859_p4)  ;;  %3227 = vmatprep.subr.bf16.mxu1 (!%p2859_p4), %v3226_v25  ;;  %v3214_v58 = vpack.c.bf16 (!%p2859_p4), %v1750_v17, %v1749_v34 }
 0x17d   : > { %v1565_v32 = vrot.slane %v1564_v24, 1  ;;  %v1603_v37 = vrot.slane %v1602_v2, 1  ;;  %v3198_v36 = vpack.c.bf16 (!%p2859_p4), %v1742_v50, %v1741_v4  ;;  %v1725_v22 = vld [vmem:[#allocation9 + $0x30] sm:$0xff] (!%p2859_p4)  ;;  %v1677_v59 = vld [vmem:[#allocation2] sm:$0xff] (!%p2859_p4)  ;;  %v1764_v26 = vld [vmem:[#allocation9 + $0x168] sm:$0xff] (!%p2859_p4) }
 0x17e   : > { %v1639_v16 = vrot.slane %v1638_v45, 2  ;;  %3197 = vmatpush3.bf16.msra.mxu0 (!%p2859_p4), %v3196_v38  ;;  %v1681_v60 = vmul.f32 (!%p2859_p4), 0.0051020407, %v1677_v59  ;;  %v1781_v39 = vld [vmem:[#allocation9 + $0x1f0] sm:$0xff] (!%p2859_p4)  ;;  %v1782_v19 = vld [vmem:[#allocation9 + $0x1f8] sm:$0xff] (!%p2859_p4)  ;;  %v3244_v57 = vpack.c.bf16 (!%p2859_p4), %v1764_v26, %v1763_v13  ;;  %v1836_v41 = vld [vmem:[#allocation9 + $0x3a8] sm:$0xff] (!%p2859_p4) }
 0x17f   : > { %v1566_v6 = vadd.f32 %v1565_v32, %v1564_v24  ;;  %v1604_v55 = vadd.f32 %v1603_v37, %v1602_v2  ;;  %v3228_v24 = vpack.c.bf16 (!%p2859_p4), %v1756_v8, %v1755_v27  ;;  %v1774_v2 = vld [vmem:[#allocation9 + $0x1b8] sm:$0xff] (!%p2859_p4)  ;;  %v1757_v37 = vld [vmem:[#allocation9 + $0x130] sm:$0xff] (!%p2859_p4)  ;;  %3199 = vmatprep.subr.bf16.mxu0 (!%p2859_p4), %v3198_v36  ;;  %v3246_v8 = vpack.c.bf16 (!%p2859_p4), %v1782_v19, %v1781_v39  ;;  %v1831_v36 = vld [vmem:[#allocation9 + $0x380] sm:$0xff] (!%p2859_p4) }
 0x180   : > { %v1640_v43 = vadd.f32 %v1639_v16, %v1638_v45  ;;  %v1726_v32 = vld [vmem:[#allocation9 + $0x38] sm:$0xff] (!%p2859_p4)  ;;  %v3230_v45 = vpack.c.bf16 (!%p2859_p4), %v1774_v2, %v1773_v44  ;;  %v1986_v23 = vrot.slane (!%p2859_p4), %v1681_v60, %v4070_v54  ;;  %v1979_v56 = vcombine.high (!%p2859_p4), %v1681_v60, %v1681_v60  ;;  %v1733_v25 = vld [vmem:[#allocation9 + $0x70] sm:$0xff] (!%p2859_p4)  ;;  %v1799_v44 = vld [vmem:[#allocation9 + $0x280] sm:$0xff] (!%p2859_p4) }
 0x181   : > { %v1647_v28 = vcombine.low %v1528_v7, %v1566_v6  ;;  %v1758_v16 = vld [vmem:[#allocation9 + $0x138] sm:$0xff] (!%p2859_p4)  ;;  %v1743_v7 = vld [vmem:[#allocation9 + $0xc0] sm:$0xff] (!%p2859_p4)  ;;  %v1744_v6 = vld [vmem:[#allocation9 + $0xc8] sm:$0xff] (!%p2859_p4)  ;;  %3229 = vmatpush3.bf16.msra.mxu1 (!%p2859_p4), %v3228_v24 }
 0x182   : > { %v1641_v48 = vrot.slane %v1640_v43, 1  ;;  %3231 = vmatprep.subr.bf16.mxu1 (!%p2859_p4), %v3230_v45  ;;  %v1734_v53 = vld [vmem:[#allocation9 + $0x78] sm:$0xff] (!%p2859_p4)  ;;  %v1765_v27 = vld [vmem:[#allocation9 + $0x170] sm:$0xff] (!%p2859_p4)  ;;  %v1994_v4 = vcombine.high (!%p2859_p4), %v1986_v23, %v1986_v23  ;;  %v1993_v50 = vrot.slane (!%p2859_p4), %v1979_v56, %v4070_v54  ;;  %v1800_v24 = vld [vmem:[#allocation9 + $0x288] sm:$0xff] (!%p2859_p4) }
 0x183   : > { %v1654_v29 = vrot.slane %v1647_v28, %v4070_v54  ;;  %v3202_v28 = vpack.c.bf16 (!%p2859_p4), %v1744_v6, %v1743_v7  ;;  %v1766_v38 = vld [vmem:[#allocation9 + $0x178] sm:$0xff] (!%p2859_p4)  ;;  %v1832_v2 = vld [vmem:[#allocation9 + $0x388] sm:$0xff] (!%p2859_p4)  ;;  %v1815_v6 = vld [vmem:[#allocation9 + $0x300] sm:$0xff] (!%p2859_p4) }
 0x184   : > { %v1642_v11 = vadd.f32 %v1641_v48, %v1640_v43  ;;  %v1775_v43 = vld [vmem:[#allocation9 + $0x1c0] sm:$0xff] (!%p2859_p4)  ;;  %v3200_v48 = vpack.c.bf16 (!%p2859_p4), %v1726_v32, %v1725_v22  ;;  %v3216_v22 = vpack.c.bf16 (!%p2859_p4), %v1734_v53, %v1733_v25  ;;  %2127 = vmatprep.mubr.f32.mxu0 (!%p2859_p4), %v1994_v4  ;;  %v1995_v32 = vcombine.high (!%p2859_p4), %v1993_v50, %v1993_v50  ;;  %v1784_v7 = vld [vmem:[#allocation9 + $0x208] sm:$0xff] (!%p2859_p4)  ;;  %v1806_v0 = vld [vmem:[#allocation9 + $0x2b8] sm:$0xff] (!%p2859_p4) }
 0x185   : > { %v3248_v45 = vpack.c.bf16 (!%p2859_p4), %v1766_v38, %v1765_v27  ;;  %v1787_v61 = vld [vmem:[#allocation9 + $0x220] sm:$0xff] (!%p2859_p4)  ;;  %v1788_v62 = vld [vmem:[#allocation9 + $0x228] sm:$0xff] (!%p2859_p4)  ;;  %v1789_v13 = vld [vmem:[#allocation9 + $0x230] sm:$0xff] (!%p2859_p4) }
 0x186   : > { %v1655_v51 = vcombine.low %v1604_v55, %v1642_v11  ;;  %v1776_v55 = vld [vmem:[#allocation9 + $0x1c8] sm:$0xff] (!%p2859_p4)  ;;  %v3232_v11 = vpack.c.bf16 (!%p2859_p4), %v1758_v16, %v1757_v37  ;;  %3201 = vmatpush3.bf16.msra.mxu0 (!%p2859_p4), %v3200_v48  ;;  %v3250_v37 = vpack.c.bf16 (!%p2859_p4), %v1800_v24, %v1799_v44  ;;  %v1783_v16 = vld [vmem:[#allocation9 + $0x200] sm:$0xff] (!%p2859_p4)  ;;  %2197 = vmatprep.mubr.f32.mxu1 (!%p2859_p4), %v1995_v32  ;;  %v1801_v48 = vld [vmem:[#allocation9 + $0x290] sm:$0xff] (!%p2859_p4) }
 0x187   : > { %3203 = vmatprep.subr.bf16.mxu0 (!%p2859_p4), %v3202_v28  ;;  %v1833_v28 = vld [vmem:[#allocation9 + $0x390] sm:$0xff] (!%p2859_p4)  ;;  %v1819_v63 = vld [vmem:[#allocation9 + $0x320] sm:$0xff] (!%p2859_p4)  ;;  %v1820_v40 = vld [vmem:[#allocation9 + $0x328] sm:$0xff] (!%p2859_p4)  ;;  %v3260_v9 = vpack.c.bf16 (!%p2859_p4), %v1788_v62, %v1787_v61 }
 0x188   : > { %v1662_v31 = vrot.slane %v1655_v51, %v4070_v54  ;;  %v1727_v51 = vld [vmem:[#allocation9 + $0x40] sm:$0xff] (!%p2859_p4)  ;;  %3233 = vmatpush3.bf16.msra.mxu1 (!%p2859_p4), %v3232_v11  ;;  %v1802_v11 = vld [vmem:[#allocation9 + $0x298] sm:$0xff] (!%p2859_p4)  ;;  %v3292_v59 = vpack.c.bf16 (!%p2859_p4), %v1820_v40, %v1819_v63  ;;  %v1821_v34 = vld [vmem:[#allocation9 + $0x330] sm:$0xff] (!%p2859_p4) }
 0x189   : > { %v1790_v26 = vld [vmem:[#allocation9 + $0x238] sm:$0xff] (!%p2859_p4)  ;;  %v1807_v39 = vld [vmem:[#allocation9 + $0x2c0] sm:$0xff] (!%p2859_p4)  ;;  %v1808_v19 = vld [vmem:[#allocation9 + $0x2c8] sm:$0xff] (!%p2859_p4) }
 0x18a   : > { %v1665_v46 = vrot.slane %v1662_v31, 7  ;;  %v1759_v31 = vld [vmem:[#allocation9 + $0x140] sm:$0xff] (!%p2859_p4)  ;;  %v1822_v17 = vld [vmem:[#allocation9 + $0x338] sm:$0xff] (!%p2859_p4)  ;;  %v1840_v56 = vld [vmem:[#allocation9 + $0x3c8] sm:$0xff] (!%p2859_p4)  ;;  %v3266_v53 = vpack.c.bf16 (!%p2859_p4), %v1808_v19, %v1807_v39 }
 0x18b   : > { %v3296_v25 = vpack.c.bf16 (!%p2859_p4), %v1822_v17, %v1821_v34  ;;  %v1791_v27 = vld [vmem:[#allocation9 + $0x240] sm:$0xff] (!%p2859_p4)  ;;  %v1824_v24 = vld [vmem:[#allocation9 + $0x348] sm:$0xff] (!%p2859_p4)  ;;  %v1842_v32 = vld [vmem:[#allocation9 + $0x3d8] sm:$0xff] (!%p2859_p4) }
 0x18c   : > { %v1666_v47 = vsel %vm1317_vm0, %v1665_v46, %v1654_v29  ;;  %1676 = sbr.rel (%p2859_p4) target bundleno = 767 (0x2ff), region = 68  ;;  %v1728_v29 = vld [vmem:[#allocation9 + $0x48] sm:$0xff] (!%p2859_p4)  ;;  %v1823_v38 = vld [vmem:[#allocation9 + $0x340] sm:$0xff] (!%p2859_p4)  ;;  %v1846_v61 = vld [vmem:[#allocation9 + $0x3f8] sm:$0xff] (!%p2859_p4) }
 0x18d   : > { %v1667_v42 = vsel %vm1319_vm1, %v1665_v46, %v1666_v47  ;;  %v1760_v47 = vld [vmem:[#allocation9 + $0x148] sm:$0xff] (!%p2859_p4)  ;;  %v1797_v40 = vld [vmem:[#allocation9 + $0x270] sm:$0xff] (!%p2859_p4)  ;;  %v1879_v19 = vld [vmem:[#allocation9 + $0x500] sm:$0xff] (!%p2859_p4) }
 0x18e   : > { %v1668_v52 = vsel %vm1321_vm2, %v1665_v46, %v1667_v42  ;;  %v1746_v42 = vld [vmem:[#allocation9 + $0xd8] sm:$0xff] (!%p2859_p4)  ;;  %v3236_v33 = vpack.c.bf16 (!%p2859_p4), %v1760_v47, %v1759_v31  ;;  %v1785_v47 = vld [vmem:[#allocation9 + $0x210] sm:$0xff] (!%p2859_p4)  ;;  %v1848_v39 = vld [vmem:[#allocation9 + $0x408] sm:$0xff] (!%p2859_p4) }
 0x18f   : > { %v1669_v1 = vsel %vm1323_vm3, %v1665_v46, %v1668_v52  ;;  %v3234_v46 = vpack.c.bf16 (!%p2859_p4), %v1776_v55, %v1775_v43  ;;  %v1777_v52 = vld [vmem:[#allocation9 + $0x1d0] sm:$0xff] (!%p2859_p4)  ;;  %v3282_v43 = vpack.c.bf16 (!%p2859_p4), %v1832_v2, %v1831_v36  ;;  %v1816_v55 = vld [vmem:[#allocation9 + $0x308] sm:$0xff] (!%p2859_p4)  ;;  %v1810_v2 = vld [vmem:[#allocation9 + $0x2d8] sm:$0xff] (!%p2859_p4) }
 0x190   : > { %v1671_v20 = vadd.f32 %v1669_v1, %v1358_v12  ;;  %v1745_v12 = vld [vmem:[#allocation9 + $0xd0] sm:$0xff] (!%p2859_p4)  ;;  %v1778_v1 = vld [vmem:[#allocation9 + $0x1d8] sm:$0xff] (!%p2859_p4)  ;;  %v3284_v31 = vpack.c.bf16 (!%p2859_p4), %v1816_v55, %v1815_v6 }
 0x191   : > { %v3206_v35 = vpack.c.bf16 (!%p2859_p4), %v1746_v42, %v1745_v12  ;;  %3235 = vmatprep.subr.bf16.mxu1 (!%p2859_p4), %v3234_v46  ;;  %v3238_v30 = vpack.c.bf16 (!%p2859_p4), %v1778_v1, %v1777_v52  ;;  %v3254_v46 = vpack.c.bf16 (!%p2859_p4), %v1802_v11, %v1801_v48  ;;  %v1786_v12 = vld [vmem:[#allocation9 + $0x218] sm:$0xff] (!%p2859_p4)  ;;  %v1817_v42 = vld [vmem:[#allocation9 + $0x310] sm:$0xff] (!%p2859_p4) }
 0x192   : > { %1672 = vst [vmem:[#allocation3] sm:$0xf] %v1671_v20  ;;  %v3204_v20 = vpack.c.bf16 (!%p2859_p4), %v1728_v29, %v1727_v51  ;;  %3237 = vmatpush3.bf16.msra.mxu1 (!%p2859_p4), %v3236_v33  ;;  %v1834_v51 = vld [vmem:[#allocation9 + $0x398] sm:$0xff] (!%p2859_p4)  ;;  %v3252_v29 = vpack.c.bf16 (!%p2859_p4), %v1784_v7, %v1783_v16  ;;  %v1804_v33 = vld [vmem:[#allocation9 + $0x2a8] sm:$0xff] (!%p2859_p4)  ;;  %v3256_v18 = vpack.c.bf16 (!%p2859_p4), %v1786_v12, %v1785_v47  ;;  %v1809_v36 = vld [vmem:[#allocation9 + $0x2d0] sm:$0xff] (!%p2859_p4) }
 0x193   : > { %3239 = vmatprep.subr.bf16.mxu1 %v3238_v30  ;;  %v3286_v52 = vpack.c.bf16 %v1834_v51, %v1833_v28  ;;  %v1818_v1 = vld [vmem:[#allocation9 + $0x318] sm:$0xff]  ;;  %v3300_v7 = vpack.c.bf16 %v1824_v24, %v1823_v38  ;;  %v3270_v6 = vpack.c.bf16 %v1810_v2, %v1809_v36  ;;  %v1825_v48 = vld [vmem:[#allocation9 + $0x350] sm:$0xff]  ;;  %v1844_v47 = vld [vmem:[#allocation9 + $0x3e8] sm:$0xff] }
 0x194   : > { %3205 = vmatpush3.bf16.msra.mxu0 %v3204_v20  ;;  %v1803_v20 = vld [vmem:[#allocation9 + $0x2a0] sm:$0xff]  ;;  %v3288_v15 = vpack.c.bf16 %v1818_v1, %v1817_v42  ;;  %v1794_v55 = vld [vmem:[#allocation9 + $0x258] sm:$0xff]  ;;  %v1881_v24 = vld [vmem:[#allocation9 + $0x510] sm:$0xff] }
 0x195   : > { %3207 = vmatprep.subr.bf16.mxu0 %v3206_v35  ;;  %v1835_v35 = vld [vmem:[#allocation9 + $0x3a0] sm:$0xff]  ;;  %v3258_v30 = vpack.c.bf16 %v1804_v33, %v1803_v20  ;;  %v1826_v51 = vld [vmem:[#allocation9 + $0x358] sm:$0xff]  ;;  %v1796_v20 = vld [vmem:[#allocation9 + $0x268] sm:$0xff] }
 0x196   : > { %3241 = vmatpush3.bf16.msra.mxu1 %v3240_v14  ;;  %v3290_v3 = vpack.c.bf16 %v1836_v41, %v1835_v35  ;;  %v1837_v14 = vld [vmem:[#allocation9 + $0x3b0] sm:$0xff]  ;;  %v3304_v42 = vpack.c.bf16 %v1826_v51, %v1825_v48  ;;  %v1795_v1 = vld [vmem:[#allocation9 + $0x260] sm:$0xff]  ;;  %v1828_v41 = vld [vmem:[#allocation9 + $0x368] sm:$0xff] }
 0x197   : > { %3243 = vmatprep.subr.bf16.mxu1 %v3242_v49  ;;  %v1827_v33 = vld [vmem:[#allocation9 + $0x360] sm:$0xff]  ;;  %v3276_v62 = vpack.c.bf16 %v1796_v20, %v1795_v1  ;;  %v1882_v36 = vld [vmem:[#allocation9 + $0x518] sm:$0xff]  ;;  %v1852_v51 = vld [vmem:[#allocation9 + $0x428] sm:$0xff] }
 0x198   : > { %3209 = vmatpush3.bf16.msra.mxu0 %v3208_v10  ;;  %v1805_v10 = vld [vmem:[#allocation9 + $0x2b0] sm:$0xff]  ;;  %v3308_v63 = vpack.c.bf16 %v1828_v41, %v1827_v33  ;;  %v3352_v48 = vpack.c.bf16 %v1882_v36, %v1881_v24 }
 0x199   : > { %3211 = vmatprep.subr.bf16.mxu0 %v3210_v5  ;;  %v1838_v5 = vld [vmem:[#allocation9 + $0x3b8] sm:$0xff]  ;;  %v3262_v49 = vpack.c.bf16 %v1806_v0, %v1805_v10  ;;  %v1829_v0 = vld [vmem:[#allocation9 + $0x370] sm:$0xff] }
 0x19a   : > { %3245 = vmatpush3.bf16.msra.mxu1 %v3244_v57  ;;  %v3294_v60 = vpack.c.bf16 %v1838_v5, %v1837_v14  ;;  %v1798_v10 = vld [vmem:[#allocation9 + $0x278] sm:$0xff]  ;;  %v1853_v41 = vld [vmem:[#allocation9 + $0x430] sm:$0xff] }
 0x19b   : > { %3247 = vmatprep.subr.bf16.mxu1 %v3246_v8  ;;  %v1792_v8 = vld [vmem:[#allocation9 + $0x248] sm:$0xff]  ;;  %v1830_v5 = vld [vmem:[#allocation9 + $0x378] sm:$0xff] }
 0x19c   : > { %3213 = vmatpush3.bf16.msra.mxu0 %v3212_v21  ;;  %v1678_v21 = vld [vmem:[#allocation2 + $0x8] sm:$0xff]  ;;  %v3268_v16 = vpack.c.bf16 %v1792_v8, %v1791_v27  ;;  %v3312_v34 = vpack.c.bf16 %v1830_v5, %v1829_v0  ;;  %v1849_v27 = vld [vmem:[#allocation9 + $0x410] sm:$0xff] }
 0x19d   : > { %3215 = vmatprep.subr.bf16.mxu0 %v3214_v58  ;;  %v1682_v57 = vmul.f32 0.0051020407, %v1678_v21  ;;  %v3264_v58 = vpack.c.bf16 %v1790_v26, %v1789_v13  ;;  %v1864_v13 = vld [vmem:[#allocation9 + $0x488] sm:$0xff]  ;;  %v3280_v26 = vpack.c.bf16 %v1798_v10, %v1797_v40  ;;  %v1855_v5 = vld [vmem:[#allocation9 + $0x440] sm:$0xff] }
 0x19e   : > { %3249 = vmatpush3.bf16.msra.mxu1 %v3248_v45  ;;  %v1679_v8 = vld [vmem:[#allocation2 + $0x10] sm:$0xff] }
 0x19f   : > { %3283 = vmatprep.subr.bf16.mxu1 %v3282_v43  ;;  %v4654_v4 = vrot.slane %v1682_v57, %v4070_v54  ;;  %v1793_v43 = vld [vmem:[#allocation9 + $0x250] sm:$0xff]  ;;  %v1683_v2 = vmul.f32 0.0051020407, %v1679_v8  ;;  %v1904_v40 = vld [vmem:[#allocation9 + $0x5c8] sm:$0xff]  ;;  %v1907_v8 = vld [vmem:[#allocation9 + $0x5e0] sm:$0xff] }
 0x1a0   : > { %3217 = vmatpush3.bf16.msra.mxu0 %v3216_v22  ;;  %v1841_v22 = vld [vmem:[#allocation9 + $0x3d0] sm:$0xff]  ;;  %v3272_v12 = vpack.c.bf16 %v1794_v55, %v1793_v43 }
 0x1a1   : > { %3251 = vmatprep.subr.bf16.mxu0 %v3250_v37  ;;  %2198 = vmatmul.mubr.f32.vlgmr.msra.gmra.mrb[0].mxu1 %v1993_v50  ;;  %v1996_v50 = vcombine.high %v1682_v57, %v1682_v57  ;;  %v2011_v45 = vcombine.high %v4654_v4, %v4654_v4  ;;  %v3302_v28 = vpack.c.bf16 %v1842_v32, %v1841_v22  ;;  %v1866_v57 = vld [vmem:[#allocation9 + $0x498] sm:$0xff]  ;;  %v1867_v32 = vld [vmem:[#allocation9 + $0x4a0] sm:$0xff] }
 0x1a2   : > { %3285 = vmatpush3.bf16.msra.mxu1 %v3284_v31  ;;  %v1812_v31 = vld [vmem:[#allocation9 + $0x2e8] sm:$0xff]  ;;  %v2013_v43 = vcombine.high %v1683_v2, %v1683_v2 }
 0x1a3   : > { %2128 = vmatmul.mubr.f32.vlgmr.msra.gmra.mrb[0].mxu0 %v1986_v23  ;;  %3287 = vmatprep.subr.bf16.mxu1 %v3286_v52  ;;  %v1839_v23 = vld [vmem:[#allocation9 + $0x3c0] sm:$0xff]  ;;  %v4659_v37 = vrot.slane %v1996_v50, %v4070_v54 }
 0x1a4   : > { %3253 = vmatpush3.bf16.msra.mxu0 %v3252_v29  ;;  %v3298_v44 = vpack.c.bf16 %v1840_v56, %v1839_v23  ;;  %v1811_v29 = vld [vmem:[#allocation9 + $0x2e0] sm:$0xff]  ;;  %2267 = vmatprep.mubr.f32.mxu0 %v2011_v45  ;;  %v1880_v23 = vld [vmem:[#allocation9 + $0x508] sm:$0xff]  ;;  %v1865_v56 = vld [vmem:[#allocation9 + $0x490] sm:$0xff] }
 0x1a5   : > { %3255 = vmatprep.subr.bf16.mxu0 %v3254_v46  ;;  %v2012_v11 = vcombine.high %v4659_v37, %v4659_v37  ;;  %v1843_v46 = vld [vmem:[#allocation9 + $0x3e0] sm:$0xff]  ;;  %v3274_v52 = vpack.c.bf16 %v1812_v31, %v1811_v29  ;;  %v3348_v38 = vpack.c.bf16 %v1880_v23, %v1879_v19  ;;  %v3318_v50 = vpack.c.bf16 %v1866_v57, %v1865_v56  ;;  %v1868_v45 = vld [vmem:[#allocation9 + $0x4a8] sm:$0xff]  ;;  %v1857_v23 = vld [vmem:[#allocation9 + $0x450] sm:$0xff] }
 0x1a6   : > { %3289 = vmatpush3.bf16.msra.mxu1 %v3288_v15  ;;  %v3306_v35 = vpack.c.bf16 %v1844_v47, %v1843_v46  ;;  %v1814_v15 = vld [vmem:[#allocation9 + $0x2f8] sm:$0xff]  ;;  %v1883_v29 = vld [vmem:[#allocation9 + $0x520] sm:$0xff]  ;;  %v4671_v31 = vrot.slane %v2013_v43, %v4070_v54  ;;  %v1884_v47 = vld [vmem:[#allocation9 + $0x528] sm:$0xff] }
 0x1a7   : > { %3291 = vmatprep.subr.bf16.mxu1 %v3290_v3  ;;  %2337 = vmatprep.mubr.f32.mxu1 %v2012_v11  ;;  %v3322_v11 = vpack.c.bf16 %v1868_v45, %v1867_v32  ;;  %v3356_v33 = vpack.c.bf16 %v1884_v47, %v1883_v29  ;;  %v1858_v56 = vld [vmem:[#allocation9 + $0x458] sm:$0xff]  ;;  %v1889_v57 = vld [vmem:[#allocation9 + $0x550] sm:$0xff] }
 0x1a8   : > { %3257 = vmatpush3.bf16.msra.mxu0 %v3256_v18  ;;  %v1813_v18 = vld [vmem:[#allocation9 + $0x2f0] sm:$0xff]  ;;  %v2029_v1 = vcombine.high %v4671_v31, %v4671_v31  ;;  %v1878_v43 = vld [vmem:[#allocation9 + $0x4f8] sm:$0xff] }
 0x1a9   : > { %3259 = vmatprep.subr.bf16.mxu0 %v3258_v30  ;;  %v1845_v30 = vld [vmem:[#allocation9 + $0x3f0] sm:$0xff]  ;;  %v3278_v3 = vpack.c.bf16 %v1814_v15, %v1813_v18  ;;  %v1854_v18 = vld [vmem:[#allocation9 + $0x438] sm:$0xff] }
 0x1aa   : > { %3293 = vmatpush3.bf16.msra.mxu1 %v3292_v59  ;;  %v3310_v14 = vpack.c.bf16 %v1846_v61, %v1845_v30  ;;  %v1895_v59 = vld [vmem:[#allocation9 + $0x580] sm:$0xff]  ;;  %v1885_v15 = vld [vmem:[#allocation9 + $0x530] sm:$0xff]  ;;  %v1886_v61 = vld [vmem:[#allocation9 + $0x538] sm:$0xff]  ;;  %v3328_v10 = vpack.c.bf16 %v1854_v18, %v1853_v41 }
 0x1ab   : > { %3295 = vmatprep.subr.bf16.mxu1 %v3294_v60  ;;  %v1847_v60 = vld [vmem:[#allocation9 + $0x400] sm:$0xff]  ;;  %v3360_v0 = vpack.c.bf16 %v1886_v61, %v1885_v15  ;;  %v1680_v32 = vld [vmem:[#allocation2 + $0x18] sm:$0xff] }
 0x1ac   : > { %3261 = vmatpush3.bf16.msra.mxu0 %v3260_v9  ;;  %v1863_v9 = vld [vmem:[#allocation9 + $0x480] sm:$0xff]  ;;  %v1893_v47 = vld [vmem:[#allocation9 + $0x570] sm:$0xff] }
 0x1ad   : > { %3263 = vmatprep.subr.bf16.mxu0 %v3262_v49  ;;  %v1896_v49 = vld [vmem:[#allocation9 + $0x588] sm:$0xff]  ;;  %v3314_v17 = vpack.c.bf16 %v1864_v13, %v1863_v9  ;;  %v1887_v13 = vld [vmem:[#allocation9 + $0x540] sm:$0xff] }
 0x1ae   : > { %3297 = vmatpush3.bf16.msra.mxu1 %v3296_v25  ;;  %v3346_v21 = vpack.c.bf16 %v1896_v49, %v1895_v59  ;;  %v1898_v25 = vld [vmem:[#allocation9 + $0x598] sm:$0xff]  ;;  %v1856_v9 = vld [vmem:[#allocation9 + $0x448] sm:$0xff]  ;;  %v1911_v15 = vld [vmem:[#allocation9 + $0x600] sm:$0xff] }
 0x1af   : > { %3299 = vmatprep.subr.bf16.mxu1 %v3298_v44  ;;  %v1850_v44 = vld [vmem:[#allocation9 + $0x418] sm:$0xff]  ;;  %v1888_v49 = vld [vmem:[#allocation9 + $0x548] sm:$0xff]  ;;  %v1943_v61 = vld [vmem:[#allocation9 + $0x700] sm:$0xff] }
 0x1b0   : > { %3265 = vmatpush3.bf16.msra.mxu0 %v3264_v58  ;;  %v1897_v58 = vld [vmem:[#allocation9 + $0x590] sm:$0xff]  ;;  %v3320_v55 = vpack.c.bf16 %v1850_v44, %v1849_v27  ;;  %v3364_v19 = vpack.c.bf16 %v1888_v49, %v1887_v13  ;;  %v1876_v27 = vld [vmem:[#allocation9 + $0x4e8] sm:$0xff]  ;;  %v1859_v44 = vld [vmem:[#allocation9 + $0x460] sm:$0xff] }
 0x1b1   : > { %3267 = vmatprep.subr.bf16.mxu0 %v3266_v53  ;;  %v3316_v53 = vpack.c.bf16 %v1848_v39, %v1847_v60  ;;  %v3350_v22 = vpack.c.bf16 %v1898_v25, %v1897_v58  ;;  %v1906_v60 = vld [vmem:[#allocation9 + $0x5d8] sm:$0xff]  ;;  %v3332_v39 = vpack.c.bf16 %v1856_v9, %v1855_v5  ;;  %v1913_v49 = vld [vmem:[#allocation9 + $0x610] sm:$0xff] }
 0x1b2   : > { %3301 = vmatpush3.bf16.msra.mxu1 %v3300_v7  ;;  %v1900_v7 = vld [vmem:[#allocation9 + $0x5a8] sm:$0xff]  ;;  %v1890_v25 = vld [vmem:[#allocation9 + $0x558] sm:$0xff] }
 0x1b3   : > { %3303 = vmatprep.subr.bf16.mxu1 %v3302_v28  ;;  %v1851_v28 = vld [vmem:[#allocation9 + $0x420] sm:$0xff]  ;;  %v3368_v24 = vpack.c.bf16 %v1890_v25, %v1889_v57 }
 0x1b4   : > { %3269 = vmatpush3.bf16.msra.mxu0 %v3268_v16  ;;  %v1899_v16 = vld [vmem:[#allocation9 + $0x5a0] sm:$0xff]  ;;  %v3324_v20 = vpack.c.bf16 %v1852_v51, %v1851_v28 }
 0x1b5   : > { %3271 = vmatprep.subr.bf16.mxu0 %v3270_v6  ;;  %v4665_v6 = vrot.slane %v1683_v2, %v4070_v54  ;;  %v3354_v46 = vpack.c.bf16 %v1900_v7, %v1899_v16  ;;  %v1860_v2 = vld [vmem:[#allocation9 + $0x468] sm:$0xff]  ;;  %v1877_v7 = vld [vmem:[#allocation9 + $0x4f0] sm:$0xff] }
 0x1b6   : > { %3305 = vmatpush3.bf16.msra.mxu1 %v3304_v42  ;;  %v1870_v42 = vld [vmem:[#allocation9 + $0x4b8] sm:$0xff]  ;;  %v1892_v16 = vld [vmem:[#allocation9 + $0x568] sm:$0xff]  ;;  %v3340_v28 = vpack.c.bf16 %v1860_v2, %v1859_v44  ;;  %v3342_v29 = vpack.c.bf16 %v1878_v43, %v1877_v7  ;;  %v1949_v7 = vld [vmem:[#allocation9 + $0x730] sm:$0xff] }
 0x1b7   : > { %3307 = vmatprep.subr.bf16.mxu1 %v3306_v35  ;;  %v1948_v44 = vld [vmem:[#allocation9 + $0x728] sm:$0xff]  ;;  %v1966_v2 = vld [vmem:[#allocation9 + $0x7b8] sm:$0xff] }
 0x1b8   : > { %3273 = vmatpush3.bf16.msra.mxu0 %v3272_v12  ;;  %v1869_v12 = vld [vmem:[#allocation9 + $0x4b0] sm:$0xff] }
 0x1b9   : > { %3275 = vmatprep.subr.bf16.mxu0 %v3274_v52  ;;  %v1902_v52 = vld [vmem:[#allocation9 + $0x5b8] sm:$0xff]  ;;  %v3326_v35 = vpack.c.bf16 %v1870_v42, %v1869_v12 }
 0x1ba   : > { %3309 = vmatpush3.bf16.msra.mxu1 %v3308_v63  ;;  %v1872_v63 = vld [vmem:[#allocation9 + $0x4c8] sm:$0xff]  ;;  %v1894_v42 = vld [vmem:[#allocation9 + $0x578] sm:$0xff] }
 0x1bb   : > { %3311 = vmatprep.subr.bf16.mxu1 %v3310_v14  ;;  %v3376_v41 = vpack.c.bf16 %v1894_v42, %v1893_v47  ;;  %v1919_v47 = vld [vmem:[#allocation9 + $0x640] sm:$0xff] }
 0x1bc   : > { %3277 = vmatpush3.bf16.msra.mxu0 %v3276_v62  ;;  %v1871_v62 = vld [vmem:[#allocation9 + $0x4c0] sm:$0xff] }
 0x1bd   : > { %3279 = vmatprep.subr.bf16.mxu0 %v3278_v3  ;;  %v1903_v3 = vld [vmem:[#allocation9 + $0x5c0] sm:$0xff]  ;;  %v3330_v14 = vpack.c.bf16 %v1872_v63, %v1871_v62  ;;  %v1944_v63 = vld [vmem:[#allocation9 + $0x708] sm:$0xff] }
 0x1be   : > { %3313 = vmatpush3.bf16.msra.mxu1 %v3312_v34  ;;  %v3362_v59 = vpack.c.bf16 %v1904_v40, %v1903_v3  ;;  %v1874_v34 = vld [vmem:[#allocation9 + $0x4d8] sm:$0xff]  ;;  %v1929_v3 = vld [vmem:[#allocation9 + $0x690] sm:$0xff]  ;;  %v3412_v13 = vpack.c.bf16 %v1944_v63, %v1943_v61  ;;  %v1951_v42 = vld [vmem:[#allocation9 + $0x740] sm:$0xff] }
 0x1bf   : > { %3347 = vmatprep.subr.bf16.mxu1 %v3346_v21  ;;  %v1930_v40 = vld [vmem:[#allocation9 + $0x698] sm:$0xff] }
 0x1c0   : > { %3281 = vmatpush3.bf16.msra.mxu0 %v3280_v26  ;;  %v1873_v26 = vld [vmem:[#allocation9 + $0x4d0] sm:$0xff]  ;;  %v1922_v61 = vld [vmem:[#allocation9 + $0x658] sm:$0xff] }
 0x1c1   : > { %3315 = vmatprep.subr.bf16.mxu0 %v3314_v17  ;;  %2338 = vmatmul.mubr.f32.vlgmr.msra.gmra.mrb[2].mxu1 %v4659_v37  ;;  %v1901_v37 = vld [vmem:[#allocation9 + $0x5b0] sm:$0xff]  ;;  %v3334_v21 = vpack.c.bf16 %v1874_v34, %v1873_v26  ;;  %v1914_v26 = vld [vmem:[#allocation9 + $0x618] sm:$0xff] }
 0x1c2   : > { %3349 = vmatpush3.bf16.msra.mxu1 %v3348_v38  ;;  %v3358_v30 = vpack.c.bf16 %v1902_v52, %v1901_v37  ;;  %2477 = vmatprep.mubr.f32.mxu1 %v2029_v1  ;;  %v1905_v17 = vld [vmem:[#allocation9 + $0x5d0] sm:$0xff]  ;;  %v1908_v38 = vld [vmem:[#allocation9 + $0x5e8] sm:$0xff]  ;;  %v1927_v37 = vld [vmem:[#allocation9 + $0x680] sm:$0xff] }
 0x1c3   : > { %2268 = vmatmul.mubr.f32.vlgmr.msra.gmra.mrb[2].mxu0 %v4654_v4  ;;  %v2028_v4 = vcombine.high %v4665_v6, %v4665_v6  ;;  %3351 = vmatprep.subr.bf16.mxu1 %v3350_v22  ;;  %v3366_v58 = vpack.c.bf16 %v1906_v60, %v1905_v17  ;;  %v1891_v22 = vld [vmem:[#allocation9 + $0x560] sm:$0xff]  ;;  %v3370_v45 = vpack.c.bf16 %v1908_v38, %v1907_v8  ;;  %v1928_v52 = vld [vmem:[#allocation9 + $0x688] sm:$0xff]  ;;  %v1945_v34 = vld [vmem:[#allocation9 + $0x710] sm:$0xff] }
 0x1c4   : > { %3317 = vmatpush3.bf16.msra.mxu0 %v3316_v53  ;;  %v1875_v53 = vld [vmem:[#allocation9 + $0x4e0] sm:$0xff]  ;;  %v3372_v51 = vpack.c.bf16 %v1892_v16, %v1891_v22  ;;  %v3378_v18 = vpack.c.bf16 %v1928_v52, %v1927_v37  ;;  %v1946_v60 = vld [vmem:[#allocation9 + $0x718] sm:$0xff]  ;;  %v1916_v8 = vld [vmem:[#allocation9 + $0x628] sm:$0xff] }
 0x1c5   : > { %3319 = vmatprep.subr.bf16.mxu0 %v3318_v50  ;;  %2407 = vmatprep.mubr.f32.mxu0 %v2028_v4  ;;  %v3336_v50 = vpack.c.bf16 %v1858_v56, %v1857_v23  ;;  %v3338_v36 = vpack.c.bf16 %v1876_v27, %v1875_v53  ;;  %v1861_v4 = vld [vmem:[#allocation9 + $0x470] sm:$0xff]  ;;  %v1959_v1 = vld [vmem:[#allocation9 + $0x780] sm:$0xff]  ;;  %v1964_v56 = vld [vmem:[#allocation9 + $0x7a8] sm:$0xff]  ;;  %v3416_v25 = vpack.c.bf16 %v1946_v60, %v1945_v34 }
 0x1c6   : > { %3353 = vmatpush3.bf16.msra.mxu1 %v3352_v48  ;;  %v1910_v48 = vld [vmem:[#allocation9 + $0x5f8] sm:$0xff]  ;;  %v1963_v23 = vld [vmem:[#allocation9 + $0x7a0] sm:$0xff]  ;;  %v1952_v52 = vld [vmem:[#allocation9 + $0x748] sm:$0xff] }
 0x1c7   : > { %3355 = vmatprep.subr.bf16.mxu1 %v3354_v46  ;;  %v1862_v46 = vld [vmem:[#allocation9 + $0x478] sm:$0xff]  ;;  %v1915_v27 = vld [vmem:[#allocation9 + $0x620] sm:$0xff]  ;;  %v1924_v34 = vld [vmem:[#allocation9 + $0x668] sm:$0xff] }
 0x1c8   : > { %3321 = vmatpush3.bf16.msra.mxu0 %v3320_v55  ;;  %v1909_v55 = vld [vmem:[#allocation9 + $0x5f0] sm:$0xff]  ;;  %v1947_v38 = vld [vmem:[#allocation9 + $0x720] sm:$0xff]  ;;  %v3388_v22 = vpack.c.bf16 %v1916_v8, %v1915_v27  ;;  %v1918_v16 = vld [vmem:[#allocation9 + $0x638] sm:$0xff] }
 0x1c9   : > { %3323 = vmatprep.subr.bf16.mxu0 %v3322_v11  ;;  %v1684_v11 = vmul.f32 0.0051020407, %v1680_v32  ;;  %v3374_v12 = vpack.c.bf16 %v1910_v48, %v1909_v55  ;;  %v1950_v55 = vld [vmem:[#allocation9 + $0x738] sm:$0xff]  ;;  %v1935_v48 = vld [vmem:[#allocation9 + $0x6c0] sm:$0xff]  ;;  %v1956_v60 = vld [vmem:[#allocation9 + $0x768] sm:$0xff] }
 0x1ca   : > { %3357 = vmatpush3.bf16.msra.mxu1 %v3356_v33  ;;  %v1925_v27 = vld [vmem:[#allocation9 + $0x670] sm:$0xff]  ;;  %v1926_v8 = vld [vmem:[#allocation9 + $0x678] sm:$0xff] }
 0x1cb   : > { %3359 = vmatprep.subr.bf16.mxu1 %v3358_v30  ;;  %v2030_v33 = vcombine.high %v1684_v11, %v1684_v11  ;;  %v1912_v30 = vld [vmem:[#allocation9 + $0x608] sm:$0xff] }
 0x1cc   : > { %3325 = vmatpush3.bf16.msra.mxu0 %v3324_v20  ;;  %v1960_v20 = vld [vmem:[#allocation9 + $0x788] sm:$0xff]  ;;  %v3380_v9 = vpack.c.bf16 %v1912_v30, %v1911_v15  ;;  %v1921_v30 = vld [vmem:[#allocation9 + $0x650] sm:$0xff] }
 0x1cd   : > { %3327 = vmatprep.subr.bf16.mxu0 %v3326_v35  ;;  %v3344_v35 = vpack.c.bf16 %v1862_v46, %v1861_v4  ;;  %v3410_v62 = vpack.c.bf16 %v1960_v20, %v1959_v1  ;;  %v4679_v5 = vrot.slane %v2030_v33, %v4070_v54  ;;  %v3424_v4 = vpack.c.bf16 %v1950_v55, %v1949_v7  ;;  %v1937_v1 = vld [vmem:[#allocation9 + $0x6d0] sm:$0xff]  ;;  %v1938_v20 = vld [vmem:[#allocation9 + $0x6d8] sm:$0xff] }
 0x1ce   : > { %3361 = vmatpush3.bf16.msra.mxu1 %v3360_v0  ;;  %v1961_v0 = vld [vmem:[#allocation9 + $0x790] sm:$0xff]  ;;  %v3398_v15 = vpack.c.bf16 %v1938_v20, %v1937_v1 }
 0x1cf   : > { %3363 = vmatprep.subr.bf16.mxu1 %v3362_v59  ;;  %v3382_v59 = vpack.c.bf16 %v1930_v40, %v1929_v3  ;;  %v2046_v57 = vcombine.high %v4679_v5, %v4679_v5  ;;  %v1969_v33 = vld [vmem:[#allocation9 + $0x7d0] sm:$0xff]  ;;  %v1954_v3 = vld [vmem:[#allocation9 + $0x758] sm:$0xff]  ;;  %v1939_v40 = vld [vmem:[#allocation9 + $0x6e0] sm:$0xff] }
 0x1d0   : > { %3329 = vmatpush3.bf16.msra.mxu0 %v3328_v10  ;;  %v4676_v10 = vrot.slane %v1684_v11, %v4070_v54  ;;  %v1936_v11 = vld [vmem:[#allocation9 + $0x6c8] sm:$0xff]  ;;  %v1705_v7 = vld [vmem:[#allocation10 + $0x90] sm:$0xff] }
 0x1d1   : > { %3331 = vmatprep.subr.bf16.mxu0 %v3330_v14  ;;  %v1962_v14 = vld [vmem:[#allocation9 + $0x798] sm:$0xff]  ;;  %v3394_v46 = vpack.c.bf16 %v1936_v11, %v1935_v48  ;;  %v1689_v11 = vld [vmem:[#allocation10 + $0x10] sm:$0xff] }
 0x1d2   : > { %3365 = vmatpush3.bf16.msra.mxu1 %v3364_v19  ;;  %v3414_v17 = vpack.c.bf16 %v1962_v14, %v1961_v0  ;;  %v1932_v19 = vld [vmem:[#allocation9 + $0x6a8] sm:$0xff]  ;;  %v1971_v14 = vld [vmem:[#allocation9 + $0x7e0] sm:$0xff]  ;;  %v1693_v20 = vld [vmem:[#allocation10 + $0x30] sm:$0xff] }
 0x1d3   : > { %3367 = vmatprep.subr.bf16.mxu1 %v3366_v58  ;;  %v3384_v58 = vpack.c.bf16 %v1914_v26, %v1913_v49  ;;  %v1940_v0 = vld [vmem:[#allocation9 + $0x6e8] sm:$0xff] }
 0x1d4   : > { %3333 = vmatpush3.bf16.msra.mxu0 %v3332_v39  ;;  %v1931_v39 = vld [vmem:[#allocation9 + $0x6a0] sm:$0xff]  ;;  %v3402_v26 = vpack.c.bf16 %v1940_v0, %v1939_v40  ;;  %v1698_v40 = vld [vmem:[#allocation10 + $0x58] sm:$0xff] }
 0x1d5   : > { %3335 = vmatprep.subr.bf16.mxu0 %v3334_v21  ;;  %v2045_v21 = vcombine.high %v4676_v10, %v4676_v10  ;;  %v3386_v53 = vpack.c.bf16 %v1932_v19, %v1931_v39  ;;  %v1941_v19 = vld [vmem:[#allocation9 + $0x6f0] sm:$0xff]  ;;  %v1715_v0 = vld [vmem:[#allocation10 + $0xe0] sm:$0xff] }
 0x1d6   : > { %3369 = vmatpush3.bf16.msra.mxu1 %v3368_v24  ;;  %v1934_v24 = vld [vmem:[#allocation9 + $0x6b8] sm:$0xff] }
 0x1d7   : > { %3371 = vmatprep.subr.bf16.mxu1 %v3370_v45  ;;  %v1917_v45 = vld [vmem:[#allocation9 + $0x630] sm:$0xff] }
 0x1d8   : > { %3337 = vmatpush3.bf16.msra.mxu0 %v3336_v50  ;;  %v3418_v50 = vpack.c.bf16 %v1964_v56, %v1963_v23  ;;  %v1685_v23 = vld [vmem:[#allocation3] sm:$0xf]  ;;  %v1973_v56 = vld [vmem:[#allocation9 + $0x7f0] sm:$0xff] }
 0x1d9   : > { %3339 = vmatprep.subr.bf16.mxu0 %v3338_v36  ;;  %v1965_v36 = vld [vmem:[#allocation9 + $0x7b0] sm:$0xff] }
 0x1da   : > { %3373 = vmatpush3.bf16.msra.mxu1 %v3372_v51  ;;  %v3422_v43 = vpack.c.bf16 %v1966_v2, %v1965_v36  ;;  %v1968_v51 = vld [vmem:[#allocation9 + $0x7c8] sm:$0xff]  ;;  %v3408_v2 = vpack.c.bf16 %v1926_v8, %v1925_v27 }
 0x1db   : > { %3375 = vmatprep.subr.bf16.mxu1 %v3374_v12  ;;  %v1920_v12 = vld [vmem:[#allocation9 + $0x648] sm:$0xff] }
 0x1dc   : > { %3341 = vmatpush3.bf16.msra.mxu0 %v3340_v28  ;;  %v1967_v28 = vld [vmem:[#allocation9 + $0x7c0] sm:$0xff]  ;;  %v1704_v36 = vld [vmem:[#allocation10 + $0x88] sm:$0xff] }
 0x1dd   : > { %3343 = vmatprep.subr.bf16.mxu0 %v3342_v29  ;;  %v3392_v29 = vpack.c.bf16 %v1918_v16, %v1917_v45  ;;  %v3426_v37 = vpack.c.bf16 %v1968_v51, %v1967_v28  ;;  %v1688_v45 = vld [vmem:[#allocation10 + $0x8] sm:$0xff]  ;;  %v1690_v28 = vld [vmem:[#allocation10 + $0x18] sm:$0xff] }
 0x1de   : > { %3377 = vmatpush3.bf16.msra.mxu1 %v3376_v41  ;;  %v3396_v41 = vpack.c.bf16 %v1920_v12, %v1919_v47  ;;  %v1691_v47 = vld [vmem:[#allocation10 + $0x20] sm:$0xff]  ;;  %v1692_v12 = vld [vmem:[#allocation10 + $0x28] sm:$0xff] }
 0x1df   : > { %3411 = vmatprep.subr.bf16.mxu1 %v3410_v62  ;;  %v1953_v62 = vld [vmem:[#allocation9 + $0x750] sm:$0xff] }
 0x1e0   : > { %3345 = vmatpush3.bf16.msra.mxu0 %v3344_v35  ;;  %v1970_v35 = vld [vmem:[#allocation9 + $0x7d8] sm:$0xff]  ;;  %v3432_v49 = vpack.c.bf16 %v1954_v3, %v1953_v62  ;;  %v1697_v3 = vld [vmem:[#allocation10 + $0x50] sm:$0xff] }
 0x1e1   : > { %3379 = vmatprep.subr.bf16.mxu0 %v3378_v18  ;;  %2478 = vmatmul.mubr.f32.vlgmr.msra.gmra.mrb[4].mxu1 %v4671_v31  ;;  %v3420_v31 = vpack.c.bf16 %v1948_v44, %v1947_v38  ;;  %v3428_v18 = vpack.c.bf16 %v1952_v52, %v1951_v42  ;;  %v3430_v63 = vpack.c.bf16 %v1970_v35, %v1969_v33  ;;  %v1957_v38 = vld [vmem:[#allocation9 + $0x770] sm:$0xff]  ;;  %v1694_v33 = vld [vmem:[#allocation10 + $0x38] sm:$0xff]  ;;  %v1711_v35 = vld [vmem:[#allocation10 + $0xc0] sm:$0xff] }
 0x1e2   : > { %3413 = vmatpush3.bf16.msra.mxu1 %v3412_v13  ;;  %2617 = vmatprep.mubr.f32.mxu1 %v2046_v57  ;;  %v3400_v13 = vpack.c.bf16 %v1922_v61, %v1921_v30  ;;  %v1974_v57 = vld [vmem:[#allocation9 + $0x7f8] sm:$0xff]  ;;  %v1709_v42 = vld [vmem:[#allocation10 + $0xb0] sm:$0xff]  ;;  %v3452_v52 = vpack.c.bf16 %v1692_v12, %v1691_v47 }
 0x1e3   : > { %2408 = vmatmul.mubr.f32.vlgmr.msra.gmra.mrb[4].mxu0 %v4665_v6  ;;  %3415 = vmatprep.subr.bf16.mxu1 %v3414_v17  ;;  %v1933_v6 = vld [vmem:[#allocation9 + $0x6b0] sm:$0xff]  ;;  %v1955_v17 = vld [vmem:[#allocation9 + $0x760] sm:$0xff]  ;;  %v3438_v44 = vpack.c.bf16 %v1974_v57, %v1973_v56  ;;  %v1714_v61 = vld [vmem:[#allocation10 + $0xd8] sm:$0xff] }
 0x1e4   : > { %3381 = vmatpush3.bf16.msra.mxu0 %v3380_v9  ;;  %2547 = vmatprep.mubr.f32.mxu0 %v2045_v21  ;;  %v3390_v32 = vpack.c.bf16 %v1934_v24, %v1933_v6  ;;  %v1972_v9 = vld [vmem:[#allocation9 + $0x7e8] sm:$0xff]  ;;  %v1942_v21 = vld [vmem:[#allocation9 + $0x6f8] sm:$0xff]  ;;  %v1703_v24 = vld [vmem:[#allocation10 + $0x80] sm:$0xff] }
 0x1e5   : > { %3383 = vmatprep.subr.bf16.mxu0 %v3382_v59  ;;  %v1923_v59 = vld [vmem:[#allocation9 + $0x660] sm:$0xff]  ;;  %v3434_v39 = vpack.c.bf16 %v1972_v9, %v1971_v14  ;;  %v1958_v6 = vld [vmem:[#allocation9 + $0x778] sm:$0xff]  ;;  %v1713_v30 = vld [vmem:[#allocation10 + $0xd0] sm:$0xff]  ;;  %v3464_v9 = vpack.c.bf16 %v1698_v40, %v1697_v3 }
 0x1e6   : > { %3417 = vmatpush3.bf16.msra.mxu1 %v3416_v25  ;;  %v3436_v25 = vpack.c.bf16 %v1956_v60, %v1955_v17  ;;  %v1716_v14 = vld [vmem:[#allocation10 + $0xe8] sm:$0xff] }
 0x1e7   : > { %3419 = vmatprep.subr.bf16.mxu1 %v3418_v50  ;;  %v1686_v50 = vmul.f32 0.0012755102, %v1685_v23 }
 0x1e8   : > { %3385 = vmatpush3.bf16.msra.mxu0 %v3384_v58  ;;  %v3404_v58 = vpack.c.bf16 %v1924_v34, %v1923_v59  ;;  %v1699_v59 = vld [vmem:[#allocation10 + $0x60] sm:$0xff]  ;;  %v1718_v34 = vld [vmem:[#allocation10 + $0xf8] sm:$0xff] }
 0x1e9   : > { %3387 = vmatprep.subr.bf16.mxu0 %v3386_v53  ;;  %v3406_v53 = vpack.c.bf16 %v1942_v21, %v1941_v19  ;;  %v4688_v16 = vrot.slane %v1686_v50, %v4070_v54  ;;  %v3448_v54 = vpack.c.bf16 %v1690_v28, %v1689_v11  ;;  %v1702_v19 = vld [vmem:[#allocation10 + $0x78] sm:$0xff] }
 0x1ea   : > { %3421 = vmatpush3.bf16.msra.mxu1 %v3420_v31  ;;  %v3442_v31 = vpack.c.bf16 %v1704_v36, %v1703_v24 }
 0x1eb   : > { %3423 = vmatprep.subr.bf16.mxu1 %v3422_v43  ;;  %v1706_v43 = vld [vmem:[#allocation10 + $0x98] sm:$0xff]  ;;  %v2631_v51 = vcombine.high %v4688_v16, %v4688_v16 }
 0x1ec   : > { %3389 = vmatpush3.bf16.msra.mxu0 %v3388_v22  ;;  %v3440_v22 = vpack.c.bf16 %v1958_v6, %v1957_v38  ;;  %v3446_v48 = vpack.c.bf16 %v1706_v43, %v1705_v7 }
 0x1ed   : > { %3391 = vmatprep.subr.bf16.mxu0 %v3390_v32  ;;  %v1687_v32 = vld [vmem:[#allocation10] sm:$0xff] }
 0x1ee   : > { %3425 = vmatpush3.bf16.msra.mxu1 %v3424_v4  ;;  %v3444_v55 = vpack.c.bf16 %v1688_v45, %v1687_v32  ;;  %v1708_v4 = vld [vmem:[#allocation10 + $0xa8] sm:$0xff] }
 0x1ef   : > { %3427 = vmatprep.subr.bf16.mxu1 %v3426_v37  ;;  %v1710_v37 = vld [vmem:[#allocation10 + $0xb8] sm:$0xff] }
 0x1f0   : > { %3393 = vmatpush3.bf16.msra.mxu0 %v3392_v29  ;;  %v1707_v29 = vld [vmem:[#allocation10 + $0xa0] sm:$0xff]  ;;  %v3454_v1 = vpack.c.bf16 %v1710_v37, %v1709_v42 }
 0x1f1   : > { %3395 = vmatprep.subr.bf16.mxu0 %v3394_v46  ;;  %v3450_v46 = vpack.c.bf16 %v1708_v4, %v1707_v29  ;;  %v2860_v37 = vld [vmem:[#allocation12] ss:$0 sm:$0xff] }
 0x1f2   : > { %3429 = vmatpush3.bf16.msra.mxu1 %v3428_v18  ;;  %v1695_v18 = vld [vmem:[#allocation10 + $0x40] sm:$0xff] }
 0x1f3   : > { %3431 = vmatprep.subr.bf16.mxu1 %v3430_v63  ;;  %v3462_v63 = vpack.c.bf16 %v1714_v61, %v1713_v30 }
 0x1f4   : > { %3397 = vmatpush3.bf16.msra.mxu0 %v3396_v41  ;;  %v1712_v41 = vld [vmem:[#allocation10 + $0xc8] sm:$0xff] }
 0x1f5   : > { %3399 = vmatprep.subr.bf16.mxu0 %v3398_v15  ;;  %v1696_v15 = vld [vmem:[#allocation10 + $0x48] sm:$0xff] }
 0x1f6   : > { %3433 = vmatpush3.bf16.msra.mxu1 %v3432_v49  ;;  %v3460_v62 = vpack.c.bf16 %v1696_v15, %v1695_v18  ;;  %v1700_v49 = vld [vmem:[#allocation10 + $0x68] sm:$0xff] }
 0x1f7   : > { %3435 = vmatprep.subr.bf16.mxu1 %v3434_v39  ;;  %v3468_v17 = vpack.c.bf16 %v1700_v49, %v1699_v59  ;;  %v1701_v39 = vld [vmem:[#allocation10 + $0x70] sm:$0xff] }
 0x1f8   : > { %3401 = vmatpush3.bf16.msra.mxu0 %v3400_v13  ;;  %v3466_v13 = vpack.c.bf16 %v1716_v14, %v1715_v0  ;;  %v3472_v21 = vpack.c.bf16 %v1702_v19, %v1701_v39 }
 0x1f9   : > { %3403 = vmatprep.subr.bf16.mxu0 %v3402_v26  ;;  %v1717_v26 = vld [vmem:[#allocation10 + $0xf0] sm:$0xff] }
 0x1fa   : > { %3437 = vmatpush3.bf16.msra.mxu1 %v3436_v25  ;;  %v3470_v60 = vpack.c.bf16 %v1718_v34, %v1717_v26 }
 0x1fb   : > { %3439 = vmatprep.subr.bf16.mxu1 %v3438_v44 }
 0x1fc   : > { %3405 = vmatpush3.bf16.msra.mxu0 %v3404_v58 }
 0x1fd   : > { %3407 = vmatprep.subr.bf16.mxu0 %v3406_v53 }
 0x1fe   : > { %3441 = vmatpush3.bf16.msra.mxu1 %v3440_v22 }
 0x200   : > { %3409 = vmatpush3.bf16.msra.mxu0 %v3408_v2 }
 0x201   : > { %3443 = vmatprep.subr.bf16.mxu0 %v3442_v31  ;;  %2618 = vmatmul.mubr.f32.vlgmr.msra.gmra.mrb[6].mxu1 %v4679_v5  ;;  %v3458_v5 = vpack.c.bf16 %v1712_v41, %v1711_v35 }
 0x203   : > { %2548 = vmatmul.mubr.f32.vlgmr.msra.gmra.mrb[6].mxu0 %v4676_v10  ;;  %v3456_v10 = vpack.c.bf16 %v1694_v33, %v1693_v20 }
 0x204   : > { %3445 = vmatpush3.bf16.msra.mxu0 %v3444_v55  ;;  %2698 = vmatprep.mubr.f32.mxu0 %v2631_v51 }
 0x205   : > { %3447 = vmatprep.subr.bf16.mxu0 %v3446_v48 }
 0x208   : > { %3449 = vmatpush3.bf16.msra.mxu0 %v3448_v54 }
 0x209   : > { %3451 = vmatprep.subr.bf16.mxu0 %v3450_v46 }
 0x20c   : > { %3453 = vmatpush3.bf16.msra.mxu0 %v3452_v52 }
 0x20d   : > { %3455 = vmatprep.subr.bf16.mxu0 %v3454_v1 }
 0x210   : > { %3457 = vmatpush3.bf16.msra.mxu0 %v3456_v10 }
 0x211   : > { %3459 = vmatprep.subr.bf16.mxu0 %v3458_v5 }
 0x214   : > { %3461 = vmatpush3.bf16.msra.mxu0 %v3460_v62 }
 0x215   : > { %3463 = vmatprep.subr.bf16.mxu0 %v3462_v63 }
 0x218   : > { %3465 = vmatpush3.bf16.msra.mxu0 %v3464_v9 }
 0x219   : > { %3467 = vmatprep.subr.bf16.mxu0 %v3466_v13 }
 0x21c   : > { %3469 = vmatpush3.bf16.msra.mxu0 %v3468_v17 }
 0x21d   : > { %3471 = vmatprep.subr.bf16.mxu0 %v3470_v60 }
 0x220   : > { %3473 = vmatpush3.bf16.msra.mxu0 %v3472_v21 }
 0x223   : > { %2699 = vmatmul.mubr.f32.vlgmr.msra.gmra.mrb[8].mxu0 %v4688_v16 }
 0x274   : > { %v2938_v56 = vpop.f32.mrb[0].mxu1 }
 0x275   : > { %v2939_v25 = vpop.f32.mrb[1].mxu1 }
 0x276   : > { %v2903_v23 = vpop.f32.mrb[0].mxu0  ;;  %v2940_v53 = vadd.f32 %v2939_v25, %v2938_v56 }
 0x277   : > { %v2904_v57 = vpop.f32.mrb[1].mxu0 }
 0x278   : > { %v2905_v58 = vadd.f32 %v2904_v57, %v2903_v23 }
 0x27a   : > { %v2200_v27 = vadd.f32 %v2940_v53, %v2905_v58 }
 0x294   : > { %v3008_v50 = vpop.f32.mrb[2].mxu1 }
 0x295   : > { %v3009_v6 = vpop.f32.mrb[3].mxu1 }
 0x296   : > { %v2973_v8 = vpop.f32.mrb[2].mxu0  ;;  %v3010_v24 = vadd.f32 %v3009_v6, %v3008_v50 }
 0x297   : > { %v2974_v38 = vpop.f32.mrb[3].mxu0 }
 0x298   : > { %v2975_v44 = vadd.f32 %v2974_v38, %v2973_v8 }
 0x29a   : > { %v2270_v36 = vadd.f32 %v2975_v44, %v2200_v27 }
 0x29c   : > { %v2340_v2 = vadd.f32 %v3010_v24, %v2270_v36 }
 0x2b4   : > { %v3078_v32 = vpop.f32.mrb[4].mxu1 }
 0x2b5   : > { %v3079_v16 = vpop.f32.mrb[5].mxu1 }
 0x2b6   : > { %v3043_v22 = vpop.f32.mrb[4].mxu0  ;;  %v3080_v7 = vadd.f32 %v3079_v16, %v3078_v32 }
 0x2b7   : > { %v3044_v31 = vpop.f32.mrb[5].mxu0 }
 0x2b8   : > { %v3045_v45 = vadd.f32 %v3044_v31, %v3043_v22 }
 0x2ba   : > { %v2410_v43 = vadd.f32 %v3045_v45, %v2340_v2 }
 0x2bc   : > { %v2480_v55 = vadd.f32 %v3080_v7, %v2410_v43 }
 0x2d4   : > { %v3148_v28 = vpop.f32.mrb[6].mxu1 }
 0x2d5   : > { %v3149_v29 = vpop.f32.mrb[7].mxu1 }
 0x2d6   : > { %v3113_v48 = vpop.f32.mrb[6].mxu0  ;;  %v3150_v4 = vadd.f32 %v3149_v29, %v3148_v28 }
 0x2d7   : > { %v3114_v11 = vpop.f32.mrb[7].mxu0 }
 0x2d8   : > { %v3115_v51 = vadd.f32 %v3114_v11, %v3113_v48 }
 0x2da   : > { %v2550_v54 = vadd.f32 %v3115_v51, %v2480_v55 }
 0x2dc   : > { %v2620_v46 = vadd.f32 %v3150_v4, %v2550_v54 }
 0x2f6   : > { %v3183_v47 = vpop.f32.mrb[8].mxu0 }
 0x2f7   : > { %v3184_v12 = vpop.f32.mrb[9].mxu0 }
 0x2f8   : > { %v3185_v42 = vadd.f32 %v3184_v12, %v3183_v47 }
 0x2fa   : > { %v2701_v52 = vadd.f32 %v3185_v42, %v2620_v46 }
 0x2fc   : > { %v2711_v1 = vadd.f32 %v2860_v37, %v2701_v52 }
 0x2fe   : > { %2712 = vst [vmem:[#allocation13] sm:$0x3] %v2711_v1 }
 0x2ff PF: > { %p3528_p6 = scmp.eq.s32.totalorder %s3855_s24, 2  ;;  %s3795_s21 = smov [#allocation13]  }
 0x300   : > { %s2722_s29 = sshll.u32 %s3795_s21, 4  ;;  %s2723_s29 = int_to_ptr.vmem [resolvable:$true] %s2722_s29 }
 0x301   : > { %s3682_s6 = scalar_lea.vmem %s2723_s29, 32  ;;  %p3689_p5 = scmp.lt.s32.totalorder %s2723_s29, %s2723_s29 }
 0x302   : > { %p3683_p7 = scmp.ne.s32.totalorder %s2723_s29, %s3682_s6  ;;  %p3690_p0 = scmp.lt.s32.totalorder %s3682_s6, %s3682_s6 }
 0x304   : > { %p3684_p9 = pnand %p3683_p7, %p3528_p6  ;;  %p3691_p12 = por %p3690_p0, %p3689_p5 }
 0x306   : > { %p3685_p11 = pneg %p3684_p9 }
 0x308   : > { %p3692_p3 = pnand %p3691_p12, %p3685_p11 }
 0x30a   : > { %3695 = shalt.err (!%p3692_p3)
}
 0x30b   : > { %s3696_s3 = scalar_lea.hbm %s4741_s5, 32 }
 0x30c   : > { %p3697_p8 = scmp.ne.s32.totalorder %s4741_s5, %s3696_s3  ;;  %p3702_p1 = scmp.lt.u32.totalorder %s3696_s3, %s4741_s5 }
 0x30e   : > { %p3698_p10 = pnand %p3697_p8, %p3528_p6 }
 0x310   : > { %p3699_p13 = pneg %p3698_p10 }
 0x312   : > { %p3704_p2 = pnand %p3702_p1, %p3699_p13 }
 0x314   : > { %3707 = shalt.err (!%p3704_p2)
}
 0x315   : > { %3509 = dma.vmem_to_hbm [thread:$0]  (%p3528_p6), %s2723_s29, 32, %s4741_s5, [#allocation6]  }
 0x316   : > { %3749 = dma.done.wait (%p3528_p6), [#allocation6], 32  }
 0x317   : > { %3751 = vsyncadd (%p3528_p6), [#allocation6], 4294967264 }
 0x318 PF: > { %s23_s23 = sadd.s32 1, %s3774_s23   ;;  %s4766_s12 = sld [smem:[#allocation25_spill]] }
 0x319   : > { %p20_p4 = scmp.ge.s32.totalorder %s23_s23, 5   ;;  %s4767_s18 = smov %s3758_s19 }
 0x31a   : > { %s4768_s19 = smov %s3762_s20  ;;  %s4769_s20 = smov %s3881_s30 }
 0x31b   : > { %s4770_s21 = smov %s3770_s22  ;;  %22 = sbr.rel (!%p20_p4) target bundleno = 10 (0xa), region = 121 }
 0x31e   : > { %s4771_s22 = smov %s4766_s12 }
 0x322   :  { %2735 = vsyncpa [#allocation5], 1 }
 0x323   :  { %2737 = vsyncpa [#allocation5 + $0x1], 1 }
 0x324   :  { %2738 = vsyncpa [#allocation8], 1 }
 0x325   :  { %2740 = vsyncpa [#allocation8 + $0x1], 1 }
 0x326   :  { %2741 = vsyncpa [#allocation11], 1 }
 0x327   :  { %2742 = vsyncpa [#allocation6], 1 }
 0x328   :  { %2744 = vsyncpa [#allocation6 + $0x1], 1 }

</bundles_post_ra>
